<compile_context>
chip_gen: v6e
topology: v6e:2x2x1
jax: 0.10.0
libtpu: 0.0.40
codegen_flags: <defaults>
</compile_context>

<pallas_src>
import functools

import numpy as np

import jax
import jax.numpy as jnp
from jax import lax
from jax.experimental import pallas as pl
from jax.experimental.pallas import tpu as pltpu


# ---------------------------------------------------------------------------
# Pallas kernels
# ---------------------------------------------------------------------------
def _conv_relu_pool_kernel(s_ref, te_ref, to_ref, b_ref, o_ref):
    """Fused 3x3 conv (pad=1) + bias + ReLU + 2x2/stride-2 maxpool for a block of images.

    s_ref : (4, M, K)   pre-gathered row slabs; slab r holds padded input rows 2*h'+r
                        for every (image, pooled-row h'), rows image-major / h'-minor,
                        columns ci-major / padded-width-minor.
    te_ref: (3, K, N)   Toeplitz weights -> even output columns (one matrix per kh)
    to_ref: (3, K, N)   Toeplitz weights -> odd  output columns
    b_ref : (1, N)      bias in the pooled / lane-padded output column layout
    o_ref : (M, N)      pooled output rows (image-major / h'-minor), N multiple of 128
    """
    slabs = [s_ref[r] for r in range(4)]
    pooled = None
    for dh in (0, 1):                           # row parity inside the 2x2 window
        for t_par in (te_ref, to_ref):          # column parity inside the 2x2 window
            acc = jnp.dot(slabs[dh], t_par[0], preferred_element_type=jnp.float32)
            for kh in (1, 2):
                acc += jnp.dot(slabs[dh + kh], t_par[kh],
                               preferred_element_type=jnp.float32)
            pooled = acc if pooled is None else jnp.maximum(pooled, acc)
    # relu(maxpool(conv) + bias) == maxpool(relu(conv + bias)): bias is per-column const
    # and both relu/max are monotone.
    o_ref[...] = jnp.maximum(pooled + b_ref[...], 0.0).astype(o_ref.dtype)


def _fc_fused_kernel(x_ref, w1_ref, b1_ref, w2_ref, b2_ref, o_ref):
    """Fused fc1 + ReLU + fc2 on a (TM, K) row tile; intermediate stays on-chip."""
    h = jnp.dot(x_ref[...], w1_ref[...], preferred_element_type=jnp.float32) + b1_ref[...]
    h = jnp.maximum(h, 0.0)
    o_ref[...] = (jnp.dot(h, w2_ref[...], preferred_element_type=jnp.float32)
                  + b2_ref[...]).astype(o_ref.dtype)


# ---------------------------------------------------------------------------
# Pallas wrappers
# ---------------------------------------------------------------------------
def conv_relu_pool(slabs, t_even, t_odd, bias_row, ho, img_blk):
    """slabs: (4, B*ho, K) -> pooled (B*ho, N); img_blk images per grid step."""
    _, BH, K = slabs.shape
    N = t_even.shape[2]
    m_blk = img_blk * ho
    return pl.pallas_call(
        _conv_relu_pool_kernel,
        out_shape=jax.ShapeDtypeStruct((BH, N), jnp.float32),
        grid=(BH // m_blk,),
        in_specs=[
            pl.BlockSpec((4, m_blk, K), lambda i: (0, i, 0)),
            pl.BlockSpec((3, K, N), lambda i: (0, 0, 0)),
            pl.BlockSpec((3, K, N), lambda i: (0, 0, 0)),
            pl.BlockSpec((1, N), lambda i: (0, 0)),
        ],
        out_specs=pl.BlockSpec((m_blk, N), lambda i: (i, 0)),
        compiler_params=pltpu.CompilerParams(dimension_semantics=("parallel",)),
    )(slabs, t_even, t_odd, bias_row)


def fc1_relu_fc2(x, w1, b1, w2, b2, tile_m=512):
    """x: (B, K) -> (B, N2); tiled over batch rows, weights resident full-block."""
    B, K = x.shape
    N1, N2 = w1.shape[1], w2.shape[1]
    tm = B if B <= tile_m else tile_m
    return pl.pallas_call(
        _fc_fused_kernel,
        out_shape=jax.ShapeDtypeStruct((B, N2), jnp.float32),
        grid=(pl.cdiv(B, tm),),
        in_specs=[
            pl.BlockSpec((tm, K), lambda i: (i, 0)),
            pl.BlockSpec((K, N1), lambda i: (0, 0)),
            pl.BlockSpec((1, N1), lambda i: (0, 0)),
            pl.BlockSpec((N1, N2), lambda i: (0, 0)),
            pl.BlockSpec((1, N2), lambda i: (0, 0)),
        ],
        out_specs=pl.BlockSpec((tm, N2), lambda i: (i, 0)),
        compiler_params=pltpu.CompilerParams(dimension_semantics=("parallel",)),
    )(x, w1, b1, w2, b2)


# ---------------------------------------------------------------------------
# One-time parameter preparation (outside the jitted forward)
# ---------------------------------------------------------------------------
def _build_conv_stage(w_oihw, b_c, W, col_blk):
    """Toeplitz weights for even/odd pooled output columns + bias row.

    Input slab columns : ci * (W+2) + wp   (wp = padded width index)
    Output columns     : co * col_blk + (wq + col_off), lane-padded to a 128 multiple.
    conv1 (col_blk = Wo+2) keeps one zero column on each side of every co block so its
    output doubles as conv2's width padding; conv2 (col_blk = Wo+1) pads at the end.
    """
    w = np.asarray(w_oihw, np.float32)
    Cout, Cin, KH, KW = w.shape
    Wp = W + 2
    Wo = W // 2
    col_off = 1 if col_blk == Wo + 2 else 0
    K, N = Cin * Wp, Cout * col_blk
    te = np.zeros((KH, K, N), np.float32)
    to = np.zeros((KH, K, N), np.float32)
    ci_rows = np.arange(Cin) * Wp
    co_cols = np.arange(Cout) * col_blk
    for kh in range(KH):
        for kw in range(KW):
            wk = w[:, :, kh, kw].T                      # (Cin, Cout)
            for wq in range(Wo):
                rows_e = ci_rows + 2 * wq + kw          # even output col: wp = 2*wq + kw
                cols = co_cols + wq + col_off
                te[kh, rows_e[:, None], cols[None, :]] = wk
                to[kh, (rows_e + 1)[:, None], cols[None, :]] = wk   # odd: wp = 2*wq+1+kw
    bias = np.zeros((1, N), np.float32)
    b = np.asarray(b_c, np.float32)
    for co in range(Cout):
        bias[0, co * col_blk + col_off: co * col_blk + col_off + Wo] = b[co]
    return te, to, bias


def prepare_params(params):
    t1e, t1o, b1r = _build_conv_stage(params["w1"], params["b1"], 28, col_blk=16)  # N=256
    t2e, t2o, b2r = _build_conv_stage(params["w2"], params["b2"], 14, col_blk=8)   # N=256
    # fc1 rows: PyTorch flatten order (co, h, w) -> our layout h*256 + co*8 + w, with a
    # zero row at the padded w == 7 slot of every (h, co) block.
    w_fc1 = np.asarray(params["w_fc1"], np.float32)                # (128, 1568)
    w4 = w_fc1.reshape(128, 32, 7, 7).transpose(2, 1, 3, 0)        # (h, co, w, out)
    w4 = np.pad(w4, ((0, 0), (0, 0), (0, 1), (0, 0)))              # pad w: 7 -> 8
    w1fc = np.ascontiguousarray(w4.reshape(7 * 32 * 8, 128))       # (1792, 128)
    b1fc = np.asarray(params["b_fc1"], np.float32).reshape(1, 128)
    # fc2: transpose + zero-pad N 10 -> 128 so the final store is lane-dense.
    w_fc2 = np.asarray(params["w_fc2"], np.float32)                # (10, 128)
    w2fc = np.zeros((128, 128), np.float32)
    w2fc[:, :10] = w_fc2.T
    b2fc = np.zeros((1, 128), np.float32)
    b2fc[0, :10] = np.asarray(params["b_fc2"], np.float32)
    prep = dict(t1e=t1e, t1o=t1o, b1r=b1r, t2e=t2e, t2o=t2o, b2r=b2r,
                w1fc=w1fc, b1fc=b1fc, w2fc=w2fc, b2fc=b2fc)
    return {k: jnp.asarray(v) for k, v in prep.items()}


def init_params(key):
    ks = jax.random.split(key, 8)
    s = 0.05
    return {
        "w1": jax.random.normal(ks[0], (16, 1, 3, 3), jnp.float32) * s,
        "b1": jax.random.normal(ks[1], (16,), jnp.float32) * s,
        "w2": jax.random.normal(ks[2], (32, 16, 3, 3), jnp.float32) * s,
        "b2": jax.random.normal(ks[3], (32,), jnp.float32) * s,
        "w_fc1": jax.random.normal(ks[4], (128, 7 * 7 * 32), jnp.float32) * s,
        "b_fc1": jax.random.normal(ks[5], (128,), jnp.float32) * s,
        "w_fc2": jax.random.normal(ks[6], (10, 128), jnp.float32) * s,
        "b_fc2": jax.random.normal(ks[7], (10,), jnp.float32) * s,
    }


# ---------------------------------------------------------------------------
# Forward pass
# ---------------------------------------------------------------------------
def _gather_pool_slabs(x_pad, ho):
    """x_pad: (B, Hp, K) -> (4, B*ho, K); slab r holds padded rows 2*h' + r per image."""
    B, _, K = x_pad.shape
    slabs = jnp.stack([x_pad[:, r:r + 2 * ho:2, :] for r in range(4)], axis=0)
    return slabs.reshape(4, B * ho, K)


@functools.partial(jax.jit, static_argnames=("img_blk",))
def cnn_forward(x_nchw, prep, img_blk=8):
    B = x_nchw.shape[0]
    blk = min(img_blk, B)
    Bp = -(-B // blk) * blk
    x = x_nchw if Bp == B else jnp.pad(x_nchw, ((0, Bp - B), (0, 0), (0, 0), (0, 0)))

    # conv1 stage: pad to (Bp, 30, 30) (Cin=1 -> columns already wp-minor), gather the
    # four pool-row slabs, run the fused kernel.  Output columns are already conv2's
    # padded-width layout (co*16 + wp), 256 lanes wide.
    x2 = jnp.pad(x[:, 0, :, :], ((0, 0), (1, 1), (1, 1)))                        # (Bp,30,30)
    s1 = _gather_pool_slabs(x2, 14)                                              # (4,Bp*14,30)
    p1 = conv_relu_pool(s1, prep["t1e"], prep["t1o"], prep["b1r"], 14, blk)      # (Bp*14,256)

    # conv2 stage: only the two height-padding rows need to be added.
    x2b = jnp.pad(p1.reshape(Bp, 14, 256), ((0, 0), (1, 1), (0, 0)))             # (Bp,16,256)
    s2 = _gather_pool_slabs(x2b, 7)                                              # (4,Bp*7,256)
    p2 = conv_relu_pool(s2, prep["t2e"], prep["t2o"], prep["b2r"], 7, blk)       # (Bp*7,256)

    # fc: flatten in (h, co, w-padded) order -- w1fc rows were pre-permuted/padded.
    xf = p2.reshape(Bp, 7 * 256)                                                 # (Bp,1792)
    logits = fc1_relu_fc2(xf, prep["w1fc"], prep["b1fc"], prep["w2fc"], prep["b2fc"])
    return logits[:B, :10]


# ---------------------------------------------------------------------------
# Pure-JAX reference (mirrors PyTorch semantics) for a sanity check
# ---------------------------------------------------------------------------
def reference_forward(x, p):
    dn = ("NCHW", "OIHW", "NCHW")
    y = lax.conv_general_dilated(x, p["w1"], (1, 1), ((1, 1), (1, 1)),
                                 dimension_numbers=dn) + p["b1"][None, :, None, None]
    y = jnp.maximum(y, 0.0)
    y = lax.reduce_window(y, -jnp.inf, lax.max, (1, 1, 2, 2), (1, 1, 2, 2), "VALID")
    y = lax.conv_general_dilated(y, p["w2"], (1, 1), ((1, 1), (1, 1)),
                                 dimension_numbers=dn) + p["b2"][None, :, None, None]
    y = jnp.maximum(y, 0.0)
    y = lax.reduce_window(y, -jnp.inf, lax.max, (1, 1, 2, 2), (1, 1, 2, 2), "VALID")
    y = y.reshape(y.shape[0], -1)
    y = jnp.maximum(y @ p["w_fc1"].T + p["b_fc1"], 0.0)
    return y @ p["w_fc2"].T + p["b_fc2"]


if __name__ == "__main__":
    key = jax.random.PRNGKey(0)
    kx, kp = jax.random.split(key)
    # Input shape implied by fc1 = Linear(7*7*32, 128): (B, 1, 28, 28)
    x = jax.random.normal(kx, (2, 1, 28, 28), jnp.float32)
    params = init_params(kp)
    prep = prepare_params(params)

    out = jax.block_until_ready(cnn_forward(x, prep))
    assert out.shape == (2, 10) and out.dtype == jnp.float32

    ref = reference_forward(x, params)
    assert jnp.allclose(out, ref, rtol=1e-3, atol=1e-3), "mismatch vs. reference"

    print("KERNEL_OK")
</pallas_src>

<mosaic_0001>
module attributes {stable_mosaic.version = 11 : i64} {
  func.func @_conv_relu_pool_kernel(%arg0: i32, %arg1: memref<4x28x30xf32, #tpu.memory_space<vmem>>, %arg2: memref<3x30x256xf32, #tpu.memory_space<vmem>>, %arg3: memref<3x30x256xf32, #tpu.memory_space<vmem>>, %arg4: memref<1x256xf32, #tpu.memory_space<vmem>>, %arg5: memref<28x256xf32, #tpu.memory_space<vmem>>) attributes {dimension_semantics = [#tpu.dimension_semantics<parallel>], iteration_bounds = array<i64: 1>, scalar_prefetch = 0 : i64, scratch_operands = 0 : i64, tpu.core_type = #tpu.core_type<tc>, window_params = [{transform_indices = @transform_0, window_bounds = array<i64: 4, 28, 30>}, {pipeline_mode = #tpu.pipeline_mode<synchronous>, transform_indices = @transform_1, window_bounds = array<i64: 3, 30, 256>}, {pipeline_mode = #tpu.pipeline_mode<synchronous>, transform_indices = @transform_2, window_bounds = array<i64: 3, 30, 256>}, {pipeline_mode = #tpu.pipeline_mode<synchronous>, transform_indices = @transform_3, window_bounds = array<i64: 1, 256>}, {transform_indices = @transform_4, window_bounds = array<i64: 28, 256>}]} {
    %c0 = arith.constant 0 : index
    %c0_0 = arith.constant 0 : index
    %c0_1 = arith.constant 0 : index
    %0 = vector.load %arg1[%c0, %c0_0, %c0_1] : memref<4x28x30xf32, #tpu.memory_space<vmem>>, vector<1x28x30xf32>
    %1 = vector.shape_cast %0 : vector<1x28x30xf32> to vector<28x30xf32>
    %c1 = arith.constant 1 : index
    %c0_2 = arith.constant 0 : index
    %c0_3 = arith.constant 0 : index
    %2 = vector.load %arg1[%c1, %c0_2, %c0_3] : memref<4x28x30xf32, #tpu.memory_space<vmem>>, vector<1x28x30xf32>
    %3 = vector.shape_cast %2 : vector<1x28x30xf32> to vector<28x30xf32>
    %c2 = arith.constant 2 : index
    %c0_4 = arith.constant 0 : index
    %c0_5 = arith.constant 0 : index
    %4 = vector.load %arg1[%c2, %c0_4, %c0_5] : memref<4x28x30xf32, #tpu.memory_space<vmem>>, vector<1x28x30xf32>
    %5 = vector.shape_cast %4 : vector<1x28x30xf32> to vector<28x30xf32>
    %c3 = arith.constant 3 : index
    %c0_6 = arith.constant 0 : index
    %c0_7 = arith.constant 0 : index
    %6 = vector.load %arg1[%c3, %c0_6, %c0_7] : memref<4x28x30xf32, #tpu.memory_space<vmem>>, vector<1x28x30xf32>
    %7 = vector.shape_cast %6 : vector<1x28x30xf32> to vector<28x30xf32>
    %c0_8 = arith.constant 0 : index
    %c0_9 = arith.constant 0 : index
    %c0_10 = arith.constant 0 : index
    %8 = vector.load %arg2[%c0_8, %c0_9, %c0_10] : memref<3x30x256xf32, #tpu.memory_space<vmem>>, vector<1x30x256xf32>
    %9 = vector.shape_cast %8 : vector<1x30x256xf32> to vector<30x256xf32>
    %cst = arith.constant dense<0.000000e+00> : vector<28x256xf32>
    %10 = tpu.matmul %1, %9, %cst {dimension_numbers = #tpu.dot_dimension_numbers<[1], [0], [0], [1], [0, 0, 1, 1], [], []>} : vector<28x30xf32>, vector<30x256xf32>, vector<28x256xf32> -> vector<28x256xf32>
    %c1_11 = arith.constant 1 : index
    %c0_12 = arith.constant 0 : index
    %c0_13 = arith.constant 0 : index
    %11 = vector.load %arg2[%c1_11, %c0_12, %c0_13] : memref<3x30x256xf32, #tpu.memory_space<vmem>>, vector<1x30x256xf32>
    %12 = vector.shape_cast %11 : vector<1x30x256xf32> to vector<30x256xf32>
    %cst_14 = arith.constant dense<0.000000e+00> : vector<28x256xf32>
    %13 = tpu.matmul %3, %12, %cst_14 {dimension_numbers = #tpu.dot_dimension_numbers<[1], [0], [0], [1], [0, 0, 1, 1], [], []>} : vector<28x30xf32>, vector<30x256xf32>, vector<28x256xf32> -> vector<28x256xf32>
    %14 = arith.addf %10, %13 : vector<28x256xf32>
    %c2_15 = arith.constant 2 : index
    %c0_16 = arith.constant 0 : index
    %c0_17 = arith.constant 0 : index
    %15 = vector.load %arg2[%c2_15, %c0_16, %c0_17] : memref<3x30x256xf32, #tpu.memory_space<vmem>>, vector<1x30x256xf32>
    %16 = vector.shape_cast %15 : vector<1x30x256xf32> to vector<30x256xf32>
    %cst_18 = arith.constant dense<0.000000e+00> : vector<28x256xf32>
    %17 = tpu.matmul %5, %16, %cst_18 {dimension_numbers = #tpu.dot_dimension_numbers<[1], [0], [0], [1], [0, 0, 1, 1], [], []>} : vector<28x30xf32>, vector<30x256xf32>, vector<28x256xf32> -> vector<28x256xf32>
    %18 = arith.addf %14, %17 : vector<28x256xf32>
    %c0_19 = arith.constant 0 : index
    %c0_20 = arith.constant 0 : index
    %c0_21 = arith.constant 0 : index
    %19 = vector.load %arg3[%c0_19, %c0_20, %c0_21] : memref<3x30x256xf32, #tpu.memory_space<vmem>>, vector<1x30x256xf32>
    %20 = vector.shape_cast %19 : vector<1x30x256xf32> to vector<30x256xf32>
    %cst_22 = arith.constant dense<0.000000e+00> : vector<28x256xf32>
    %21 = tpu.matmul %1, %20, %cst_22 {dimension_numbers = #tpu.dot_dimension_numbers<[1], [0], [0], [1], [0, 0, 1, 1], [], []>} : vector<28x30xf32>, vector<30x256xf32>, vector<28x256xf32> -> vector<28x256xf32>
    %c1_23 = arith.constant 1 : index
    %c0_24 = arith.constant 0 : index
    %c0_25 = arith.constant 0 : index
    %22 = vector.load %arg3[%c1_23, %c0_24, %c0_25] : memref<3x30x256xf32, #tpu.memory_space<vmem>>, vector<1x30x256xf32>
    %23 = vector.shape_cast %22 : vector<1x30x256xf32> to vector<30x256xf32>
    %cst_26 = arith.constant dense<0.000000e+00> : vector<28x256xf32>
    %24 = tpu.matmul %3, %23, %cst_26 {dimension_numbers = #tpu.dot_dimension_numbers<[1], [0], [0], [1], [0, 0, 1, 1], [], []>} : vector<28x30xf32>, vector<30x256xf32>, vector<28x256xf32> -> vector<28x256xf32>
    %25 = arith.addf %21, %24 : vector<28x256xf32>
    %c2_27 = arith.constant 2 : index
    %c0_28 = arith.constant 0 : index
    %c0_29 = arith.constant 0 : index
    %26 = vector.load %arg3[%c2_27, %c0_28, %c0_29] : memref<3x30x256xf32, #tpu.memory_space<vmem>>, vector<1x30x256xf32>
    %27 = vector.shape_cast %26 : vector<1x30x256xf32> to vector<30x256xf32>
    %cst_30 = arith.constant dense<0.000000e+00> : vector<28x256xf32>
    %28 = tpu.matmul %5, %27, %cst_30 {dimension_numbers = #tpu.dot_dimension_numbers<[1], [0], [0], [1], [0, 0, 1, 1], [], []>} : vector<28x30xf32>, vector<30x256xf32>, vector<28x256xf32> -> vector<28x256xf32>
    %29 = arith.addf %25, %28 : vector<28x256xf32>
    %30 = arith.maximumf %18, %29 : vector<28x256xf32>
    %c0_31 = arith.constant 0 : index
    %c0_32 = arith.constant 0 : index
    %c0_33 = arith.constant 0 : index
    %31 = vector.load %arg2[%c0_31, %c0_32, %c0_33] : memref<3x30x256xf32, #tpu.memory_space<vmem>>, vector<1x30x256xf32>
    %32 = vector.shape_cast %31 : vector<1x30x256xf32> to vector<30x256xf32>
    %cst_34 = arith.constant dense<0.000000e+00> : vector<28x256xf32>
    %33 = tpu.matmul %3, %32, %cst_34 {dimension_numbers = #tpu.dot_dimension_numbers<[1], [0], [0], [1], [0, 0, 1, 1], [], []>} : vector<28x30xf32>, vector<30x256xf32>, vector<28x256xf32> -> vector<28x256xf32>
    %c1_35 = arith.constant 1 : index
    %c0_36 = arith.constant 0 : index
    %c0_37 = arith.constant 0 : index
    %34 = vector.load %arg2[%c1_35, %c0_36, %c0_37] : memref<3x30x256xf32, #tpu.memory_space<vmem>>, vector<1x30x256xf32>
    %35 = vector.shape_cast %34 : vector<1x30x256xf32> to vector<30x256xf32>
    %cst_38 = arith.constant dense<0.000000e+00> : vector<28x256xf32>
    %36 = tpu.matmul %5, %35, %cst_38 {dimension_numbers = #tpu.dot_dimension_numbers<[1], [0], [0], [1], [0, 0, 1, 1], [], []>} : vector<28x30xf32>, vector<30x256xf32>, vector<28x256xf32> -> vector<28x256xf32>
    %37 = arith.addf %33, %36 : vector<28x256xf32>
    %c2_39 = arith.constant 2 : index
    %c0_40 = arith.constant 0 : index
    %c0_41 = arith.constant 0 : index
    %38 = vector.load %arg2[%c2_39, %c0_40, %c0_41] : memref<3x30x256xf32, #tpu.memory_space<vmem>>, vector<1x30x256xf32>
    %39 = vector.shape_cast %38 : vector<1x30x256xf32> to vector<30x256xf32>
    %cst_42 = arith.constant dense<0.000000e+00> : vector<28x256xf32>
    %40 = tpu.matmul %7, %39, %cst_42 {dimension_numbers = #tpu.dot_dimension_numbers<[1], [0], [0], [1], [0, 0, 1, 1], [], []>} : vector<28x30xf32>, vector<30x256xf32>, vector<28x256xf32> -> vector<28x256xf32>
    %41 = arith.addf %37, %40 : vector<28x256xf32>
    %42 = arith.maximumf %30, %41 : vector<28x256xf32>
    %c0_43 = arith.constant 0 : index
    %c0_44 = arith.constant 0 : index
    %c0_45 = arith.constant 0 : index
    %43 = vector.load %arg3[%c0_43, %c0_44, %c0_45] : memref<3x30x256xf32, #tpu.memory_space<vmem>>, vector<1x30x256xf32>
    %44 = vector.shape_cast %43 : vector<1x30x256xf32> to vector<30x256xf32>
    %cst_46 = arith.constant dense<0.000000e+00> : vector<28x256xf32>
    %45 = tpu.matmul %3, %44, %cst_46 {dimension_numbers = #tpu.dot_dimension_numbers<[1], [0], [0], [1], [0, 0, 1, 1], [], []>} : vector<28x30xf32>, vector<30x256xf32>, vector<28x256xf32> -> vector<28x256xf32>
    %c1_47 = arith.constant 1 : index
    %c0_48 = arith.constant 0 : index
    %c0_49 = arith.constant 0 : index
    %46 = vector.load %arg3[%c1_47, %c0_48, %c0_49] : memref<3x30x256xf32, #tpu.memory_space<vmem>>, vector<1x30x256xf32>
    %47 = vector.shape_cast %46 : vector<1x30x256xf32> to vector<30x256xf32>
    %cst_50 = arith.constant dense<0.000000e+00> : vector<28x256xf32>
    %48 = tpu.matmul %5, %47, %cst_50 {dimension_numbers = #tpu.dot_dimension_numbers<[1], [0], [0], [1], [0, 0, 1, 1], [], []>} : vector<28x30xf32>, vector<30x256xf32>, vector<28x256xf32> -> vector<28x256xf32>
    %49 = arith.addf %45, %48 : vector<28x256xf32>
    %c2_51 = arith.constant 2 : index
    %c0_52 = arith.constant 0 : index
    %c0_53 = arith.constant 0 : index
    %50 = vector.load %arg3[%c2_51, %c0_52, %c0_53] : memref<3x30x256xf32, #tpu.memory_space<vmem>>, vector<1x30x256xf32>
    %51 = vector.shape_cast %50 : vector<1x30x256xf32> to vector<30x256xf32>
    %cst_54 = arith.constant dense<0.000000e+00> : vector<28x256xf32>
    %52 = tpu.matmul %7, %51, %cst_54 {dimension_numbers = #tpu.dot_dimension_numbers<[1], [0], [0], [1], [0, 0, 1, 1], [], []>} : vector<28x30xf32>, vector<30x256xf32>, vector<28x256xf32> -> vector<28x256xf32>
    %53 = arith.addf %49, %52 : vector<28x256xf32>
    %54 = arith.maximumf %42, %53 : vector<28x256xf32>
    %c0_55 = arith.constant 0 : index
    %c0_56 = arith.constant 0 : index
    %55 = vector.load %arg4[%c0_55, %c0_56] : memref<1x256xf32, #tpu.memory_space<vmem>>, vector<1x256xf32>
    %56 = vector.broadcast %55 : vector<1x256xf32> to vector<28x256xf32>
    %57 = arith.addf %54, %56 : vector<28x256xf32>
    %cst_57 = arith.constant 0.000000e+00 : f32
    %58 = vector.broadcast %cst_57 : f32 to vector<28x256xf32>
    %59 = arith.maximumf %57, %58 : vector<28x256xf32>
    %c0_58 = arith.constant 0 : index
    %c0_59 = arith.constant 0 : index
    %60 = vector.load %arg5[%c0_58, %c0_59] : memref<28x256xf32, #tpu.memory_space<vmem>>, vector<28x256xf32>
    tpu.vector_store %arg5[%c0_58, %c0_59], %59 {strides = array<i32>} : memref<28x256xf32, #tpu.memory_space<vmem>>, vector<28x256xf32>,
    return
  }
  func.func @transform_0(%arg0: i32) -> (i32, i32, i32) {
    %c0_i32 = arith.constant 0 : i32
    %c0_i32_0 = arith.constant 0 : i32
    %c0_i32_1 = arith.constant 0 : i32
    return %c0_i32, %arg0, %c0_i32_0 : i32, i32, i32
  }
  func.func @transform_1(%arg0: i32) -> (i32, i32, i32) {
    %c0_i32 = arith.constant 0 : i32
    %c0_i32_0 = arith.constant 0 : i32
    %c0_i32_1 = arith.constant 0 : i32
    %c0_i32_2 = arith.constant 0 : i32
    return %c0_i32, %c0_i32_0, %c0_i32_1 : i32, i32, i32
  }
  func.func @transform_2(%arg0: i32) -> (i32, i32, i32) {
    %c0_i32 = arith.constant 0 : i32
    %c0_i32_0 = arith.constant 0 : i32
    %c0_i32_1 = arith.constant 0 : i32
    %c0_i32_2 = arith.constant 0 : i32
    return %c0_i32, %c0_i32_0, %c0_i32_1 : i32, i32, i32
  }
  func.func @transform_3(%arg0: i32) -> (i32, i32) {
    %c0_i32 = arith.constant 0 : i32
    %c0_i32_0 = arith.constant 0 : i32
    %c0_i32_1 = arith.constant 0 : i32
    return %c0_i32, %c0_i32_0 : i32, i32
  }
  func.func @transform_4(%arg0: i32) -> (i32, i32) {
    %c0_i32 = arith.constant 0 : i32
    %c0_i32_0 = arith.constant 0 : i32
    return %arg0, %c0_i32 : i32, i32
  }
}

module attributes {stable_mosaic.version = 11 : i64} {
  func.func @_conv_relu_pool_kernel(%arg0: i32, %arg1: memref<4x14x256xf32, #tpu.memory_space<vmem>>, %arg2: memref<3x256x256xf32, #tpu.memory_space<vmem>>, %arg3: memref<3x256x256xf32, #tpu.memory_space<vmem>>, %arg4: memref<1x256xf32, #tpu.memory_space<vmem>>, %arg5: memref<14x256xf32, #tpu.memory_space<vmem>>) attributes {dimension_semantics = [#tpu.dimension_semantics<parallel>], iteration_bounds = array<i64: 1>, scalar_prefetch = 0 : i64, scratch_operands = 0 : i64, tpu.core_type = #tpu.core_type<tc>, window_params = [{transform_indices = @transform_0, window_bounds = array<i64: 4, 14, 256>}, {pipeline_mode = #tpu.pipeline_mode<synchronous>, transform_indices = @transform_1, window_bounds = array<i64: 3, 256, 256>}, {pipeline_mode = #tpu.pipeline_mode<synchronous>, transform_indices = @transform_2, window_bounds = array<i64: 3, 256, 256>}, {pipeline_mode = #tpu.pipeline_mode<synchronous>, transform_indices = @transform_3, window_bounds = array<i64: 1, 256>}, {transform_indices = @transform_4, window_bounds = array<i64: 14, 256>}]} {
    %c0 = arith.constant 0 : index
    %c0_0 = arith.constant 0 : index
    %c0_1 = arith.constant 0 : index
    %0 = vector.load %arg1[%c0, %c0_0, %c0_1] : memref<4x14x256xf32, #tpu.memory_space<vmem>>, vector<1x14x256xf32>
    %1 = vector.shape_cast %0 : vector<1x14x256xf32> to vector<14x256xf32>
    %c1 = arith.constant 1 : index
    %c0_2 = arith.constant 0 : index
    %c0_3 = arith.constant 0 : index
    %2 = vector.load %arg1[%c1, %c0_2, %c0_3] : memref<4x14x256xf32, #tpu.memory_space<vmem>>, vector<1x14x256xf32>
    %3 = vector.shape_cast %2 : vector<1x14x256xf32> to vector<14x256xf32>
    %c2 = arith.constant 2 : index
    %c0_4 = arith.constant 0 : index
    %c0_5 = arith.constant 0 : index
    %4 = vector.load %arg1[%c2, %c0_4, %c0_5] : memref<4x14x256xf32, #tpu.memory_space<vmem>>, vector<1x14x256xf32>
    %5 = vector.shape_cast %4 : vector<1x14x256xf32> to vector<14x256xf32>
    %c3 = arith.constant 3 : index
    %c0_6 = arith.constant 0 : index
    %c0_7 = arith.constant 0 : index
    %6 = vector.load %arg1[%c3, %c0_6, %c0_7] : memref<4x14x256xf32, #tpu.memory_space<vmem>>, vector<1x14x256xf32>
    %7 = vector.shape_cast %6 : vector<1x14x256xf32> to vector<14x256xf32>
    %c0_8 = arith.constant 0 : index
    %c0_9 = arith.constant 0 : index
    %c0_10 = arith.constant 0 : index
    %8 = vector.load %arg2[%c0_8, %c0_9, %c0_10] : memref<3x256x256xf32, #tpu.memory_space<vmem>>, vector<1x256x256xf32>
    %9 = vector.shape_cast %8 : vector<1x256x256xf32> to vector<256x256xf32>
    %cst = arith.constant dense<0.000000e+00> : vector<14x256xf32>
    %10 = tpu.matmul %1, %9, %cst {dimension_numbers = #tpu.dot_dimension_numbers<[1], [0], [0], [1], [0, 0, 1, 1], [], []>} : vector<14x256xf32>, vector<256x256xf32>, vector<14x256xf32> -> vector<14x256xf32>
    %c1_11 = arith.constant 1 : index
    %c0_12 = arith.constant 0 : index
    %c0_13 = arith.constant 0 : index
    %11 = vector.load %arg2[%c1_11, %c0_12, %c0_13] : memref<3x256x256xf32, #tpu.memory_space<vmem>>, vector<1x256x256xf32>
    %12 = vector.shape_cast %11 : vector<1x256x256xf32> to vector<256x256xf32>
    %cst_14 = arith.constant dense<0.000000e+00> : vector<14x256xf32>
    %13 = tpu.matmul %3, %12, %cst_14 {dimension_numbers = #tpu.dot_dimension_numbers<[1], [0], [0], [1], [0, 0, 1, 1], [], []>} : vector<14x256xf32>, vector<256x256xf32>, vector<14x256xf32> -> vector<14x256xf32>
    %14 = arith.addf %10, %13 : vector<14x256xf32>
    %c2_15 = arith.constant 2 : index
    %c0_16 = arith.constant 0 : index
    %c0_17 = arith.constant 0 : index
    %15 = vector.load %arg2[%c2_15, %c0_16, %c0_17] : memref<3x256x256xf32, #tpu.memory_space<vmem>>, vector<1x256x256xf32>
    %16 = vector.shape_cast %15 : vector<1x256x256xf32> to vector<256x256xf32>
    %cst_18 = arith.constant dense<0.000000e+00> : vector<14x256xf32>
    %17 = tpu.matmul %5, %16, %cst_18 {dimension_numbers = #tpu.dot_dimension_numbers<[1], [0], [0], [1], [0, 0, 1, 1], [], []>} : vector<14x256xf32>, vector<256x256xf32>, vector<14x256xf32> -> vector<14x256xf32>
    %18 = arith.addf %14, %17 : vector<14x256xf32>
    %c0_19 = arith.constant 0 : index
    %c0_20 = arith.constant 0 : index
    %c0_21 = arith.constant 0 : index
    %19 = vector.load %arg3[%c0_19, %c0_20, %c0_21] : memref<3x256x256xf32, #tpu.memory_space<vmem>>, vector<1x256x256xf32>
    %20 = vector.shape_cast %19 : vector<1x256x256xf32> to vector<256x256xf32>
    %cst_22 = arith.constant dense<0.000000e+00> : vector<14x256xf32>
    %21 = tpu.matmul %1, %20, %cst_22 {dimension_numbers = #tpu.dot_dimension_numbers<[1], [0], [0], [1], [0, 0, 1, 1], [], []>} : vector<14x256xf32>, vector<256x256xf32>, vector<14x256xf32> -> vector<14x256xf32>
    %c1_23 = arith.constant 1 : index
    %c0_24 = arith.constant 0 : index
    %c0_25 = arith.constant 0 : index
    %22 = vector.load %arg3[%c1_23, %c0_24, %c0_25] : memref<3x256x256xf32, #tpu.memory_space<vmem>>, vector<1x256x256xf32>
    %23 = vector.shape_cast %22 : vector<1x256x256xf32> to vector<256x256xf32>
    %cst_26 = arith.constant dense<0.000000e+00> : vector<14x256xf32>
    %24 = tpu.matmul %3, %23, %cst_26 {dimension_numbers = #tpu.dot_dimension_numbers<[1], [0], [0], [1], [0, 0, 1, 1], [], []>} : vector<14x256xf32>, vector<256x256xf32>, vector<14x256xf32> -> vector<14x256xf32>
    %25 = arith.addf %21, %24 : vector<14x256xf32>
    %c2_27 = arith.constant 2 : index
    %c0_28 = arith.constant 0 : index
    %c0_29 = arith.constant 0 : index
    %26 = vector.load %arg3[%c2_27, %c0_28, %c0_29] : memref<3x256x256xf32, #tpu.memory_space<vmem>>, vector<1x256x256xf32>
    %27 = vector.shape_cast %26 : vector<1x256x256xf32> to vector<256x256xf32>
    %cst_30 = arith.constant dense<0.000000e+00> : vector<14x256xf32>
    %28 = tpu.matmul %5, %27, %cst_30 {dimension_numbers = #tpu.dot_dimension_numbers<[1], [0], [0], [1], [0, 0, 1, 1], [], []>} : vector<14x256xf32>, vector<256x256xf32>, vector<14x256xf32> -> vector<14x256xf32>
    %29 = arith.addf %25, %28 : vector<14x256xf32>
    %30 = arith.maximumf %18, %29 : vector<14x256xf32>
    %c0_31 = arith.constant 0 : index
    %c0_32 = arith.constant 0 : index
    %c0_33 = arith.constant 0 : index
    %31 = vector.load %arg2[%c0_31, %c0_32, %c0_33] : memref<3x256x256xf32, #tpu.memory_space<vmem>>, vector<1x256x256xf32>
    %32 = vector.shape_cast %31 : vector<1x256x256xf32> to vector<256x256xf32>
    %cst_34 = arith.constant dense<0.000000e+00> : vector<14x256xf32>
    %33 = tpu.matmul %3, %32, %cst_34 {dimension_numbers = #tpu.dot_dimension_numbers<[1], [0], [0], [1], [0, 0, 1, 1], [], []>} : vector<14x256xf32>, vector<256x256xf32>, vector<14x256xf32> -> vector<14x256xf32>
    %c1_35 = arith.constant 1 : index
    %c0_36 = arith.constant 0 : index
    %c0_37 = arith.constant 0 : index
    %34 = vector.load %arg2[%c1_35, %c0_36, %c0_37] : memref<3x256x256xf32, #tpu.memory_space<vmem>>, vector<1x256x256xf32>
    %35 = vector.shape_cast %34 : vector<1x256x256xf32> to vector<256x256xf32>
    %cst_38 = arith.constant dense<0.000000e+00> : vector<14x256xf32>
    %36 = tpu.matmul %5, %35, %cst_38 {dimension_numbers = #tpu.dot_dimension_numbers<[1], [0], [0], [1], [0, 0, 1, 1], [], []>} : vector<14x256xf32>, vector<256x256xf32>, vector<14x256xf32> -> vector<14x256xf32>
    %37 = arith.addf %33, %36 : vector<14x256xf32>
    %c2_39 = arith.constant 2 : index
    %c0_40 = arith.constant 0 : index
    %c0_41 = arith.constant 0 : index
    %38 = vector.load %arg2[%c2_39, %c0_40, %c0_41] : memref<3x256x256xf32, #tpu.memory_space<vmem>>, vector<1x256x256xf32>
    %39 = vector.shape_cast %38 : vector<1x256x256xf32> to vector<256x256xf32>
    %cst_42 = arith.constant dense<0.000000e+00> : vector<14x256xf32>
    %40 = tpu.matmul %7, %39, %cst_42 {dimension_numbers = #tpu.dot_dimension_numbers<[1], [0], [0], [1], [0, 0, 1, 1], [], []>} : vector<14x256xf32>, vector<256x256xf32>, vector<14x256xf32> -> vector<14x256xf32>
    %41 = arith.addf %37, %40 : vector<14x256xf32>
    %42 = arith.maximumf %30, %41 : vector<14x256xf32>
    %c0_43 = arith.constant 0 : index
    %c0_44 = arith.constant 0 : index
    %c0_45 = arith.constant 0 : index
    %43 = vector.load %arg3[%c0_43, %c0_44, %c0_45] : memref<3x256x256xf32, #tpu.memory_space<vmem>>, vector<1x256x256xf32>
    %44 = vector.shape_cast %43 : vector<1x256x256xf32> to vector<256x256xf32>
    %cst_46 = arith.constant dense<0.000000e+00> : vector<14x256xf32>
    %45 = tpu.matmul %3, %44, %cst_46 {dimension_numbers = #tpu.dot_dimension_numbers<[1], [0], [0], [1], [0, 0, 1, 1], [], []>} : vector<14x256xf32>, vector<256x256xf32>, vector<14x256xf32> -> vector<14x256xf32>
    %c1_47 = arith.constant 1 : index
    %c0_48 = arith.constant 0 : index
    %c0_49 = arith.constant 0 : index
    %46 = vector.load %arg3[%c1_47, %c0_48, %c0_49] : memref<3x256x256xf32, #tpu.memory_space<vmem>>, vector<1x256x256xf32>
    %47 = vector.shape_cast %46 : vector<1x256x256xf32> to vector<256x256xf32>
    %cst_50 = arith.constant dense<0.000000e+00> : vector<14x256xf32>
    %48 = tpu.matmul %5, %47, %cst_50 {dimension_numbers = #tpu.dot_dimension_numbers<[1], [0], [0], [1], [0, 0, 1, 1], [], []>} : vector<14x256xf32>, vector<256x256xf32>, vector<14x256xf32> -> vector<14x256xf32>
    %49 = arith.addf %45, %48 : vector<14x256xf32>
    %c2_51 = arith.constant 2 : index
    %c0_52 = arith.constant 0 : index
    %c0_53 = arith.constant 0 : index
    %50 = vector.load %arg3[%c2_51, %c0_52, %c0_53] : memref<3x256x256xf32, #tpu.memory_space<vmem>>, vector<1x256x256xf32>
    %51 = vector.shape_cast %50 : vector<1x256x256xf32> to vector<256x256xf32>
    %cst_54 = arith.constant dense<0.000000e+00> : vector<14x256xf32>
    %52 = tpu.matmul %7, %51, %cst_54 {dimension_numbers = #tpu.dot_dimension_numbers<[1], [0], [0], [1], [0, 0, 1, 1], [], []>} : vector<14x256xf32>, vector<256x256xf32>, vector<14x256xf32> -> vector<14x256xf32>
    %53 = arith.addf %49, %52 : vector<14x256xf32>
    %54 = arith.maximumf %42, %53 : vector<14x256xf32>
    %c0_55 = arith.constant 0 : index
    %c0_56 = arith.constant 0 : index
    %55 = vector.load %arg4[%c0_55, %c0_56] : memref<1x256xf32, #tpu.memory_space<vmem>>, vector<1x256xf32>
    %56 = vector.broadcast %55 : vector<1x256xf32> to vector<14x256xf32>
    %57 = arith.addf %54, %56 : vector<14x256xf32>
    %cst_57 = arith.constant 0.000000e+00 : f32
    %58 = vector.broadcast %cst_57 : f32 to vector<14x256xf32>
    %59 = arith.maximumf %57, %58 : vector<14x256xf32>
    %c0_58 = arith.constant 0 : index
    %c0_59 = arith.constant 0 : index
    %60 = vector.load %arg5[%c0_58, %c0_59] : memref<14x256xf32, #tpu.memory_space<vmem>>, vector<14x256xf32>
    tpu.vector_store %arg5[%c0_58, %c0_59], %59 {strides = array<i32>} : memref<14x256xf32, #tpu.memory_space<vmem>>, vector<14x256xf32>,
    return
  }
  func.func @transform_0(%arg0: i32) -> (i32, i32, i32) {
    %c0_i32 = arith.constant 0 : i32
    %c0_i32_0 = arith.constant 0 : i32
    %c0_i32_1 = arith.constant 0 : i32
    return %c0_i32, %arg0, %c0_i32_0 : i32, i32, i32
  }
  func.func @transform_1(%arg0: i32) -> (i32, i32, i32) {
    %c0_i32 = arith.constant 0 : i32
    %c0_i32_0 = arith.constant 0 : i32
    %c0_i32_1 = arith.constant 0 : i32
    %c0_i32_2 = arith.constant 0 : i32
    return %c0_i32, %c0_i32_0, %c0_i32_1 : i32, i32, i32
  }
  func.func @transform_2(%arg0: i32) -> (i32, i32, i32) {
    %c0_i32 = arith.constant 0 : i32
    %c0_i32_0 = arith.constant 0 : i32
    %c0_i32_1 = arith.constant 0 : i32
    %c0_i32_2 = arith.constant 0 : i32
    return %c0_i32, %c0_i32_0, %c0_i32_1 : i32, i32, i32
  }
  func.func @transform_3(%arg0: i32) -> (i32, i32) {
    %c0_i32 = arith.constant 0 : i32
    %c0_i32_0 = arith.constant 0 : i32
    %c0_i32_1 = arith.constant 0 : i32
    return %c0_i32, %c0_i32_0 : i32, i32
  }
  func.func @transform_4(%arg0: i32) -> (i32, i32) {
    %c0_i32 = arith.constant 0 : i32
    %c0_i32_0 = arith.constant 0 : i32
    return %arg0, %c0_i32 : i32, i32
  }
}

module attributes {stable_mosaic.version = 11 : i64} {
  func.func @_fc_fused_kernel(%arg0: i32, %arg1: memref<2x1792xf32, #tpu.memory_space<vmem>>, %arg2: memref<1792x128xf32, #tpu.memory_space<vmem>>, %arg3: memref<1x128xf32, #tpu.memory_space<vmem>>, %arg4: memref<128x128xf32, #tpu.memory_space<vmem>>, %arg5: memref<1x128xf32, #tpu.memory_space<vmem>>, %arg6: memref<2x128xf32, #tpu.memory_space<vmem>>) attributes {dimension_semantics = [#tpu.dimension_semantics<parallel>], iteration_bounds = array<i64: 1>, scalar_prefetch = 0 : i64, scratch_operands = 0 : i64, tpu.core_type = #tpu.core_type<tc>, window_params = [{transform_indices = @transform_0, window_bounds = array<i64: 2, 1792>}, {pipeline_mode = #tpu.pipeline_mode<synchronous>, transform_indices = @transform_1, window_bounds = array<i64: 1792, 128>}, {pipeline_mode = #tpu.pipeline_mode<synchronous>, transform_indices = @transform_2, window_bounds = array<i64: 1, 128>}, {pipeline_mode = #tpu.pipeline_mode<synchronous>, transform_indices = @transform_3, window_bounds = array<i64: 128, 128>}, {pipeline_mode = #tpu.pipeline_mode<synchronous>, transform_indices = @transform_4, window_bounds = array<i64: 1, 128>}, {transform_indices = @transform_5, window_bounds = array<i64: 2, 128>}]} {
    %c0 = arith.constant 0 : index
    %c0_0 = arith.constant 0 : index
    %0 = vector.load %arg1[%c0, %c0_0] : memref<2x1792xf32, #tpu.memory_space<vmem>>, vector<2x1792xf32>
    %c0_1 = arith.constant 0 : index
    %c0_2 = arith.constant 0 : index
    %1 = vector.load %arg2[%c0_1, %c0_2] : memref<1792x128xf32, #tpu.memory_space<vmem>>, vector<1792x128xf32>
    %cst = arith.constant dense<0.000000e+00> : vector<2x128xf32>
    %2 = tpu.matmul %0, %1, %cst {dimension_numbers = #tpu.dot_dimension_numbers<[1], [0], [0], [1], [0, 0, 1, 1], [], []>} : vector<2x1792xf32>, vector<1792x128xf32>, vector<2x128xf32> -> vector<2x128xf32>
    %c0_3 = arith.constant 0 : index
    %c0_4 = arith.constant 0 : index
    %3 = vector.load %arg3[%c0_3, %c0_4] : memref<1x128xf32, #tpu.memory_space<vmem>>, vector<1x128xf32>
    %4 = vector.broadcast %3 : vector<1x128xf32> to vector<2x128xf32>
    %5 = arith.addf %2, %4 : vector<2x128xf32>
    %cst_5 = arith.constant 0.000000e+00 : f32
    %6 = vector.broadcast %cst_5 : f32 to vector<2x128xf32>
    %7 = arith.maximumf %5, %6 : vector<2x128xf32>
    %c0_6 = arith.constant 0 : index
    %c0_7 = arith.constant 0 : index
    %8 = vector.load %arg4[%c0_6, %c0_7] : memref<128x128xf32, #tpu.memory_space<vmem>>, vector<128x128xf32>
    %cst_8 = arith.constant dense<0.000000e+00> : vector<2x128xf32>
    %9 = tpu.matmul %7, %8, %cst_8 {dimension_numbers = #tpu.dot_dimension_numbers<[1], [0], [0], [1], [0, 0, 1, 1], [], []>} : vector<2x128xf32>, vector<128x128xf32>, vector<2x128xf32> -> vector<2x128xf32>
    %c0_9 = arith.constant 0 : index
    %c0_10 = arith.constant 0 : index
    %10 = vector.load %arg5[%c0_9, %c0_10] : memref<1x128xf32, #tpu.memory_space<vmem>>, vector<1x128xf32>
    %11 = vector.broadcast %10 : vector<1x128xf32> to vector<2x128xf32>
    %12 = arith.addf %9, %11 : vector<2x128xf32>
    %c0_11 = arith.constant 0 : index
    %c0_12 = arith.constant 0 : index
    %13 = vector.load %arg6[%c0_11, %c0_12] : memref<2x128xf32, #tpu.memory_space<vmem>>, vector<2x128xf32>
    tpu.vector_store %arg6[%c0_11, %c0_12], %12 {strides = array<i32>} : memref<2x128xf32, #tpu.memory_space<vmem>>, vector<2x128xf32>,
    return
  }
  func.func @transform_0(%arg0: i32) -> (i32, i32) {
    %c0_i32 = arith.constant 0 : i32
    %c0_i32_0 = arith.constant 0 : i32
    return %arg0, %c0_i32 : i32, i32
  }
  func.func @transform_1(%arg0: i32) -> (i32, i32) {
    %c0_i32 = arith.constant 0 : i32
    %c0_i32_0 = arith.constant 0 : i32
    %c0_i32_1 = arith.constant 0 : i32
    return %c0_i32, %c0_i32_0 : i32, i32
  }
  func.func @transform_2(%arg0: i32) -> (i32, i32) {
    %c0_i32 = arith.constant 0 : i32
    %c0_i32_0 = arith.constant 0 : i32
    %c0_i32_1 = arith.constant 0 : i32
    return %c0_i32, %c0_i32_0 : i32, i32
  }
  func.func @transform_3(%arg0: i32) -> (i32, i32) {
    %c0_i32 = arith.constant 0 : i32
    %c0_i32_0 = arith.constant 0 : i32
    %c0_i32_1 = arith.constant 0 : i32
    return %c0_i32, %c0_i32_0 : i32, i32
  }
  func.func @transform_4(%arg0: i32) -> (i32, i32) {
    %c0_i32 = arith.constant 0 : i32
    %c0_i32_0 = arith.constant 0 : i32
    %c0_i32_1 = arith.constant 0 : i32
    return %c0_i32, %c0_i32_0 : i32, i32
  }
  func.func @transform_5(%arg0: i32) -> (i32, i32) {
    %c0_i32 = arith.constant 0 : i32
    %c0_i32_0 = arith.constant 0 : i32
    return %arg0, %c0_i32 : i32, i32
  }
}

</mosaic_0001>

<bundles_post_ra>
// kernel: cnn_forward.3
= control target key start
LH: loop header
LB: loop body
LE: loop exit
PB: predicated region body
PF: predicated region fallthrough
CT: control target
= control target key end

     0   :  { %9 = vsyncpa [#allocation3], 0  ;;  %s2189_s0 = inlined_call_operand.vmem [shape: f32[4,28,30], index: 0, kind: input, shape index: {}]   ;;  %s2190_s1 = inlined_call_operand.hbm [shape: f32[3,30,256], index: 1, kind: input, shape index: {}]   ;;  %s2191_s2 = inlined_call_operand.hbm [shape: f32[3,30,256], index: 2, kind: input, shape index: {}]   ;;  %s2192_s3 = inlined_call_operand.hbm [shape: f32[1,256], index: 3, kind: input, shape index: {}]   ;;  %s2193_s4 = inlined_call_operand.vmem [shape: f32[28,256], index: 4, kind: output, shape index: {}]  }
   0x1   :  { %10 = vsyncpa [#allocation5], 0  ;;  %s1533_s15 = smov [#allocation4]   ;;  %s1534_s17 = smov [#allocation2]  }
   0x2   :  { %s30_s16 = sshll.u32 %s1533_s15, 4  ;;  %s18_s18 = sshll.u32 %s1534_s17, 4  ;;  %s31_s16 = int_to_ptr.vmem [resolvable:$true] %s30_s16  ;;  %s19_s18 = int_to_ptr.vmem [resolvable:$true] %s18_s18 }
   0x3   :  { %s1477_s19 = scalar_lea.vmem %s31_s16, 3072  ;;  %p1482_p1 = scmp.lt.s32.totalorder %s31_s16, %s31_s16 }
   0x4   :  { %p1478_p0 = scmp.ne.s32.totalorder %s31_s16, %s1477_s19  ;;  %p1483_p2 = scmp.lt.s32.totalorder %s1477_s19, %s1477_s19 }
   0x6   :  { %p1484_p3 = por %p1483_p2, %p1482_p1 }
   0x8   :  { %p1485_p4 = pnand %p1484_p3, %p1478_p0 }
   0xa   :  { %1488 = shalt.err (!%p1485_p4)
}
   0xb   :  { %s1535_s20 = smov 256   ;;  %s1536_s21 = smov 16  }
   0xc   :  { %36 = dma.hbm_to_vmem [thread:$0]  %s2191_s2, 3072, %s31_s16, [#allocation5], %s1535_s20, %s1535_s20, %s1536_s21  }
   0xd   :  { %s1497_s24 = scalar_lea.vmem %s19_s18, 3072  ;;  %p1502_p6 = scmp.lt.s32.totalorder %s19_s18, %s19_s18 }
   0xe   :  { %p1498_p5 = scmp.ne.s32.totalorder %s19_s18, %s1497_s24  ;;  %p1503_p7 = scmp.lt.s32.totalorder %s1497_s24, %s1497_s24 }
  0x10   :  { %p1504_p8 = por %p1503_p7, %p1502_p6 }
  0x12   :  { %p1505_p9 = pnand %p1504_p8, %p1498_p5 }
  0x14   :  { %1508 = shalt.err (!%p1505_p9)
}
  0x15   :  { %24 = dma.hbm_to_vmem [thread:$0]  %s2190_s1, 3072, %s19_s18, [#allocation3], %s1535_s20, %s1535_s20, %s1536_s21  }
  0x16   :  { %s1537_s27 = smov [#allocation6]  }
  0x17   :  { %s43_s28 = sshll.u32 %s1537_s27, 4  ;;  %s44_s28 = int_to_ptr.vmem [resolvable:$true] %s43_s28 }
  0x18   :  { %s1517_s29 = scalar_lea.vmem %s44_s28, 32  ;;  %p1522_p11 = scmp.lt.s32.totalorder %s44_s28, %s44_s28 }
  0x19   :  { %p1518_p10 = scmp.ne.s32.totalorder %s44_s28, %s1517_s29  ;;  %p1523_p12 = scmp.lt.s32.totalorder %s1517_s29, %s1517_s29 }
  0x1b   :  { %p1524_p13 = por %p1523_p12, %p1522_p11 }
  0x1d   :  { %p1525_p0 = pnand %p1524_p13, %p1518_p10 }
  0x1f   :  { %1528 = shalt.err (!%p1525_p0)
}
  0x20   :  { %46 = dma.hbm_to_vmem [thread:$0]  %s2192_s3, 32, %s44_s28, [#allocation5]  }
  0x21   :  { %1529 = dma.done.wait [#allocation3], 3072  }
  0x22   :  { %1530 = vsyncadd [#allocation3], 4294964224 }
  0x23   :  { %1531 = dma.done.wait [#allocation5], 3104  }
  0x24   :  { %1532 = vsyncadd [#allocation5], 4294964192  ;;  %v1538_v0 = vmov 0.0   ;;  %vm105_vm0 = vcmask 1045504   ;;  %v1575_v1 = vld [vmem:[#allocation2 + $0x78] sm:$0x3f] }
  0x25   :  { %176 = vmatprep.mubr.f32.mxu0 %v1538_v0  ;;  %283 = vmatprep.mubr.f32.mxu1 %v1538_v0  ;;  %v1577_v2 = vld [vmem:[#allocation2 + $0x38] sm:$0x3f]  ;;  %v1579_v3 = vld [vmem:[#allocation2 + $0x70] sm:$0x3f]  ;;  %v1587_v5 = vld [vmem:[#allocation2 + $0x68] sm:$0xff]  ;;  %vm92_vm1 = vcmask 244736  }
  0x26   :  { %1391 = vmatprep.subr.msk.mxu0 %vm105_vm0, %v1575_v1  ;;  %1397 = vmatprep.subr.msk.mxu1 %vm105_vm0, %v1577_v2  ;;  %v1585_v4 = vld [vmem:[#allocation2 + $0x30] sm:$0x3f]  ;;  %v1589_v6 = vld [vmem:[#allocation2 + $0x28] sm:$0xff]  ;;  %v1595_v7 = vld [vmem:[#allocation2 + $0x60] sm:$0xff] }
  0x27   :  { %1392 = vmatpush1.msk.msra.mxu0 %vm105_vm0, %v1579_v3  ;;  %1398 = vmatpush1.msk.msra.mxu1 %vm105_vm0, %v1585_v4  ;;  %v1597_v8 = vld [vmem:[#allocation2 + $0x20] sm:$0xff]  ;;  %v1599_v9 = vld [vmem:[#allocation2 + $0x58] sm:$0xff]  ;;  %v1605_v11 = vld [vmem:[#allocation2 + $0x50] sm:$0xff] }
  0x28   :  { %138 = vmatprep.subr.mxu0 %v1587_v5  ;;  %245 = vmatprep.subr.mxu1 %v1589_v6  ;;  %v1603_v10 = vld [vmem:[#allocation2 + $0x18] sm:$0xff]  ;;  %v1607_v12 = vld [vmem:[#allocation2 + $0x10] sm:$0xff]  ;;  %v1611_v13 = vld [vmem:[#allocation2 + $0x48] sm:$0xff] }
  0x29   :  { %139 = vmatpush1.msra.mxu0 %v1595_v7  ;;  %246 = vmatpush1.msra.mxu1 %v1597_v8  ;;  %v1613_v14 = vld [vmem:[#allocation2 + $0x8] sm:$0xff]  ;;  %v1617_v15 = vld [vmem:[#allocation2 + $0x40] sm:$0xff]  ;;  %v1635_v19 = vld [vmem:[#allocation2 + $0xb8] sm:$0x3f] }
  0x2a   :  { %140 = vmatprep.subr.mxu0 %v1599_v9  ;;  %247 = vmatprep.subr.mxu1 %v1603_v10  ;;  %v1619_v16 = vld [vmem:[#allocation2] sm:$0xff]  ;;  %v1637_v20 = vld [vmem:[#allocation4 + $0x78] sm:$0x3f]  ;;  %v1641_v21 = vld [vmem:[#allocation2 + $0xb0] sm:$0x3f] }
  0x2b   :  { %141 = vmatpush1.msra.mxu0 %v1605_v11  ;;  %248 = vmatpush1.msra.mxu1 %v1607_v12  ;;  %v1626_v17 = vld [vmem:[%s2189_s0 + $0x20] sm:$0xff]  ;;  %v1647_v22 = vld [vmem:[#allocation4 + $0x70] sm:$0x3f]  ;;  %v1656_v23 = vld [vmem:[%s2189_s0 + $0x28] sm:$0xff] }
  0x2c   :  { %v1631_v18 = vld [vmem:[%s2189_s0] sm:$0xff]  ;;  %142 = vmatprep.subr.mxu0 %v1611_v13  ;;  %249 = vmatprep.subr.mxu1 %v1613_v14  ;;  %v1661_v24 = vld [vmem:[%s2189_s0 + $0x8] sm:$0xff]  ;;  %v1686_v29 = vld [vmem:[%s2189_s0 + $0x30] sm:$0xff] }
  0x2d   :  { %143 = vmatpush1.msra.mxu0 %v1617_v15  ;;  %250 = vmatpush1.msra.mxu1 %v1619_v16  ;;  %v1666_v25 = vld [vmem:[#allocation2 + $0xa8] sm:$0xff]  ;;  %v1673_v27 = vld [vmem:[#allocation2 + $0xa0] sm:$0xff]  ;;  %v1691_v30 = vld [vmem:[%s2189_s0 + $0x10] sm:$0xff] }
  0x2e   :  { %1393 = vmatmul.mubr.msk.f32.vlgmr.msra.gmra.mxu0 %vm92_vm1, %v1626_v17  ;;  %1399 = vmatmul.mubr.msk.f32.vlgmr.msra.gmra.mxu1 %vm92_vm1, %v1631_v18  ;;  %v1668_v26 = vld [vmem:[#allocation4 + $0x68] sm:$0xff]  ;;  %v1679_v28 = vld [vmem:[#allocation4 + $0x60] sm:$0xff]  ;;  %v1695_v31 = vld [vmem:[#allocation2 + $0x98] sm:$0xff] }
  0x2f   :  { %1403 = vmatprep.subr.msk.mxu0 %vm105_vm0, %v1635_v19  ;;  %1409 = vmatprep.subr.msk.mxu1 %vm105_vm0, %v1637_v20  ;;  %v1697_v32 = vld [vmem:[#allocation4 + $0x58] sm:$0xff]  ;;  %v1701_v33 = vld [vmem:[#allocation2 + $0x90] sm:$0xff]  ;;  %v1723_v37 = vld [vmem:[#allocation2 + $0x88] sm:$0xff] }
  0x30   :  { %1404 = vmatpush1.msk.msra.mxu0 %vm105_vm0, %v1641_v21  ;;  %182 = vmatprep.mubr.f32.mxu0 %v1538_v0  ;;  %v1707_v34 = vld [vmem:[#allocation4 + $0x50] sm:$0xff]  ;;  %v1714_v35 = vld [vmem:[%s2189_s0 + $0x38] sm:$0xf]  ;;  %v1725_v38 = vld [vmem:[#allocation4 + $0x48] sm:$0xff] }
  0x31   :  { %289 = vmatprep.mubr.f32.mxu1 %v1538_v0  ;;  %1410 = vmatpush1.msk.msra.mxu1 %vm105_vm0, %v1647_v22  ;;  %v1719_v36 = vld [vmem:[%s2189_s0 + $0x18] sm:$0xf]  ;;  %v1729_v39 = vld [vmem:[#allocation2 + $0x80] sm:$0xff]  ;;  %v1752_v44 = vld [vmem:[#allocation4 + $0x30] sm:$0x3f] }
  0x32   :  { %1394 = vmatmul.mubr.msk.f32.gmra.mxu0 %vm92_vm1, %v1656_v23  ;;  %1400 = vmatmul.mubr.msk.f32.gmra.mxu1 %vm92_vm1, %v1661_v24  ;;  %v1735_v40 = vld [vmem:[#allocation4 + $0x40] sm:$0xff]  ;;  %v1746_v42 = vld [vmem:[#allocation4 + $0x38] sm:$0x3f]  ;;  %v1758_v45 = vld [vmem:[#allocation4 + $0xb0] sm:$0x3f] }
  0x33   :  { %361 = vmatprep.subr.mxu0 %v1666_v25  ;;  %481 = vmatprep.subr.mxu1 %v1668_v26  ;;  %v1742_v41 = vld [vmem:[%s2189_s0 + $0x40] sm:$0xff]  ;;  %v1748_v43 = vld [vmem:[#allocation4 + $0xb8] sm:$0x3f]  ;;  %v1767_v46 = vld [vmem:[%s2189_s0 + $0x48] sm:$0xff] }
  0x34   :  { %362 = vmatpush1.msra.mxu0 %v1673_v27  ;;  %188 = vmatprep.mubr.f32.mxu0 %v1538_v0  ;;  %v1772_v47 = vld [vmem:[#allocation4 + $0x28] sm:$0xff]  ;;  %v1779_v49 = vld [vmem:[#allocation4 + $0x20] sm:$0xff]  ;;  %v1792_v51 = vld [vmem:[%s2189_s0 + $0x50] sm:$0xff] }
  0x35   :  { %295 = vmatprep.mubr.f32.mxu1 %v1538_v0  ;;  %482 = vmatpush1.msra.mxu1 %v1679_v28  ;;  %v1774_v48 = vld [vmem:[#allocation4 + $0xa8] sm:$0xff]  ;;  %v1785_v50 = vld [vmem:[#allocation4 + $0xa0] sm:$0xff]  ;;  %v1796_v52 = vld [vmem:[#allocation4 + $0x18] sm:$0xff] }
  0x36   :  { %1395 = vmatmul.mubr.msk.f32.gmra.mxu0 %vm92_vm1, %v1686_v29  ;;  %1401 = vmatmul.mubr.msk.f32.gmra.mxu1 %vm92_vm1, %v1691_v30  ;;  %v1798_v53 = vld [vmem:[#allocation4 + $0x98] sm:$0xff]  ;;  %v1802_v54 = vld [vmem:[#allocation4 + $0x10] sm:$0xff]  ;;  %v1819_v57 = vld [vmem:[#allocation4 + $0x8] sm:$0xff] }
  0x37   :  { %363 = vmatprep.subr.mxu0 %v1695_v31  ;;  %483 = vmatprep.subr.mxu1 %v1697_v32  ;;  %v1808_v55 = vld [vmem:[#allocation4 + $0x90] sm:$0xff]  ;;  %v1815_v56 = vld [vmem:[%s2189_s0 + $0x58] sm:$0xf]  ;;  %v1821_v58 = vld [vmem:[#allocation4 + $0x88] sm:$0xff] }
  0x38   :  { %364 = vmatpush1.msra.mxu0 %v1701_v33  ;;  %194 = vmatprep.mubr.f32.mxu0 %v1538_v0  ;;  %v1825_v59 = vld [vmem:[#allocation4] sm:$0xff]  ;;  %v1388_v62 = vld [vmem:[%s2189_s0 + $0x68] sm:$0xff]  ;;  %v1389_v63 = vld [vmem:[%s2189_s0 + $0x70] sm:$0xff] }
  0x39   :  { %301 = vmatprep.mubr.f32.mxu1 %v1538_v0  ;;  %484 = vmatpush1.msra.mxu1 %v1707_v34  ;;  %v1831_v60 = vld [vmem:[#allocation4 + $0x80] sm:$0xff] }
  0x3a   :  { %1396 = vmatmul.mubr.msk.f32.gmra.mxu0 %vm92_vm1, %v1714_v35  ;;  %1402 = vmatmul.mubr.msk.f32.gmra.mxu1 %vm92_vm1, %v1719_v36  ;;  %v1387_v61 = vld [vmem:[%s2189_s0 + $0x60] sm:$0xff] }
  0x3b   :  { %365 = vmatprep.subr.mxu0 %v1723_v37  ;;  %485 = vmatprep.subr.mxu1 %v1725_v38 }
  0x3c   :  { %366 = vmatpush1.msra.mxu0 %v1729_v39  ;;  %399 = vmatprep.mubr.f32.mxu0 %v1538_v0 }
  0x3d   :  { %486 = vmatpush1.msra.mxu1 %v1735_v40  ;;  %519 = vmatprep.mubr.f32.mxu1 %v1538_v0 }
  0x3e   :  { %1405 = vmatmul.mubr.msk.f32.vlgmr.msra.gmra.mxu0 %vm92_vm1, %v1742_v41  ;;  %1411 = vmatmul.mubr.msk.f32.vlgmr.msra.gmra.mxu1 %vm92_vm1, %v1626_v17 }
  0x3f   :  { %1415 = vmatprep.subr.msk.mxu0 %vm105_vm0, %v1746_v42  ;;  %1421 = vmatprep.subr.msk.mxu1 %vm105_vm0, %v1748_v43 }
  0x40   :  { %1416 = vmatpush1.msk.msra.mxu0 %vm105_vm0, %v1752_v44  ;;  %405 = vmatprep.mubr.f32.mxu0 %v1538_v0 }
  0x41   :  { %525 = vmatprep.mubr.f32.mxu1 %v1538_v0  ;;  %1422 = vmatpush1.msk.msra.mxu1 %vm105_vm0, %v1758_v45 }
  0x42   :  { %1406 = vmatmul.mubr.msk.f32.gmra.mxu0 %vm92_vm1, %v1767_v46  ;;  %1412 = vmatmul.mubr.msk.f32.gmra.mxu1 %vm92_vm1, %v1656_v23 }
  0x43   :  { %576 = vmatprep.subr.mxu0 %v1772_v47  ;;  %680 = vmatprep.subr.mxu1 %v1774_v48 }
  0x44   :  { %577 = vmatpush1.msra.mxu0 %v1779_v49  ;;  %411 = vmatprep.mubr.f32.mxu0 %v1538_v0 }
  0x45   :  { %531 = vmatprep.mubr.f32.mxu1 %v1538_v0  ;;  %681 = vmatpush1.msra.mxu1 %v1785_v50 }
  0x46   :  { %1407 = vmatmul.mubr.msk.f32.gmra.mxu0 %vm92_vm1, %v1792_v51  ;;  %1413 = vmatmul.mubr.msk.f32.gmra.mxu1 %vm92_vm1, %v1686_v29 }
  0x47   :  { %578 = vmatprep.subr.mxu0 %v1796_v52  ;;  %682 = vmatprep.subr.mxu1 %v1798_v53 }
  0x48   :  { %579 = vmatpush1.msra.mxu0 %v1802_v54  ;;  %417 = vmatprep.mubr.f32.mxu0 %v1538_v0 }
  0x49   :  { %537 = vmatprep.mubr.f32.mxu1 %v1538_v0  ;;  %683 = vmatpush1.msra.mxu1 %v1808_v55 }
  0x4a   :  { %1408 = vmatmul.mubr.msk.f32.gmra.mxu0 %vm92_vm1, %v1815_v56  ;;  %1414 = vmatmul.mubr.msk.f32.gmra.mxu1 %vm92_vm1, %v1714_v35 }
  0x4b   :  { %580 = vmatprep.subr.mxu0 %v1819_v57  ;;  %684 = vmatprep.subr.mxu1 %v1821_v58 }
  0x4c   :  { %581 = vmatpush1.msra.mxu0 %v1825_v59  ;;  %614 = vmatprep.mubr.f32.mxu0 %v1538_v0 }
  0x4d   :  { %685 = vmatpush1.msra.mxu1 %v1831_v60  ;;  %718 = vmatprep.mubr.f32.mxu1 %v1538_v0 }
  0x4e   :  { %1417 = vmatmul.mubr.msk.f32.vlgmr.msra.gmra.mxu0 %vm92_vm1, %v1631_v18  ;;  %1423 = vmatmul.mubr.msk.f32.vlgmr.msra.gmra.mxu1 %vm92_vm1, %v1742_v41 }
  0x4f   :  { %1427 = vmatprep.subr.msk.mxu0 %vm105_vm0, %v1575_v1  ;;  %1433 = vmatprep.subr.msk.mxu1 %vm105_vm0, %v1577_v2  ;;  %v1390_v1 = vld [vmem:[%s2189_s0 + $0x78] sm:$0xf] }
  0x50   :  { %1428 = vmatpush1.msk.msra.mxu0 %vm105_vm0, %v1579_v3  ;;  %620 = vmatprep.mubr.f32.mxu0 %v1538_v0 }
  0x51   :  { %724 = vmatprep.mubr.f32.mxu1 %v1538_v0  ;;  %1434 = vmatpush1.msk.msra.mxu1 %vm105_vm0, %v1585_v4 }
  0x52   :  { %1418 = vmatmul.mubr.msk.f32.gmra.mxu0 %vm92_vm1, %v1661_v24  ;;  %1424 = vmatmul.mubr.msk.f32.gmra.mxu1 %vm92_vm1, %v1767_v46 }
  0x53   :  { %785 = vmatprep.subr.mxu0 %v1587_v5  ;;  %874 = vmatprep.subr.mxu1 %v1589_v6 }
  0x54   :  { %786 = vmatpush1.msra.mxu0 %v1595_v7  ;;  %626 = vmatprep.mubr.f32.mxu0 %v1538_v0 }
  0x55   :  { %730 = vmatprep.mubr.f32.mxu1 %v1538_v0  ;;  %875 = vmatpush1.msra.mxu1 %v1597_v8 }
  0x56   :  { %1419 = vmatmul.mubr.msk.f32.gmra.mxu0 %vm92_vm1, %v1691_v30  ;;  %1425 = vmatmul.mubr.msk.f32.gmra.mxu1 %vm92_vm1, %v1792_v51 }
  0x57   :  { %787 = vmatprep.subr.mxu0 %v1599_v9  ;;  %876 = vmatprep.subr.mxu1 %v1603_v10 }
  0x58   :  { %788 = vmatpush1.msra.mxu0 %v1605_v11  ;;  %632 = vmatprep.mubr.f32.mxu0 %v1538_v0 }
  0x59   :  { %736 = vmatprep.mubr.f32.mxu1 %v1538_v0  ;;  %877 = vmatpush1.msra.mxu1 %v1607_v12 }
  0x5a   :  { %1420 = vmatmul.mubr.msk.f32.gmra.mxu0 %vm92_vm1, %v1719_v36  ;;  %1426 = vmatmul.mubr.msk.f32.gmra.mxu1 %vm92_vm1, %v1815_v56 }
  0x5b   :  { %789 = vmatprep.subr.mxu0 %v1611_v13  ;;  %878 = vmatprep.subr.mxu1 %v1613_v14 }
  0x5c   :  { %790 = vmatpush1.msra.mxu0 %v1617_v15  ;;  %823 = vmatprep.mubr.f32.mxu0 %v1538_v0 }
  0x5d   :  { %879 = vmatpush1.msra.mxu1 %v1619_v16  ;;  %912 = vmatprep.mubr.f32.mxu1 %v1538_v0 }
  0x5e   :  { %1429 = vmatmul.mubr.msk.f32.vlgmr.msra.gmra.mxu0 %vm92_vm1, %v1742_v41  ;;  %1435 = vmatmul.mubr.msk.f32.vlgmr.msra.gmra.mxu1 %vm92_vm1, %v1626_v17 }
  0x5f   :  { %1439 = vmatprep.subr.msk.mxu0 %vm105_vm0, %v1635_v19  ;;  %1445 = vmatprep.subr.msk.mxu1 %vm105_vm0, %v1637_v20 }
  0x60   :  { %1440 = vmatpush1.msk.msra.mxu0 %vm105_vm0, %v1641_v21  ;;  %829 = vmatprep.mubr.f32.mxu0 %v1538_v0 }
  0x61   :  { %918 = vmatprep.mubr.f32.mxu1 %v1538_v0  ;;  %1446 = vmatpush1.msk.msra.mxu1 %vm105_vm0, %v1647_v22 }
  0x62   :  { %1430 = vmatmul.mubr.msk.f32.gmra.mxu0 %vm92_vm1, %v1767_v46  ;;  %1436 = vmatmul.mubr.msk.f32.gmra.mxu1 %vm92_vm1, %v1656_v23 }
  0x63   :  { %975 = vmatprep.subr.mxu0 %v1666_v25  ;;  %1080 = vmatprep.subr.mxu1 %v1668_v26 }
  0x64   :  { %976 = vmatpush1.msra.mxu0 %v1673_v27  ;;  %835 = vmatprep.mubr.f32.mxu0 %v1538_v0 }
  0x65   :  { %924 = vmatprep.mubr.f32.mxu1 %v1538_v0  ;;  %1081 = vmatpush1.msra.mxu1 %v1679_v28 }
  0x66   :  { %1431 = vmatmul.mubr.msk.f32.gmra.mxu0 %vm92_vm1, %v1792_v51  ;;  %1437 = vmatmul.mubr.msk.f32.gmra.mxu1 %vm92_vm1, %v1686_v29 }
  0x67   :  { %977 = vmatprep.subr.mxu0 %v1695_v31  ;;  %1082 = vmatprep.subr.mxu1 %v1697_v32 }
  0x68   :  { %978 = vmatpush1.msra.mxu0 %v1701_v33  ;;  %841 = vmatprep.mubr.f32.mxu0 %v1538_v0 }
  0x69   :  { %930 = vmatprep.mubr.f32.mxu1 %v1538_v0  ;;  %1083 = vmatpush1.msra.mxu1 %v1707_v34 }
  0x6a   :  { %1432 = vmatmul.mubr.msk.f32.gmra.mxu0 %vm92_vm1, %v1815_v56  ;;  %1438 = vmatmul.mubr.msk.f32.gmra.mxu1 %vm92_vm1, %v1714_v35 }
  0x6b   :  { %979 = vmatprep.subr.mxu0 %v1723_v37  ;;  %1084 = vmatprep.subr.mxu1 %v1725_v38 }
  0x6c   :  { %980 = vmatpush1.msra.mxu0 %v1729_v39  ;;  %1013 = vmatprep.mubr.f32.mxu0 %v1538_v0 }
  0x6d   :  { %1085 = vmatpush1.msra.mxu1 %v1735_v40  ;;  %1118 = vmatprep.mubr.f32.mxu1 %v1538_v0 }
  0x6e   :  { %1441 = vmatmul.mubr.msk.f32.vlgmr.msra.gmra.mxu0 %vm92_vm1, %v1387_v61  ;;  %1451 = vmatprep.subr.msk.mxu0 %vm105_vm0, %v1746_v42 }
  0x6f   :  { %1447 = vmatmul.mubr.msk.f32.vlgmr.msra.gmra.mxu1 %vm92_vm1, %v1742_v41  ;;  %1452 = vmatpush1.msk.msra.mxu0 %vm105_vm0, %v1752_v44 }
  0x70   :  { %1457 = vmatprep.subr.msk.mxu1 %vm105_vm0, %v1748_v43  ;;  %1019 = vmatprep.mubr.f32.mxu0 %v1538_v0 }
  0x71   :  { %1458 = vmatpush1.msk.msra.mxu1 %vm105_vm0, %v1758_v45  ;;  %1124 = vmatprep.mubr.f32.mxu1 %v1538_v0 }
  0x72   :  { %1442 = vmatmul.mubr.msk.f32.gmra.mxu0 %vm92_vm1, %v1388_v62  ;;  %1169 = vmatprep.subr.mxu0 %v1772_v47 }
  0x73   :  { %1448 = vmatmul.mubr.msk.f32.gmra.mxu1 %vm92_vm1, %v1767_v46  ;;  %1170 = vmatpush1.msra.mxu0 %v1779_v49 }
  0x74   :  { %1258 = vmatprep.subr.mxu1 %v1774_v48  ;;  %1025 = vmatprep.mubr.f32.mxu0 %v1538_v0 }
  0x75   :  { %1259 = vmatpush1.msra.mxu1 %v1785_v50  ;;  %1130 = vmatprep.mubr.f32.mxu1 %v1538_v0 }
  0x76   :  { %1443 = vmatmul.mubr.msk.f32.gmra.mxu0 %vm92_vm1, %v1389_v63  ;;  %1171 = vmatprep.subr.mxu0 %v1796_v52 }
  0x77   :  { %1449 = vmatmul.mubr.msk.f32.gmra.mxu1 %vm92_vm1, %v1792_v51  ;;  %1172 = vmatpush1.msra.mxu0 %v1802_v54 }
  0x78   :  { %1260 = vmatprep.subr.mxu1 %v1798_v53  ;;  %1031 = vmatprep.mubr.f32.mxu0 %v1538_v0 }
  0x79   :  { %1261 = vmatpush1.msra.mxu1 %v1808_v55  ;;  %1136 = vmatprep.mubr.f32.mxu1 %v1538_v0 }
  0x7a   :  { %1444 = vmatmul.mubr.msk.f32.gmra.mxu0 %vm92_vm1, %v1390_v1  ;;  %1173 = vmatprep.subr.mxu0 %v1819_v57 }
  0x7b   :  { %1450 = vmatmul.mubr.msk.f32.gmra.mxu1 %vm92_vm1, %v1815_v56  ;;  %1174 = vmatpush1.msra.mxu0 %v1825_v59 }
  0x7c   :  { %1262 = vmatprep.subr.mxu1 %v1821_v58  ;;  %1207 = vmatprep.mubr.f32.mxu0 %v1538_v0 }
  0x7d   :  { %1263 = vmatpush1.msra.mxu1 %v1831_v60  ;;  %1296 = vmatprep.mubr.f32.mxu1 %v1538_v0 }
  0x7e   :  { %1453 = vmatmul.mubr.msk.f32.vlgmr.msra.gmra.mxu0 %vm92_vm1, %v1626_v17 }
  0x7f   :  { %1459 = vmatmul.mubr.msk.f32.vlgmr.msra.gmra.mxu1 %vm92_vm1, %v1387_v61  ;;  %1213 = vmatprep.mubr.f32.mxu0 %v1538_v0 }
  0x80   :  { %1302 = vmatprep.mubr.f32.mxu1 %v1538_v0 }
  0x82   :  { %1454 = vmatmul.mubr.msk.f32.gmra.mxu0 %vm92_vm1, %v1656_v23 }
  0x83   :  { %1460 = vmatmul.mubr.msk.f32.gmra.mxu1 %vm92_vm1, %v1388_v62  ;;  %1219 = vmatprep.mubr.f32.mxu0 %v1538_v0 }
  0x84   :  { %1308 = vmatprep.mubr.f32.mxu1 %v1538_v0 }
  0x86   :  { %1455 = vmatmul.mubr.msk.f32.gmra.mxu0 %vm92_vm1, %v1686_v29 }
  0x87   :  { %1461 = vmatmul.mubr.msk.f32.gmra.mxu1 %vm92_vm1, %v1389_v63  ;;  %1225 = vmatprep.mubr.f32.mxu0 %v1538_v0 }
  0x88   :  { %1314 = vmatprep.mubr.f32.mxu1 %v1538_v0 }
  0x8a   :  { %1456 = vmatmul.mubr.msk.f32.gmra.mxu0 %vm92_vm1, %v1714_v35 }
  0x8b   :  { %1462 = vmatmul.mubr.msk.f32.gmra.mxu1 %vm92_vm1, %v1390_v1 }
  0xee   :  { %v178_v2 = vpop.f32.mrf.mxu0  ;;  %v285_v3 = vpop.f32.mrf.mxu1 }
  0xef   :  { %v1997_v4 = vadd.f32 %v285_v3, %v178_v2 }
  0xf0   :  { %v180_v5 = vpop.f32.mrf.mxu0  ;;  %v287_v6 = vpop.f32.mrf.mxu1 }
  0xf1   :  { %v1999_v7 = vadd.f32 %v287_v6, %v180_v5 }
  0xf2   :  { %v184_v8 = vpop.f32.mrf.mxu0  ;;  %v291_v9 = vpop.f32.mrf.mxu1 }
  0xf3   :  { %v2001_v10 = vadd.f32 %v291_v9, %v184_v8 }
  0xf4   :  { %v186_v11 = vpop.f32.mrf.mxu0  ;;  %v293_v12 = vpop.f32.mrf.mxu1 }
  0xf5   :  { %v2003_v0 = vadd.f32 %v293_v12, %v186_v11 }
  0xf6   :  { %v190_v13 = vpop.f32.mrf.mxu0  ;;  %v297_v14 = vpop.f32.mrf.mxu1 }
  0xf7   :  { %v2005_v15 = vadd.f32 %v297_v14, %v190_v13  ;;  %v1339_v13 = vlaneseq }
  0xf8   :  { %v192_v16 = vpop.f32.mrf.mxu0  ;;  %v299_v17 = vpop.f32.mrf.mxu1 }
  0xf9   :  { %v2007_v18 = vadd.f32 %v299_v17, %v192_v16 }
  0xfa   :  { %v196_v19 = vpop.f32.mrf.mxu0  ;;  %v303_v20 = vpop.f32.mrf.mxu1 }
  0xfb   :  { %v2009_v21 = vadd.f32 %v303_v20, %v196_v19  ;;  %v1340_v20 = vshrl.u32 %v1339_v13, 7 }
  0xfc   :  { %v198_v22 = vpop.f32.mrf.mxu0  ;;  %v305_v23 = vpop.f32.mrf.mxu1 }
  0xfd   :  { %v2011_v24 = vadd.f32 %v305_v23, %v198_v22 }
  0xfe   :  { %v2013_v25 = vpop.f32.mrf.mxu0  ;;  %v521_v26 = vpop.f32.mrf.mxu1 }
  0xff   :  { %v424_v13 = vadd.f32 %v2013_v25, %v1997_v4 }
 0x100   :  { %v2015_v27 = vpop.f32.mrf.mxu0  ;;  %v523_v28 = vpop.f32.mrf.mxu1 }
 0x102   :  { %v2017_v29 = vpop.f32.mrf.mxu0  ;;  %v527_v30 = vpop.f32.mrf.mxu1 }
 0x104   :  { %v2019_v31 = vpop.f32.mrf.mxu0  ;;  %v529_v32 = vpop.f32.mrf.mxu1 }
 0x105   :  { %v427_v4 = vadd.f32 %v2019_v31, %v2003_v0 }
 0x106   :  { %v2021_v33 = vpop.f32.mrf.mxu0  ;;  %v2023_v34 = vpop.f32.mrf.mxu1 }
 0x108   :  { %v2025_v35 = vpop.f32.mrf.mxu0  ;;  %v2027_v36 = vpop.f32.mrf.mxu1 }
 0x10a   :  { %v2029_v37 = vpop.f32.mrf.mxu0  ;;  %v2031_v38 = vpop.f32.mrf.mxu1 }
 0x10b   :  { %v2115_v0 = vadd.f32 %v2029_v37, %v2009_v21 }
 0x10c   :  { %v2033_v39 = vpop.f32.mrf.mxu0  ;;  %v2035_v40 = vpop.f32.mrf.mxu1 }
 0x10d   :  { %2194 = vst [vmem:[#allocation9_spill] sm:$0xff] %v2035_v40 }
 0x10e   :  { %v616_v41 = vpop.f32.mrf.mxu0  ;;  %v720_v42 = vpop.f32.mrf.mxu1 }
 0x110   :  { %v618_v43 = vpop.f32.mrf.mxu0  ;;  %v722_v44 = vpop.f32.mrf.mxu1 }
 0x112   :  { %v622_v45 = vpop.f32.mrf.mxu0  ;;  %v2037_v46 = vpop.f32.mrf.mxu1 }
 0x114   :  { %v624_v47 = vpop.f32.mrf.mxu0  ;;  %v2039_v48 = vpop.f32.mrf.mxu1 }
 0x116   :  { %v628_v49 = vpop.f32.mrf.mxu0  ;;  %v2041_v50 = vpop.f32.mrf.mxu1 }
 0x118   :  { %v630_v51 = vpop.f32.mrf.mxu0  ;;  %v2043_v52 = vpop.f32.mrf.mxu1 }
 0x11a   :  { %v634_v53 = vpop.f32.mrf.mxu0  ;;  %v2045_v54 = vpop.f32.mrf.mxu1 }
 0x11c   :  { %v2047_v55 = vpop.f32.mrf.mxu0  ;;  %v2049_v56 = vpop.f32.mrf.mxu1 }
 0x11d   :  { %2195 = vst [vmem:[#allocation10_spill] sm:$0xff] %v2047_v55  ;;  %2196 = vst [vmem:[#allocation11_spill] sm:$0xff] %v2049_v56  ;;  %v623_v55 = vadd.f32 %v622_v45, %v527_v30  ;;  %v631_v30 = vadd.f32 %v630_v51, %v2027_v36 }
 0x11e   :  { %v825_v57 = vpop.f32.mrf.mxu0  ;;  %v914_v58 = vpop.f32.mrf.mxu1 }
 0x120   :  { %v827_v59 = vpop.f32.mrf.mxu0  ;;  %v916_v60 = vpop.f32.mrf.mxu1 }
 0x121   :  { %v917_v36 = vadd.f32 %v916_v60, %v827_v59 }
 0x122   :  { %v831_v61 = vpop.f32.mrf.mxu0  ;;  %v920_v62 = vpop.f32.mrf.mxu1 }
 0x124   :  { %v2051_v63 = vpop.f32.mrf.mxu0  ;;  %v2053_v1 = vpop.f32.mrf.mxu1 }
 0x125   :  { %2197 = vst [vmem:[#allocation12_spill] sm:$0xff] %v2051_v63  ;;  %2198 = vst [vmem:[#allocation13_spill] sm:$0xff] %v2053_v1  ;;  %v625_v1 = vadd.f32 %v624_v47, %v529_v32 }
 0x126   :  { %v2055_v2 = vpop.f32.mrf.mxu0  ;;  %v2057_v3 = vpop.f32.mrf.mxu1 }
 0x127   :  { %2199 = vst [vmem:[#allocation14_spill] sm:$0xff] %v2055_v2  ;;  %2200 = vst [vmem:[#allocation15_spill] sm:$0xff] %v2057_v3  ;;  %v619_v2 = vadd.f32 %v618_v43, %v523_v28  ;;  %v629_v28 = vadd.f32 %v628_v49, %v2023_v34  ;;  %v915_v43 = vadd.f32 %v914_v58, %v825_v57 }
 0x128   :  { %v2059_v5 = vpop.f32.mrf.mxu0  ;;  %v2061_v6 = vpop.f32.mrf.mxu1  ;;  %v746_v31 = vadd.f32 %v2039_v48, %v625_v1  ;;  %v2211_v1 = vld [vmem:[#allocation9_spill] sm:$0xff] }
 0x129   :  { %2201 = vst [vmem:[#allocation16_spill] sm:$0xff] %v2059_v5  ;;  %2202 = vst [vmem:[#allocation17_spill] sm:$0xff] %v2061_v6  ;;  %v1341_v6 = vsub.s32 0, %v1340_v20  ;;  %v744_v32 = vadd.f32 %v722_v44, %v619_v2  ;;  %v2212_v2 = vld [vmem:[#allocation10_spill] sm:$0xff] }
 0x12a   :  { %v2063_v8 = vpop.f32.mrf.mxu0  ;;  %v2065_v9 = vpop.f32.mrf.mxu1  ;;  %v754_v58 = vmax.f32 %v427_v4, %v746_v31 }
 0x12b   :  { %2203 = vst [vmem:[#allocation18_spill] sm:$0xff] %v2063_v8  ;;  %2204 = vst [vmem:[#allocation19_spill] sm:$0xff] %v2065_v9  ;;  %v1345_v8 = vsub.s32 1, %v1340_v20  ;;  %v1337_v9 = vld [vmem:[#allocation6] sm:$0x3]  ;;  %v425_v20 = vadd.f32 %v2015_v27, %v1999_v7  ;;  %v2103_v7 = vadd.f32 %v2021_v33, %v2005_v15  ;;  %v745_v27 = vadd.f32 %v2037_v46, %v623_v55 }
 0x12c   :  { %v2067_v11 = vpop.f32.mrf.mxu0  ;;  %v2069_v12 = vpop.f32.mrf.mxu1  ;;  %v2085_v63 = vrot.slane %v1337_v9, %v1341_v6  ;;  %v747_v33 = vadd.f32 %v2041_v50, %v629_v28  ;;  %v2210_v55 = vld [vmem:[#allocation13_spill] sm:$0xff]  ;;  %v637_v6 = vadd.f32 %v2212_v2, %v2211_v1 }
 0x12d   :  { %2205 = vst [vmem:[#allocation20_spill] sm:$0xff] %v2067_v11  ;;  %2206 = vst [vmem:[#allocation21_spill] sm:$0xff] %v2069_v12  ;;  %v617_v11 = vadd.f32 %v616_v41, %v521_v26  ;;  %v426_v26 = vadd.f32 %v2017_v29, %v2001_v10  ;;  %v2107_v10 = vadd.f32 %v2025_v35, %v2007_v18 }
 0x12e   :  { %v1015_v14 = vpop.f32.mrf.mxu0  ;;  %v635_v29 = vadd.f32 %v634_v53, %v2031_v38  ;;  %v2122_v18 = vadd.f32 %v2033_v39, %v2011_v24  ;;  %v748_v35 = vadd.f32 %v2043_v52, %v631_v30  ;;  %v921_v38 = vadd.f32 %v920_v62, %v831_v61  ;;  %v2209_v53 = vld [vmem:[#allocation12_spill] sm:$0xff] }
 0x12f   :  { %v1120_v16 = vpop.f32.mrf.mxu1  ;;  %v743_v25 = vadd.f32 %v720_v42, %v617_v11  ;;  %v1038_v42 = vadd.f32 %v1015_v14, %v915_v43  ;;  %v752_v47 = vmax.f32 %v425_v20, %v744_v32  ;;  %v753_v48 = vmax.f32 %v426_v26, %v745_v27  ;;  %v2215_v20 = vld [vmem:[#allocation15_spill] sm:$0xff] }
 0x130   :  { %v1017_v17 = vpop.f32.mrf.mxu0  ;;  %v2127_v51 = vadd.f32 %v2045_v54, %v635_v29  ;;  %v923_v57 = vadd.f32 %v2210_v55, %v2209_v53  ;;  %v755_v61 = vmax.f32 %v2103_v7, %v747_v33  ;;  %v756_v62 = vmax.f32 %v2107_v10, %v748_v35  ;;  %v2216_v28 = vld [vmem:[#allocation16_spill] sm:$0xff]  ;;  %v2217_v30 = vld [vmem:[#allocation17_spill] sm:$0xff] }
 0x131   :  { %v1122_v19 = vpop.f32.mrf.mxu1  ;;  %v751_v46 = vmax.f32 %v424_v13, %v743_v25  ;;  %v1039_v21 = vadd.f32 %v1017_v17, %v917_v36  ;;  %v929_v4 = vadd.f32 %v2217_v30, %v2216_v28 }
 0x132   :  { %v1021_v22 = vpop.f32.mrf.mxu0  ;;  %v757_v13 = vmax.f32 %v2115_v0, %v2127_v51  ;;  %v2219_v31 = vld [vmem:[#allocation18_spill] sm:$0xff]  ;;  %v2220_v36 = vld [vmem:[#allocation19_spill] sm:$0xff] }
 0x133   :  { %v2071_v23 = vpop.f32.mrf.mxu1  ;;  %v1040_v24 = vadd.f32 %v1021_v22, %v921_v38  ;;  %v1046_v50 = vmax.f32 %v751_v46, %v1038_v42  ;;  %v933_v42 = vadd.f32 %v2220_v36, %v2219_v31 }
 0x134   :  { %2207 = vst [vmem:[#allocation22_spill] sm:$0xff] %v2071_v23  ;;  %v1023_v56 = vpop.f32.mrf.mxu0  ;;  %v2222_v51 = vld [vmem:[#allocation20_spill] sm:$0xff]  ;;  %v2223_v53 = vld [vmem:[#allocation21_spill] sm:$0xff] }
 0x135   :  { %v2073_v5 = vpop.f32.mrf.mxu1  ;;  %v1048_v25 = vmax.f32 %v753_v48, %v1040_v24  ;;  %v935_v55 = vadd.f32 %v2223_v53, %v2222_v51 }
 0x136   :  { %2208 = vst [vmem:[#allocation23_spill] sm:$0xff] %v2073_v5  ;;  %v2075_v3 = vpop.f32.mrf.mxu0  ;;  %v2087_v5 = vrot.slane %v1337_v9, %v1345_v8  ;;  %v1041_v8 = vadd.f32 %v1023_v56, %v923_v57  ;;  %v1047_v9 = vmax.f32 %v752_v47, %v1039_v21 }
 0x137   :  { %v2077_v12 = vpop.f32.mrf.mxu1 }
 0x138   :  { %v2079_v40 = vpop.f32.mrf.mxu0  ;;  %v1049_v33 = vmax.f32 %v754_v58, %v1041_v8 }
 0x139   :  { %v2083_v23 = vpop.f32.mrf.mxu1  ;;  %v1043_v35 = vadd.f32 %v2079_v40, %v929_v4 }
 0x13a   :  { %v2095_v41 = vpop.f32.mrf.mxu0 }
 0x13b   :  { %v2099_v45 = vpop.f32.mrf.mxu1  ;;  %v1044_v57 = vadd.f32 %v2095_v41, %v933_v42 }
 0x13c   :  { %v2111_v34 = vpop.f32.mrf.mxu0 }
 0x13d   :  { %v2118_v15 = vpop.f32.mrf.mxu1  ;;  %v2218_v10 = vld [vmem:[#allocation23_spill] sm:$0xff]  ;;  %v1045_v1 = vadd.f32 %v2111_v34, %v935_v55 }
 0x13e   :  { %v1209_v44 = vpop.f32.mrf.mxu0 }
 0x13f   :  { %v1210_v37 = vadd.f32 %v1209_v44, %v1120_v16  ;;  %v1298_v49 = vpop.f32.mrf.mxu1  ;;  %v2213_v16 = vld [vmem:[#allocation22_spill] sm:$0xff] }
 0x140   :  { %v1211_v39 = vpop.f32.mrf.mxu0 }
 0x141   :  { %v1321_v59 = vadd.f32 %v1298_v49, %v1210_v37  ;;  %v1212_v52 = vadd.f32 %v1211_v39, %v1122_v19  ;;  %v1300_v60 = vpop.f32.mrf.mxu1  ;;  %v2214_v19 = vld [vmem:[#allocation14_spill] sm:$0xff]  ;;  %v2221_v49 = vld [vmem:[#allocation11_spill] sm:$0xff] }
 0x142   :  { %v1215_v54 = vpop.f32.mrf.mxu0  ;;  %v927_v26 = vadd.f32 %v2215_v20, %v2214_v19  ;;  %v750_v48 = vadd.f32 %v2221_v49, %v637_v6 }
 0x143   :  { %v1329_v11 = vmax.f32 %v1046_v50, %v1321_v59  ;;  %v1322_v14 = vadd.f32 %v1300_v60, %v1212_v52  ;;  %v1216_v17 = vadd.f32 %v1215_v54, %v2213_v16  ;;  %v1304_v22 = vpop.f32.mrf.mxu1  ;;  %v1051_v60 = vmax.f32 %v756_v62, %v1043_v35 }
 0x144   :  { %v1217_v32 = vpop.f32.mrf.mxu0  ;;  %v1042_v0 = vadd.f32 %v2075_v3, %v927_v26 }
 0x145   :  { %v1349_v56 = vadd.f32 %v2085_v63, %v1329_v11  ;;  %v1330_v43 = vmax.f32 %v1047_v9, %v1322_v14  ;;  %v1323_v7 = vadd.f32 %v1304_v22, %v1216_v17  ;;  %v1218_v27 = vadd.f32 %v1217_v32, %v2218_v10  ;;  %v1306_v29 = vpop.f32.mrf.mxu1 }
 0x146   :  { %v1221_v38 = vpop.f32.mrf.mxu0  ;;  %v1050_v52 = vmax.f32 %v755_v61, %v1042_v0  ;;  %v1052_v11 = vmax.f32 %v757_v13, %v1044_v57 }
 0x147   :  { %v1357_v44 = vmax.f32 %v1349_v56, 0.0  ;;  %v1350_v46 = vadd.f32 %v2087_v5, %v1330_v43  ;;  %v1331_v47 = vmax.f32 %v1048_v25, %v1323_v7  ;;  %v1324_v21 = vadd.f32 %v1306_v29, %v1218_v27  ;;  %v1310_v37 = vpop.f32.mrf.mxu1 }
 0x148   :  { %v1222_v24 = vadd.f32 %v1221_v38, %v2077_v12  ;;  %v1223_v39 = vpop.f32.mrf.mxu0 }
 0x149   :  { %1365 = vst [vmem:[%s2193_s4] sm:$0xff] %v1357_v44  ;;  %v1358_v40 = vmax.f32 %v1350_v46, 0.0  ;;  %v1351_v3 = vadd.f32 %v2085_v63, %v1331_v47  ;;  %v1332_v58 = vmax.f32 %v1049_v33, %v1324_v21  ;;  %v1224_v50 = vadd.f32 %v1223_v39, %v2083_v23  ;;  %v1312_v59 = vpop.f32.mrf.mxu1 }
 0x14a   :  { %v1325_v2 = vadd.f32 %v1310_v37, %v1222_v24  ;;  %v1227_v41 = vpop.f32.mrf.mxu0  ;;  %v758_v23 = vmax.f32 %v2122_v18, %v750_v48 }
 0x14b   :  { %1366 = vst [vmem:[%s2193_s4 + $0x8] sm:$0xff] %v1358_v40  ;;  %v1359_v12 = vmax.f32 %v1351_v3, 0.0  ;;  %v1352_v6 = vadd.f32 %v2087_v5, %v1332_v58  ;;  %v1326_v8 = vadd.f32 %v1312_v59, %v1224_v50  ;;  %v1228_v54 = vadd.f32 %v1227_v41, %v2099_v45  ;;  %v1316_v9 = vpop.f32.mrf.mxu1 }
 0x14c   :  { %v1333_v61 = vmax.f32 %v1050_v52, %v1325_v2  ;;  %v1229_v62 = vpop.f32.mrf.mxu0  ;;  %v1053_v20 = vmax.f32 %v758_v23, %v1045_v1 }
 0x14d   :  { %1367 = vst [vmem:[%s2193_s4 + $0x10] sm:$0xff] %v1359_v12  ;;  %v1360_v34 = vmax.f32 %v1352_v6, 0.0  ;;  %v1334_v14 = vmax.f32 %v1051_v60, %v1326_v8  ;;  %v1327_v16 = vadd.f32 %v1316_v9, %v1228_v54  ;;  %v1230_v17 = vadd.f32 %v1229_v62, %v2118_v15  ;;  %v1318_v19 = vpop.f32.mrf.mxu1 }
 0x14e   :  { %v1353_v22 = vadd.f32 %v2085_v63, %v1333_v61 }
 0x14f   :  { %1368 = vst [vmem:[%s2193_s4 + $0x18] sm:$0xff] %v1360_v34  ;;  %v1354_v45 = vadd.f32 %v2087_v5, %v1334_v14  ;;  %v1335_v18 = vmax.f32 %v1052_v11, %v1327_v16  ;;  %v1328_v13 = vadd.f32 %v1318_v19, %v1230_v17 }
 0x150   :  { %v1361_v26 = vmax.f32 %v1353_v22, 0.0 }
 0x151   :  { %v1362_v28 = vmax.f32 %v1354_v45, 0.0  ;;  %v1355_v30 = vadd.f32 %v2085_v63, %v1335_v18  ;;  %v1336_v4 = vmax.f32 %v1053_v20, %v1328_v13 }
 0x152   :  { %1369 = vst [vmem:[%s2193_s4 + $0x20] sm:$0xff] %v1361_v26 }
 0x153   :  { %1370 = vst [vmem:[%s2193_s4 + $0x28] sm:$0xff] %v1362_v28  ;;  %v1363_v15 = vmax.f32 %v1355_v30, 0.0  ;;  %v1356_v25 = vadd.f32 %v2087_v5, %v1336_v4 }
 0x155   :  { %1371 = vst [vmem:[%s2193_s4 + $0x30] sm:$0xf] %v1363_v15  ;;  %v1364_v32 = vmax.f32 %v1356_v25, 0.0 }
 0x157   :  { %1372 = vst [vmem:[%s2193_s4 + $0x38] sm:$0xf] %v1364_v32 }
 0x158   :  { %1377 = vsyncpa [#allocation3], 1 }
 0x159   :  { %1378 = vsyncpa [#allocation5], 1 }

// kernel: cnn_forward.5
= control target key start
LH: loop header
LB: loop body
LE: loop exit
PB: predicated region body
PF: predicated region fallthrough
CT: control target
= control target key end

     0   :  { %v1261_v27 = vmov 1983009808   ;;  %v264_v29 = vlaneseq  ;;  %s2049_s0 = inlined_call_operand.vmem [shape: f32[2,1792], index: 0, kind: input, shape index: {}]   ;;  %s2050_s1 = inlined_call_operand.vmem [shape: f32[1792,128], index: 1, kind: input, shape index: {}]   ;;  %s2051_s2 = inlined_call_operand.vmem [shape: f32[1,128], index: 2, kind: input, shape index: {}]   ;;  %s2052_s3 = inlined_call_operand.vmem [shape: f32[128,128], index: 3, kind: input, shape index: {}]   ;;  %s2053_s4 = inlined_call_operand.vmem [shape: f32[1,128], index: 4, kind: input, shape index: {}]   ;;  %s2054_s5 = inlined_call_operand.hbm [shape: f32[2,128], index: 5, kind: output, shape index: {}]  }
   0x1   :  { %v56_v0 = vld [vmem:[%s2050_s1 + $0xf8] sm:$0xff]  ;;  %v55_v2 = vld [vmem:[%s2050_s1 + $0xf0] sm:$0xff]  ;;  %v54_v6 = vld [vmem:[%s2050_s1 + $0xe8] sm:$0xff]  ;;  %v262_v28 = vunpack.c.l.s4 %v1261_v27 }
   0x2   :  { %v40_v1 = vld [vmem:[%s2050_s1 + $0x78] sm:$0xff]  ;;  %935 = vmatprep.subr.mxu0 %v56_v0  ;;  %v39_v4 = vld [vmem:[%s2050_s1 + $0x70] sm:$0xff]  ;;  %v38_v8 = vld [vmem:[%s2050_s1 + $0x68] sm:$0xff]  ;;  %v265_v39 = vshrl.u32 %v264_v29, 7 }
   0x3   :  { %v88_v3 = vld [vmem:[%s2050_s1 + $0x1f8] sm:$0xff]  ;;  %936 = vmatpush3.msra.mxu0 %v40_v1  ;;  %v87_v7 = vld [vmem:[%s2050_s1 + $0x1f0] sm:$0xff]  ;;  %v86_v10 = vld [vmem:[%s2050_s1 + $0x1e8] sm:$0xff]  ;;  %v263_v38 = vunpack.c.0.s8 %v262_v28 }
   0x4   :  { %v72_v5 = vld [vmem:[%s2050_s1 + $0x178] sm:$0xff]  ;;  %970 = vmatprep.subr.mxu1 %v88_v3  ;;  %937 = vmatprep.subr.mxu0 %v55_v2  ;;  %v71_v9 = vld [vmem:[%s2050_s1 + $0x170] sm:$0xff]  ;;  %v53_v11 = vld [vmem:[%s2050_s1 + $0xe0] sm:$0xff] }
   0x5   :  { %971 = vmatpush3.msra.mxu1 %v72_v5  ;;  %938 = vmatpush3.msra.mxu0 %v39_v4  ;;  %v70_v12 = vld [vmem:[%s2050_s1 + $0x168] sm:$0xff]  ;;  %v37_v13 = vld [vmem:[%s2050_s1 + $0x60] sm:$0xff]  ;;  %v52_v15 = vld [vmem:[%s2050_s1 + $0xd8] sm:$0xff]  ;;  %v1424_v48 = vsub.s32 %v263_v38, %v265_v39 }
   0x6   :  { %972 = vmatprep.subr.mxu1 %v87_v7  ;;  %939 = vmatprep.subr.mxu0 %v54_v6  ;;  %v85_v14 = vld [vmem:[%s2050_s1 + $0x1e0] sm:$0xff]  ;;  %v36_v17 = vld [vmem:[%s2050_s1 + $0x58] sm:$0xff]  ;;  %v51_v19 = vld [vmem:[%s2050_s1 + $0xd0] sm:$0xff] }
   0x7   :  { %973 = vmatpush3.msra.mxu1 %v71_v9  ;;  %940 = vmatpush3.msra.mxu0 %v38_v8  ;;  %v69_v16 = vld [vmem:[%s2050_s1 + $0x160] sm:$0xff]  ;;  %v84_v18 = vld [vmem:[%s2050_s1 + $0x1d8] sm:$0xff]  ;;  %v35_v21 = vld [vmem:[%s2050_s1 + $0x50] sm:$0xff] }
   0x8   :  { %974 = vmatprep.subr.mxu1 %v86_v10  ;;  %941 = vmatprep.subr.mxu0 %v53_v11  ;;  %v68_v20 = vld [vmem:[%s2050_s1 + $0x158] sm:$0xff]  ;;  %v83_v22 = vld [vmem:[%s2050_s1 + $0x1d0] sm:$0xff]  ;;  %v50_v23 = vld [vmem:[%s2050_s1 + $0xc8] sm:$0xff] }
   0x9   :  { %975 = vmatpush3.msra.mxu1 %v70_v12  ;;  %942 = vmatpush3.msra.mxu0 %v37_v13  ;;  %v67_v24 = vld [vmem:[%s2050_s1 + $0x150] sm:$0xff]  ;;  %v34_v25 = vld [vmem:[%s2050_s1 + $0x48] sm:$0xff]  ;;  %v49_v30 = vld [vmem:[%s2050_s1 + $0xc0] sm:$0xff] }
   0xa   :  { %976 = vmatprep.subr.mxu1 %v85_v14  ;;  %943 = vmatprep.subr.mxu0 %v52_v15  ;;  %v82_v26 = vld [vmem:[%s2050_s1 + $0x1c8] sm:$0xff]  ;;  %v33_v32 = vld [vmem:[%s2050_s1 + $0x40] sm:$0xff]  ;;  %v48_v34 = vld [vmem:[%s2050_s1 + $0xb8] sm:$0xff] }
   0xb   :  { %977 = vmatpush3.msra.mxu1 %v69_v16  ;;  %944 = vmatpush3.msra.mxu0 %v36_v17  ;;  %v66_v31 = vld [vmem:[%s2050_s1 + $0x148] sm:$0xff]  ;;  %v81_v33 = vld [vmem:[%s2050_s1 + $0x1c0] sm:$0xff]  ;;  %v32_v36 = vld [vmem:[%s2050_s1 + $0x38] sm:$0xff] }
   0xc   :  { %978 = vmatprep.subr.mxu1 %v84_v18  ;;  %945 = vmatprep.subr.mxu0 %v51_v19  ;;  %v65_v35 = vld [vmem:[%s2050_s1 + $0x140] sm:$0xff]  ;;  %v80_v37 = vld [vmem:[%s2050_s1 + $0x1b8] sm:$0xff]  ;;  %v47_v40 = vld [vmem:[%s2050_s1 + $0xb0] sm:$0xff] }
   0xd   :  { %979 = vmatpush3.msra.mxu1 %v68_v20  ;;  %946 = vmatpush3.msra.mxu0 %v35_v21  ;;  %v64_v41 = vld [vmem:[%s2050_s1 + $0x138] sm:$0xff]  ;;  %v31_v42 = vld [vmem:[%s2050_s1 + $0x30] sm:$0xff]  ;;  %v46_v44 = vld [vmem:[%s2050_s1 + $0xa8] sm:$0xff] }
   0xe   :  { %980 = vmatprep.subr.mxu1 %v83_v22  ;;  %947 = vmatprep.subr.mxu0 %v50_v23  ;;  %v79_v43 = vld [vmem:[%s2050_s1 + $0x1b0] sm:$0xff]  ;;  %v30_v46 = vld [vmem:[%s2050_s1 + $0x28] sm:$0xff]  ;;  %v45_v49 = vld [vmem:[%s2050_s1 + $0xa0] sm:$0xff] }
   0xf   :  { %981 = vmatpush3.msra.mxu1 %v67_v24  ;;  %948 = vmatpush3.msra.mxu0 %v34_v25  ;;  %v63_v45 = vld [vmem:[%s2050_s1 + $0x130] sm:$0xff]  ;;  %v78_v47 = vld [vmem:[%s2050_s1 + $0x1a8] sm:$0xff]  ;;  %v21_v51 = vld [vmem:[%s2049_s0] sm:$0xff] }
  0x10   :  { %982 = vmatprep.subr.mxu1 %v82_v26  ;;  %949 = vmatprep.subr.mxu0 %v49_v30  ;;  %v62_v50 = vld [vmem:[%s2050_s1 + $0x128] sm:$0xff]  ;;  %v29_v52 = vld [vmem:[%s2050_s1 + $0x20] sm:$0xff]  ;;  %v44_v54 = vld [vmem:[%s2050_s1 + $0x98] sm:$0xff]  ;;  %v267_v58 = vrot.slane %v21_v51, %v1424_v48  ;;  %v260_v59 = vcombine.high %v21_v51, %v21_v51 }
  0x11   :  { %983 = vmatpush3.msra.mxu1 %v66_v31  ;;  %950 = vmatpush3.msra.mxu0 %v33_v32  ;;  %v77_v53 = vld [vmem:[%s2050_s1 + $0x1a0] sm:$0xff]  ;;  %v28_v56 = vld [vmem:[%s2050_s1 + $0x18] sm:$0xff]  ;;  %v43_v60 = vld [vmem:[%s2050_s1 + $0x90] sm:$0xff] }
  0x12   :  { %984 = vmatprep.subr.mxu1 %v81_v33  ;;  %951 = vmatprep.subr.mxu0 %v48_v34  ;;  %v61_v55 = vld [vmem:[%s2050_s1 + $0x120] sm:$0xff]  ;;  %v76_v57 = vld [vmem:[%s2050_s1 + $0x198] sm:$0xff]  ;;  %v27_v62 = vld [vmem:[%s2050_s1 + $0x10] sm:$0xff]  ;;  %v275_v4 = vcombine.high %v267_v58, %v267_v58  ;;  %v274_v5 = vrot.slane %v260_v59, %v1424_v48 }
  0x13   :  { %985 = vmatpush3.msra.mxu1 %v65_v35  ;;  %952 = vmatpush3.msra.mxu0 %v32_v36  ;;  %v60_v61 = vld [vmem:[%s2050_s1 + $0x118] sm:$0xff]  ;;  %v75_v63 = vld [vmem:[%s2050_s1 + $0x190] sm:$0xff]  ;;  %v42_v0 = vld [vmem:[%s2050_s1 + $0x88] sm:$0xff] }
  0x14   :  { %986 = vmatprep.subr.mxu1 %v80_v37  ;;  %953 = vmatprep.subr.mxu0 %v47_v40  ;;  %v59_v1 = vld [vmem:[%s2050_s1 + $0x110] sm:$0xff]  ;;  %v26_v2 = vld [vmem:[%s2050_s1 + $0x8] sm:$0xff]  ;;  %v41_v6 = vld [vmem:[%s2050_s1 + $0x80] sm:$0xff]  ;;  %v276_v12 = vcombine.high %v274_v5, %v274_v5 }
  0x15   :  { %987 = vmatpush3.msra.mxu1 %v64_v41  ;;  %954 = vmatpush3.msra.mxu0 %v31_v42  ;;  %v74_v3 = vld [vmem:[%s2050_s1 + $0x188] sm:$0xff]  ;;  %v25_v7 = vld [vmem:[%s2050_s1] sm:$0xff]  ;;  %v120_v10 = vld [vmem:[%s2050_s1 + $0x2f8] sm:$0xff] }
  0x16   :  { %988 = vmatprep.subr.mxu1 %v79_v43  ;;  %955 = vmatprep.subr.mxu0 %v46_v44  ;;  %v58_v8 = vld [vmem:[%s2050_s1 + $0x108] sm:$0xff]  ;;  %v73_v9 = vld [vmem:[%s2050_s1 + $0x180] sm:$0xff]  ;;  %v104_v13 = vld [vmem:[%s2050_s1 + $0x278] sm:$0xff] }
  0x17   :  { %989 = vmatpush3.msra.mxu1 %v63_v45  ;;  %956 = vmatpush3.msra.mxu0 %v30_v46  ;;  %v57_v11 = vld [vmem:[%s2050_s1 + $0x100] sm:$0xff]  ;;  %v119_v14 = vld [vmem:[%s2050_s1 + $0x2f0] sm:$0xff]  ;;  %v152_v15 = vld [vmem:[%s2050_s1 + $0x3f8] sm:$0xff] }
  0x18   :  { %990 = vmatprep.subr.mxu1 %v78_v47  ;;  %957 = vmatprep.subr.mxu0 %v45_v49  ;;  %v103_v16 = vld [vmem:[%s2050_s1 + $0x270] sm:$0xff]  ;;  %v136_v17 = vld [vmem:[%s2050_s1 + $0x378] sm:$0xff]  ;;  %v118_v18 = vld [vmem:[%s2050_s1 + $0x2e8] sm:$0xff] }
  0x19   :  { %991 = vmatpush3.msra.mxu1 %v62_v50  ;;  %958 = vmatpush3.msra.mxu0 %v29_v52  ;;  %v151_v19 = vld [vmem:[%s2050_s1 + $0x3f0] sm:$0xff]  ;;  %v102_v20 = vld [vmem:[%s2050_s1 + $0x268] sm:$0xff]  ;;  %v117_v22 = vld [vmem:[%s2050_s1 + $0x2e0] sm:$0xff] }
  0x1a   :  { %992 = vmatprep.subr.mxu1 %v77_v53  ;;  %959 = vmatprep.subr.mxu0 %v44_v54  ;;  %v135_v21 = vld [vmem:[%s2050_s1 + $0x370] sm:$0xff]  ;;  %v150_v23 = vld [vmem:[%s2050_s1 + $0x3e8] sm:$0xff]  ;;  %v101_v24 = vld [vmem:[%s2050_s1 + $0x260] sm:$0xff] }
  0x1b   :  { %993 = vmatpush3.msra.mxu1 %v61_v55  ;;  %960 = vmatpush3.msra.mxu0 %v28_v56  ;;  %v134_v25 = vld [vmem:[%s2050_s1 + $0x368] sm:$0xff]  ;;  %v116_v26 = vld [vmem:[%s2050_s1 + $0x2d8] sm:$0xff]  ;;  %v149_v27 = vld [vmem:[%s2050_s1 + $0x3e0] sm:$0xff] }
  0x1c   :  { %994 = vmatprep.subr.mxu1 %v76_v57  ;;  %961 = vmatprep.subr.mxu0 %v43_v60  ;;  %v100_v28 = vld [vmem:[%s2050_s1 + $0x258] sm:$0xff]  ;;  %v133_v29 = vld [vmem:[%s2050_s1 + $0x360] sm:$0xff]  ;;  %v115_v30 = vld [vmem:[%s2050_s1 + $0x2d0] sm:$0xff] }
  0x1d   :  { %995 = vmatpush3.msra.mxu1 %v60_v61  ;;  %962 = vmatpush3.msra.mxu0 %v27_v62  ;;  %v148_v31 = vld [vmem:[%s2050_s1 + $0x3d8] sm:$0xff]  ;;  %v99_v32 = vld [vmem:[%s2050_s1 + $0x250] sm:$0xff]  ;;  %v114_v34 = vld [vmem:[%s2050_s1 + $0x2c8] sm:$0xff] }
  0x1e   :  { %996 = vmatprep.subr.mxu1 %v75_v63  ;;  %963 = vmatprep.subr.mxu0 %v42_v0  ;;  %v132_v33 = vld [vmem:[%s2050_s1 + $0x358] sm:$0xff]  ;;  %v147_v35 = vld [vmem:[%s2050_s1 + $0x3d0] sm:$0xff]  ;;  %v98_v36 = vld [vmem:[%s2050_s1 + $0x248] sm:$0xff] }
  0x1f   :  { %997 = vmatpush3.msra.mxu1 %v59_v1  ;;  %964 = vmatpush3.msra.mxu0 %v26_v2  ;;  %v131_v37 = vld [vmem:[%s2050_s1 + $0x350] sm:$0xff]  ;;  %v113_v38 = vld [vmem:[%s2050_s1 + $0x2c0] sm:$0xff]  ;;  %v146_v39 = vld [vmem:[%s2050_s1 + $0x3c8] sm:$0xff] }
  0x20   :  { %998 = vmatprep.subr.mxu1 %v74_v3  ;;  %965 = vmatprep.subr.mxu0 %v41_v6  ;;  %v97_v40 = vld [vmem:[%s2050_s1 + $0x240] sm:$0xff]  ;;  %v130_v41 = vld [vmem:[%s2050_s1 + $0x348] sm:$0xff]  ;;  %v112_v42 = vld [vmem:[%s2050_s1 + $0x2b8] sm:$0xff] }
  0x21   :  { %397 = vmatprep.mubr.f32.mxu0 %v275_v4  ;;  %966 = vmatpush3.msra.mxu0 %v25_v7  ;;  %v145_v43 = vld [vmem:[%s2050_s1 + $0x3c0] sm:$0xff]  ;;  %v96_v44 = vld [vmem:[%s2050_s1 + $0x238] sm:$0xff]  ;;  %v111_v46 = vld [vmem:[%s2050_s1 + $0x2b0] sm:$0xff] }
  0x22   :  { %999 = vmatpush3.msra.mxu1 %v58_v8  ;;  %398 = vmatmul.mubr.f32.vlgmr.msra.gmra.mxu0 %v267_v58  ;;  %v129_v45 = vld [vmem:[%s2050_s1 + $0x340] sm:$0xff]  ;;  %v144_v47 = vld [vmem:[%s2050_s1 + $0x3b8] sm:$0xff]  ;;  %v95_v49 = vld [vmem:[%s2050_s1 + $0x230] sm:$0xff] }
  0x23   :  { %1000 = vmatprep.subr.mxu1 %v73_v9  ;;  %1005 = vmatprep.subr.mxu0 %v120_v10  ;;  %v128_v50 = vld [vmem:[%s2050_s1 + $0x338] sm:$0xff]  ;;  %v110_v51 = vld [vmem:[%s2050_s1 + $0x2a8] sm:$0xff]  ;;  %v143_v52 = vld [vmem:[%s2050_s1 + $0x3b0] sm:$0xff] }
  0x24   :  { %1001 = vmatpush3.msra.mxu1 %v57_v11  ;;  %467 = vmatprep.mubr.f32.mxu1 %v276_v12  ;;  %v94_v53 = vld [vmem:[%s2050_s1 + $0x228] sm:$0xff]  ;;  %v127_v54 = vld [vmem:[%s2050_s1 + $0x330] sm:$0xff]  ;;  %v109_v55 = vld [vmem:[%s2050_s1 + $0x2a0] sm:$0xff] }
  0x25   :  { %1006 = vmatpush3.msra.mxu0 %v104_v13  ;;  %468 = vmatmul.mubr.f32.vlgmr.msra.gmra.mxu1 %v274_v5  ;;  %v142_v56 = vld [vmem:[%s2050_s1 + $0x3a8] sm:$0xff]  ;;  %v93_v57 = vld [vmem:[%s2050_s1 + $0x220] sm:$0xff]  ;;  %v108_v60 = vld [vmem:[%s2050_s1 + $0x298] sm:$0xff] }
  0x26   :  { %1007 = vmatprep.subr.mxu0 %v119_v14  ;;  %1040 = vmatprep.subr.mxu1 %v152_v15  ;;  %v22_v58 = vld [vmem:[%s2049_s0 + $0x8] sm:$0xff]  ;;  %v141_v61 = vld [vmem:[%s2050_s1 + $0x3a0] sm:$0xff]  ;;  %v92_v62 = vld [vmem:[%s2050_s1 + $0x218] sm:$0xff] }
  0x27   :  { %1008 = vmatpush3.msra.mxu0 %v103_v16  ;;  %1041 = vmatpush3.msra.mxu1 %v136_v17  ;;  %v126_v59 = vld [vmem:[%s2050_s1 + $0x328] sm:$0xff]  ;;  %v125_v63 = vld [vmem:[%s2050_s1 + $0x320] sm:$0xff]  ;;  %v107_v0 = vld [vmem:[%s2050_s1 + $0x290] sm:$0xff]  ;;  %v277_v1 = vcombine.high %v22_v58, %v22_v58  ;;  %v284_v4 = vrot.slane %v22_v58, %v1424_v48 }
  0x28   :  { %1009 = vmatprep.subr.mxu0 %v118_v18  ;;  %1042 = vmatprep.subr.mxu1 %v151_v19  ;;  %v140_v2 = vld [vmem:[%s2050_s1 + $0x398] sm:$0xff]  ;;  %v91_v3 = vld [vmem:[%s2050_s1 + $0x210] sm:$0xff]  ;;  %v106_v6 = vld [vmem:[%s2050_s1 + $0x288] sm:$0xff] }
  0x29   :  { %1010 = vmatpush3.msra.mxu0 %v102_v20  ;;  %1043 = vmatpush3.msra.mxu1 %v135_v21  ;;  %v124_v5 = vld [vmem:[%s2050_s1 + $0x318] sm:$0xff]  ;;  %v139_v7 = vld [vmem:[%s2050_s1 + $0x390] sm:$0xff]  ;;  %v90_v8 = vld [vmem:[%s2050_s1 + $0x208] sm:$0xff]  ;;  %v291_v11 = vrot.slane %v277_v1, %v1424_v48  ;;  %v292_v14 = vcombine.high %v284_v4, %v284_v4 }
  0x2a   :  { %1011 = vmatprep.subr.mxu0 %v117_v22  ;;  %1044 = vmatprep.subr.mxu1 %v150_v23  ;;  %v123_v9 = vld [vmem:[%s2050_s1 + $0x310] sm:$0xff]  ;;  %v105_v10 = vld [vmem:[%s2050_s1 + $0x280] sm:$0xff]  ;;  %v138_v12 = vld [vmem:[%s2050_s1 + $0x388] sm:$0xff] }
  0x2b   :  { %1012 = vmatpush3.msra.mxu0 %v101_v24  ;;  %1045 = vmatpush3.msra.mxu1 %v134_v25  ;;  %v89_v13 = vld [vmem:[%s2050_s1 + $0x200] sm:$0xff]  ;;  %v122_v15 = vld [vmem:[%s2050_s1 + $0x308] sm:$0xff]  ;;  %v184_v17 = vld [vmem:[%s2050_s1 + $0x4f8] sm:$0xff]  ;;  %v293_v19 = vcombine.high %v291_v11, %v291_v11 }
  0x2c   :  { %1013 = vmatprep.subr.mxu0 %v116_v26  ;;  %1046 = vmatprep.subr.mxu1 %v149_v27  ;;  %v137_v16 = vld [vmem:[%s2050_s1 + $0x380] sm:$0xff]  ;;  %v168_v20 = vld [vmem:[%s2050_s1 + $0x478] sm:$0xff]  ;;  %v183_v21 = vld [vmem:[%s2050_s1 + $0x4f0] sm:$0xff] }
  0x2d   :  { %1014 = vmatpush3.msra.mxu0 %v100_v28  ;;  %1047 = vmatpush3.msra.mxu1 %v133_v29  ;;  %v121_v18 = vld [vmem:[%s2050_s1 + $0x300] sm:$0xff]  ;;  %v216_v22 = vld [vmem:[%s2050_s1 + $0x5f8] sm:$0xff]  ;;  %v167_v23 = vld [vmem:[%s2050_s1 + $0x470] sm:$0xff] }
  0x2e   :  { %1015 = vmatprep.subr.mxu0 %v115_v30  ;;  %1048 = vmatprep.subr.mxu1 %v148_v31  ;;  %v200_v24 = vld [vmem:[%s2050_s1 + $0x578] sm:$0xff]  ;;  %v182_v25 = vld [vmem:[%s2050_s1 + $0x4e8] sm:$0xff]  ;;  %v215_v26 = vld [vmem:[%s2050_s1 + $0x5f0] sm:$0xff] }
  0x2f   :  { %1016 = vmatpush3.msra.mxu0 %v99_v32  ;;  %1049 = vmatpush3.msra.mxu1 %v132_v33  ;;  %v166_v27 = vld [vmem:[%s2050_s1 + $0x468] sm:$0xff]  ;;  %v199_v28 = vld [vmem:[%s2050_s1 + $0x570] sm:$0xff]  ;;  %v181_v29 = vld [vmem:[%s2050_s1 + $0x4e0] sm:$0xff] }
  0x30   :  { %1017 = vmatprep.subr.mxu0 %v114_v34  ;;  %1050 = vmatprep.subr.mxu1 %v147_v35  ;;  %v214_v30 = vld [vmem:[%s2050_s1 + $0x5e8] sm:$0xff]  ;;  %v165_v31 = vld [vmem:[%s2050_s1 + $0x460] sm:$0xff]  ;;  %v180_v33 = vld [vmem:[%s2050_s1 + $0x4d8] sm:$0xff] }
  0x31   :  { %1018 = vmatpush3.msra.mxu0 %v98_v36  ;;  %1051 = vmatpush3.msra.mxu1 %v131_v37  ;;  %v198_v32 = vld [vmem:[%s2050_s1 + $0x568] sm:$0xff]  ;;  %v213_v34 = vld [vmem:[%s2050_s1 + $0x5e0] sm:$0xff]  ;;  %v164_v35 = vld [vmem:[%s2050_s1 + $0x458] sm:$0xff] }
  0x32   :  { %1019 = vmatprep.subr.mxu0 %v113_v38  ;;  %1052 = vmatprep.subr.mxu1 %v146_v39  ;;  %v197_v36 = vld [vmem:[%s2050_s1 + $0x560] sm:$0xff]  ;;  %v179_v37 = vld [vmem:[%s2050_s1 + $0x4d0] sm:$0xff]  ;;  %v212_v38 = vld [vmem:[%s2050_s1 + $0x5d8] sm:$0xff] }
  0x33   :  { %1020 = vmatpush3.msra.mxu0 %v97_v40  ;;  %1053 = vmatpush3.msra.mxu1 %v130_v41  ;;  %v163_v39 = vld [vmem:[%s2050_s1 + $0x450] sm:$0xff] }
  0x34   :  { %1021 = vmatprep.subr.mxu0 %v112_v42  ;;  %1054 = vmatprep.subr.mxu1 %v145_v43 }
  0x35   :  { %1022 = vmatpush3.msra.mxu0 %v96_v44  ;;  %1055 = vmatpush3.msra.mxu1 %v129_v45 }
  0x36   :  { %1023 = vmatprep.subr.mxu0 %v111_v46  ;;  %1056 = vmatprep.subr.mxu1 %v144_v47 }
  0x37   :  { %1024 = vmatpush3.msra.mxu0 %v95_v49  ;;  %1057 = vmatpush3.msra.mxu1 %v128_v50 }
  0x38   :  { %1025 = vmatprep.subr.mxu0 %v110_v51  ;;  %1058 = vmatprep.subr.mxu1 %v143_v52 }
  0x39   :  { %1026 = vmatpush3.msra.mxu0 %v94_v53  ;;  %1059 = vmatpush3.msra.mxu1 %v127_v54 }
  0x3a   :  { %1027 = vmatprep.subr.mxu0 %v109_v55  ;;  %1060 = vmatprep.subr.mxu1 %v142_v56 }
  0x3b   :  { %1028 = vmatpush3.msra.mxu0 %v93_v57  ;;  %1061 = vmatpush3.msra.mxu1 %v126_v59 }
  0x3c   :  { %1029 = vmatprep.subr.mxu0 %v108_v60  ;;  %1062 = vmatprep.subr.mxu1 %v141_v61 }
  0x3d   :  { %1030 = vmatpush3.msra.mxu0 %v92_v62  ;;  %1063 = vmatpush3.msra.mxu1 %v125_v63 }
  0x3e   :  { %1031 = vmatprep.subr.mxu0 %v107_v0  ;;  %1064 = vmatprep.subr.mxu1 %v140_v2 }
  0x3f   :  { %1032 = vmatpush3.msra.mxu0 %v91_v3  ;;  %1065 = vmatpush3.msra.mxu1 %v124_v5 }
  0x40   :  { %1033 = vmatprep.subr.mxu0 %v106_v6  ;;  %1066 = vmatprep.subr.mxu1 %v139_v7 }
  0x41   :  { %1034 = vmatpush3.msra.mxu0 %v90_v8  ;;  %1067 = vmatpush3.msra.mxu1 %v123_v9 }
  0x42   :  { %1035 = vmatprep.subr.mxu0 %v105_v10  ;;  %1068 = vmatprep.subr.mxu1 %v138_v12 }
  0x43   :  { %1036 = vmatpush3.msra.mxu0 %v89_v13  ;;  %537 = vmatprep.mubr.f32.mxu0 %v292_v14 }
  0x44   :  { %1069 = vmatpush3.msra.mxu1 %v122_v15  ;;  %538 = vmatmul.mubr.f32.vlgmr.msra.gmra.mxu0 %v284_v4 }
  0x45   :  { %1070 = vmatprep.subr.mxu1 %v137_v16  ;;  %1075 = vmatprep.subr.mxu0 %v184_v17 }
  0x46   :  { %1071 = vmatpush3.msra.mxu1 %v121_v18  ;;  %607 = vmatprep.mubr.f32.mxu1 %v293_v19 }
  0x47   :  { %1076 = vmatpush3.msra.mxu0 %v168_v20  ;;  %608 = vmatmul.mubr.f32.vlgmr.msra.gmra.mxu1 %v291_v11 }
  0x48   :  { %1077 = vmatprep.subr.mxu0 %v183_v21  ;;  %1110 = vmatprep.subr.mxu1 %v216_v22 }
  0x49   :  { %1078 = vmatpush3.msra.mxu0 %v167_v23  ;;  %1111 = vmatpush3.msra.mxu1 %v200_v24 }
  0x4a   :  { %1079 = vmatprep.subr.mxu0 %v182_v25  ;;  %1112 = vmatprep.subr.mxu1 %v215_v26 }
  0x4b   :  { %1080 = vmatpush3.msra.mxu0 %v166_v27  ;;  %1113 = vmatpush3.msra.mxu1 %v199_v28 }
  0x4c   :  { %1081 = vmatprep.subr.mxu0 %v181_v29  ;;  %1114 = vmatprep.subr.mxu1 %v214_v30 }
  0x4d   :  { %1082 = vmatpush3.msra.mxu0 %v165_v31  ;;  %1115 = vmatpush3.msra.mxu1 %v198_v32 }
  0x4e   :  { %1083 = vmatprep.subr.mxu0 %v180_v33 }
  0x4f   :  { %10 = vsyncpa [#allocation3], 0  ;;  %1116 = vmatprep.subr.mxu1 %v213_v34  ;;  %1084 = vmatpush3.msra.mxu0 %v164_v35  ;;  %v196_v40 = vld [vmem:[%s2050_s1 + $0x558] sm:$0xff]  ;;  %v178_v41 = vld [vmem:[%s2050_s1 + $0x4c8] sm:$0xff]  ;;  %vm1263_vm0 = vmmov 0   ;;  %s1264_s27 = smov [#allocation2]  }
  0x50   :  { %1117 = vmatpush3.msra.mxu1 %v197_v36  ;;  %1085 = vmatprep.subr.mxu0 %v179_v37  ;;  %v211_v42 = vld [vmem:[%s2050_s1 + $0x5d0] sm:$0xff]  ;;  %v162_v43 = vld [vmem:[%s2050_s1 + $0x448] sm:$0xff]  ;;  %v177_v45 = vld [vmem:[%s2050_s1 + $0x4c0] sm:$0xff]  ;;  %s924_s28 = sshll.u32 %s1264_s27, 4  ;;  %s925_s28 = int_to_ptr.vmem [resolvable:$true] %s924_s28 }
  0x51   :  { %1118 = vmatprep.subr.mxu1 %v212_v38  ;;  %1086 = vmatpush3.msra.mxu0 %v163_v39  ;;  %v195_v44 = vld [vmem:[%s2050_s1 + $0x550] sm:$0xff]  ;;  %v210_v46 = vld [vmem:[%s2050_s1 + $0x5c8] sm:$0xff]  ;;  %v161_v47 = vld [vmem:[%s2050_s1 + $0x440] sm:$0xff]  ;;  %s1239_s29 = scalar_lea.vmem %s925_s28, 32  ;;  %p1244_p1 = scmp.lt.s32.totalorder %s925_s28, %s925_s28 }
  0x52   :  { %1119 = vmatpush3.msra.mxu1 %v196_v40  ;;  %1087 = vmatprep.subr.mxu0 %v178_v41  ;;  %v194_v49 = vld [vmem:[%s2050_s1 + $0x548] sm:$0xff]  ;;  %v176_v50 = vld [vmem:[%s2050_s1 + $0x4b8] sm:$0xff]  ;;  %v209_v51 = vld [vmem:[%s2050_s1 + $0x5c0] sm:$0xff]  ;;  %p1240_p0 = scmp.ne.s32.totalorder %s925_s28, %s1239_s29  ;;  %p1245_p2 = scmp.lt.s32.totalorder %s1239_s29, %s1239_s29 }
  0x53   :  { %1120 = vmatprep.subr.mxu1 %v211_v42  ;;  %1088 = vmatpush3.msra.mxu0 %v162_v43  ;;  %v160_v52 = vld [vmem:[%s2050_s1 + $0x438] sm:$0xff]  ;;  %v193_v53 = vld [vmem:[%s2050_s1 + $0x540] sm:$0xff]  ;;  %v175_v54 = vld [vmem:[%s2050_s1 + $0x4b0] sm:$0xff] }
  0x54   :  { %1121 = vmatpush3.msra.mxu1 %v195_v44  ;;  %1089 = vmatprep.subr.mxu0 %v177_v45  ;;  %v208_v55 = vld [vmem:[%s2050_s1 + $0x5b8] sm:$0xff]  ;;  %v159_v56 = vld [vmem:[%s2050_s1 + $0x430] sm:$0xff]  ;;  %v174_v58 = vld [vmem:[%s2050_s1 + $0x4a8] sm:$0xff]  ;;  %p1246_p3 = por %p1245_p2, %p1244_p1 }
  0x55   :  { %1122 = vmatprep.subr.mxu1 %v210_v46  ;;  %1090 = vmatpush3.msra.mxu0 %v161_v47  ;;  %v192_v57 = vld [vmem:[%s2050_s1 + $0x538] sm:$0xff]  ;;  %v207_v59 = vld [vmem:[%s2050_s1 + $0x5b0] sm:$0xff]  ;;  %v158_v60 = vld [vmem:[%s2050_s1 + $0x428] sm:$0xff] }
  0x56   :  { %1123 = vmatpush3.msra.mxu1 %v194_v49  ;;  %1091 = vmatprep.subr.mxu0 %v176_v50  ;;  %v191_v61 = vld [vmem:[%s2050_s1 + $0x530] sm:$0xff]  ;;  %v173_v62 = vld [vmem:[%s2050_s1 + $0x4a0] sm:$0xff]  ;;  %v206_v63 = vld [vmem:[%s2050_s1 + $0x5a8] sm:$0xff]  ;;  %p1247_p4 = pnand %p1246_p3, %p1240_p0 }
  0x57   :  { %1124 = vmatprep.subr.mxu1 %v209_v51  ;;  %1092 = vmatpush3.msra.mxu0 %v160_v52  ;;  %v157_v0 = vld [vmem:[%s2050_s1 + $0x420] sm:$0xff]  ;;  %v23_v1 = vld [vmem:[%s2049_s0 + $0x10] sm:$0xff]  ;;  %v190_v2 = vld [vmem:[%s2050_s1 + $0x528] sm:$0xff] }
  0x58   :  { %1125 = vmatpush3.msra.mxu1 %v193_v53  ;;  %1093 = vmatprep.subr.mxu0 %v175_v54  ;;  %v172_v3 = vld [vmem:[%s2050_s1 + $0x498] sm:$0xff]  ;;  %v205_v4 = vld [vmem:[%s2050_s1 + $0x5a0] sm:$0xff]  ;;  %v171_v7 = vld [vmem:[%s2050_s1 + $0x490] sm:$0xff]  ;;  %v294_v8 = vcombine.high %v23_v1, %v23_v1  ;;  %v301_v11 = vrot.slane %v23_v1, %v1424_v48 }
  0x59   :  { %1126 = vmatprep.subr.mxu1 %v208_v55  ;;  %1094 = vmatpush3.msra.mxu0 %v159_v56  ;;  %v156_v5 = vld [vmem:[%s2050_s1 + $0x418] sm:$0xff]  ;;  %v189_v6 = vld [vmem:[%s2050_s1 + $0x520] sm:$0xff]  ;;  %v155_v10 = vld [vmem:[%s2050_s1 + $0x410] sm:$0xff] }
  0x5a   :  { %1127 = vmatpush3.msra.mxu1 %v192_v57  ;;  %1095 = vmatprep.subr.mxu0 %v174_v58  ;;  %v204_v9 = vld [vmem:[%s2050_s1 + $0x598] sm:$0xff]  ;;  %v170_v13 = vld [vmem:[%s2050_s1 + $0x488] sm:$0xff]  ;;  %v203_v14 = vld [vmem:[%s2050_s1 + $0x590] sm:$0xff]  ;;  %v308_v18 = vrot.slane %v294_v8, %v1424_v48  ;;  %v309_v21 = vcombine.high %v301_v11, %v301_v11 }
  0x5b   :  { %1128 = vmatprep.subr.mxu1 %v207_v59  ;;  %1096 = vmatpush3.msra.mxu0 %v158_v60  ;;  %v188_v12 = vld [vmem:[%s2050_s1 + $0x518] sm:$0xff]  ;;  %v154_v15 = vld [vmem:[%s2050_s1 + $0x408] sm:$0xff]  ;;  %v187_v16 = vld [vmem:[%s2050_s1 + $0x510] sm:$0xff] }
  0x5c   :  { %1129 = vmatpush3.msra.mxu1 %v191_v61  ;;  %1097 = vmatprep.subr.mxu0 %v173_v62  ;;  %v169_v17 = vld [vmem:[%s2050_s1 + $0x480] sm:$0xff]  ;;  %v202_v19 = vld [vmem:[%s2050_s1 + $0x588] sm:$0xff]  ;;  %v1888_v23 = vld.sshfl [vmem:[%s2049_s0 + $0x18] sm:$0x33 pattern:$0x76325410]  ;;  %v310_v26 = vcombine.high %v308_v18, %v308_v18 }
  0x5d   :  { %1130 = vmatprep.subr.mxu1 %v206_v63  ;;  %1098 = vmatpush3.msra.mxu0 %v157_v0  ;;  %v153_v20 = vld [vmem:[%s2050_s1 + $0x400] sm:$0xff]  ;;  %v186_v22 = vld [vmem:[%s2050_s1 + $0x508] sm:$0xff]  ;;  %v248_v24 = vld [vmem:[%s2050_s1 + $0x6f8] sm:$0xff]  ;;  %v318_v29 = vcombine.high %v1888_v23, %v1888_v23  ;;  %v1262_v61 = vmov 0.0  }
  0x5e   :  { %1131 = vmatpush3.msra.mxu1 %v190_v2  ;;  %1099 = vmatprep.subr.mxu0 %v172_v3  ;;  %v201_v48 = vld [vmem:[%s2050_s1 + $0x580] sm:$0xff]  ;;  %v232_v27 = vld [vmem:[%s2050_s1 + $0x678] sm:$0xff]  ;;  %v247_v28 = vld [vmem:[%s2050_s1 + $0x6f0] sm:$0xff] }
  0x5f   :  { %1132 = vmatprep.subr.mxu1 %v205_v4  ;;  %1100 = vmatpush3.msra.mxu0 %v156_v5  ;;  %v185_v25 = vld [vmem:[%s2050_s1 + $0x500] sm:$0xff]  ;;  %v231_v30 = vld [vmem:[%s2050_s1 + $0x670] sm:$0xff]  ;;  %v246_v31 = vld [vmem:[%s2050_s1 + $0x6e8] sm:$0xff] }
  0x60   :  { %1133 = vmatpush3.msra.mxu1 %v189_v6  ;;  %1101 = vmatprep.subr.mxu0 %v171_v7  ;;  %v230_v32 = vld [vmem:[%s2050_s1 + $0x668] sm:$0xff]  ;;  %v245_v33 = vld [vmem:[%s2050_s1 + $0x6e0] sm:$0xff]  ;;  %v244_v35 = vld [vmem:[%s2050_s1 + $0x6d8] sm:$0xff] }
  0x61   :  { %1134 = vmatprep.subr.mxu1 %v204_v9  ;;  %1102 = vmatpush3.msra.mxu0 %v155_v10  ;;  %v229_v34 = vld [vmem:[%s2050_s1 + $0x660] sm:$0xff]  ;;  %v228_v36 = vld [vmem:[%s2050_s1 + $0x658] sm:$0xff]  ;;  %v243_v37 = vld [vmem:[%s2050_s1 + $0x6d0] sm:$0xff] }
  0x62   :  { %1135 = vmatpush3.msra.mxu1 %v188_v12  ;;  %1103 = vmatprep.subr.mxu0 %v170_v13  ;;  %v227_v38 = vld [vmem:[%s2050_s1 + $0x650] sm:$0xff]  ;;  %v242_v39 = vld [vmem:[%s2050_s1 + $0x6c8] sm:$0xff]  ;;  %v241_v41 = vld [vmem:[%s2050_s1 + $0x6c0] sm:$0xff] }
  0x63   :  { %1136 = vmatprep.subr.mxu1 %v203_v14  ;;  %1104 = vmatpush3.msra.mxu0 %v154_v15  ;;  %v226_v40 = vld [vmem:[%s2050_s1 + $0x648] sm:$0xff]  ;;  %v225_v42 = vld [vmem:[%s2050_s1 + $0x640] sm:$0xff]  ;;  %v240_v43 = vld [vmem:[%s2050_s1 + $0x6b8] sm:$0xff] }
  0x64   :  { %1137 = vmatpush3.msra.mxu1 %v187_v16  ;;  %1105 = vmatprep.subr.mxu0 %v169_v17  ;;  %v224_v44 = vld [vmem:[%s2050_s1 + $0x638] sm:$0xff]  ;;  %v239_v45 = vld [vmem:[%s2050_s1 + $0x6b0] sm:$0xff]  ;;  %v238_v47 = vld [vmem:[%s2050_s1 + $0x6a8] sm:$0xff] }
  0x65   :  { %1138 = vmatprep.subr.mxu1 %v202_v19  ;;  %1106 = vmatpush3.msra.mxu0 %v153_v20  ;;  %v223_v46 = vld [vmem:[%s2050_s1 + $0x630] sm:$0xff]  ;;  %v222_v49 = vld [vmem:[%s2050_s1 + $0x628] sm:$0xff]  ;;  %v237_v50 = vld [vmem:[%s2050_s1 + $0x6a0] sm:$0xff] }
  0x66   :  { %677 = vmatprep.mubr.f32.mxu0 %v309_v21  ;;  %1139 = vmatpush3.msra.mxu1 %v186_v22  ;;  %v221_v51 = vld [vmem:[%s2050_s1 + $0x620] sm:$0xff]  ;;  %v236_v52 = vld [vmem:[%s2050_s1 + $0x698] sm:$0xff]  ;;  %v235_v54 = vld [vmem:[%s2050_s1 + $0x690] sm:$0xff] }
  0x67   :  { %678 = vmatmul.mubr.f32.vlgmr.msra.gmra.mxu0 %v301_v11  ;;  %1140 = vmatprep.subr.mxu1 %v201_v48  ;;  %v220_v53 = vld [vmem:[%s2050_s1 + $0x618] sm:$0xff]  ;;  %v219_v55 = vld [vmem:[%s2050_s1 + $0x610] sm:$0xff]  ;;  %v234_v56 = vld [vmem:[%s2050_s1 + $0x688] sm:$0xff] }
  0x68   :  { %1145 = vmatprep.subr.mxu0 %v248_v24  ;;  %1141 = vmatpush3.msra.mxu1 %v185_v25  ;;  %v218_v57 = vld [vmem:[%s2050_s1 + $0x608] sm:$0xff]  ;;  %v233_v58 = vld [vmem:[%s2050_s1 + $0x680] sm:$0xff]  ;;  %v839_v60 = vld [vmem:[%s2052_s3 + $0x78] sm:$0xff] }
  0x69   :  { %747 = vmatprep.mubr.f32.mxu1 %v310_v26  ;;  %1146 = vmatpush3.msra.mxu0 %v232_v27  ;;  %v217_v59 = vld [vmem:[%s2050_s1 + $0x600] sm:$0xff]  ;;  %v838_v62 = vld [vmem:[%s2052_s3 + $0x70] sm:$0xff]  ;;  %v837_v63 = vld [vmem:[%s2052_s3 + $0x68] sm:$0xff] }
  0x6a   :  { %748 = vmatmul.mubr.f32.vlgmr.msra.gmra.mxu1 %v308_v18  ;;  %1147 = vmatprep.subr.mxu0 %v247_v28  ;;  %v836_v0 = vld [vmem:[%s2052_s3 + $0x60] sm:$0xff]  ;;  %v835_v1 = vld [vmem:[%s2052_s3 + $0x58] sm:$0xff]  ;;  %v834_v2 = vld [vmem:[%s2052_s3 + $0x50] sm:$0xff] }
  0x6b   :  { %1148 = vmatpush3.msra.mxu0 %v231_v30  ;;  %817 = vmatprep.mubr.f32.mxu0 %v318_v29  ;;  %v833_v3 = vld [vmem:[%s2052_s3 + $0x48] sm:$0xff]  ;;  %v832_v4 = vld [vmem:[%s2052_s3 + $0x40] sm:$0xff]  ;;  %v831_v5 = vld [vmem:[%s2052_s3 + $0x38] sm:$0xff] }
  0x6c   :  { %1149 = vmatprep.subr.mxu0 %v246_v31  ;;  %1197 = vmatprep.subr.mxu1 %v1262_v61  ;;  %v830_v6 = vld [vmem:[%s2052_s3 + $0x30] sm:$0xff]  ;;  %v829_v7 = vld [vmem:[%s2052_s3 + $0x28] sm:$0xff]  ;;  %v828_v8 = vld [vmem:[%s2052_s3 + $0x20] sm:$0xff] }
  0x6d   :  { %1150 = vmatpush3.msra.mxu0 %v230_v32  ;;  %1198 = vmatpush3.msra.mxu1 %v839_v60  ;;  %v827_v9 = vld [vmem:[%s2052_s3 + $0x18] sm:$0xff]  ;;  %v826_v10 = vld [vmem:[%s2052_s3 + $0x10] sm:$0xff]  ;;  %v825_v11 = vld [vmem:[%s2052_s3 + $0x8] sm:$0xff] }
  0x6e   :  { %1151 = vmatprep.subr.mxu0 %v245_v33  ;;  %1199 = vmatprep.subr.mxu1 %v1262_v61  ;;  %v824_v12 = vld [vmem:[%s2052_s3] sm:$0xff] }
  0x6f   :  { %1152 = vmatpush3.msra.mxu0 %v229_v34  ;;  %1200 = vmatpush3.msra.mxu1 %v838_v62  ;;  %v932_v18 = vld [vmem:[%s2051_s2] ss:$0 sm:$0xff] }
  0x70   :  { %1153 = vmatprep.subr.mxu0 %v244_v35  ;;  %1201 = vmatprep.subr.mxu1 %v1262_v61 }
  0x71   :  { %1154 = vmatpush3.msra.mxu0 %v228_v36  ;;  %1202 = vmatpush3.msra.mxu1 %v837_v63 }
  0x72   :  { %1155 = vmatprep.subr.mxu0 %v243_v37  ;;  %1203 = vmatprep.subr.mxu1 %v1262_v61 }
  0x73   :  { %1156 = vmatpush3.msra.mxu0 %v227_v38  ;;  %1204 = vmatpush3.msra.mxu1 %v836_v0 }
  0x74   :  { %1157 = vmatprep.subr.mxu0 %v242_v39  ;;  %1205 = vmatprep.subr.mxu1 %v1262_v61 }
  0x75   :  { %1158 = vmatpush3.msra.mxu0 %v226_v40  ;;  %1206 = vmatpush3.msra.mxu1 %v835_v1 }
  0x76   :  { %1159 = vmatprep.subr.mxu0 %v241_v41  ;;  %1207 = vmatprep.subr.mxu1 %v1262_v61 }
  0x77   :  { %1160 = vmatpush3.msra.mxu0 %v225_v42  ;;  %1208 = vmatpush3.msra.mxu1 %v834_v2  ;;  %v934_v42 = vld [vmem:[%s2053_s4] ss:$0 sm:$0xff] }
  0x78   :  { %1161 = vmatprep.subr.mxu0 %v240_v43  ;;  %1209 = vmatprep.subr.mxu1 %v1262_v61 }
  0x79   :  { %1162 = vmatpush3.msra.mxu0 %v224_v44  ;;  %1210 = vmatpush3.msra.mxu1 %v833_v3 }
  0x7a   :  { %1163 = vmatprep.subr.mxu0 %v239_v45  ;;  %1211 = vmatprep.subr.mxu1 %v1262_v61 }
  0x7b   :  { %1164 = vmatpush3.msra.mxu0 %v223_v46  ;;  %1212 = vmatpush3.msra.mxu1 %v832_v4 }
  0x7c   :  { %1165 = vmatprep.subr.mxu0 %v238_v47  ;;  %1213 = vmatprep.subr.mxu1 %v1262_v61 }
  0x7d   :  { %1166 = vmatpush3.msra.mxu0 %v222_v49  ;;  %1214 = vmatpush3.msra.mxu1 %v831_v5 }
  0x7e   :  { %1167 = vmatprep.subr.mxu0 %v237_v50  ;;  %1215 = vmatprep.subr.mxu1 %v1262_v61 }
  0x7f   :  { %1168 = vmatpush3.msra.mxu0 %v221_v51  ;;  %1216 = vmatpush3.msra.mxu1 %v830_v6 }
  0x80   :  { %1169 = vmatprep.subr.mxu0 %v236_v52  ;;  %1217 = vmatprep.subr.mxu1 %v1262_v61 }
  0x81   :  { %1170 = vmatpush3.msra.mxu0 %v220_v53  ;;  %1218 = vmatpush3.msra.mxu1 %v829_v7 }
  0x82   :  { %1171 = vmatprep.subr.mxu0 %v235_v54  ;;  %1219 = vmatprep.subr.mxu1 %v1262_v61 }
  0x83   :  { %1172 = vmatpush3.msra.mxu0 %v219_v55  ;;  %1220 = vmatpush3.msra.mxu1 %v828_v8 }
  0x84   :  { %1173 = vmatprep.subr.mxu0 %v234_v56  ;;  %1221 = vmatprep.subr.mxu1 %v1262_v61 }
  0x85   :  { %1174 = vmatpush3.msra.mxu0 %v218_v57  ;;  %1222 = vmatpush3.msra.mxu1 %v827_v9 }
  0x86   :  { %1175 = vmatprep.subr.mxu0 %v233_v58  ;;  %1223 = vmatprep.subr.mxu1 %v1262_v61 }
  0x87   :  { %1176 = vmatpush3.msra.mxu0 %v217_v59  ;;  %1224 = vmatpush3.msra.mxu1 %v826_v10 }
  0x88   :  { %818 = vmatmul.mubr.f32.vlgmr.msra.gmra.mxu0 %v1888_v23  ;;  %1225 = vmatprep.subr.mxu1 %v1262_v61 }
  0x89   :  { %1226 = vmatpush3.msra.mxu1 %v825_v11  ;;  %1229 = vmatprep.mubr.msk.f32.mxu1 %vm1263_vm0, %v1262_v61 }
  0x8a   :  { %1227 = vmatprep.subr.mxu1 %v1262_v61 }
  0x8b   :  { %1228 = vmatpush3.msra.mxu1 %v824_v12 }
  0xe2   :  { %v967_v13 = vpop.f32.mrf.mxu0 }
  0xe4   :  { %v968_v14 = vpop.f32.mrf.mxu0 }
  0xe5   :  { %v1002_v15 = vpop.f32.mrf.mxu1  ;;  %v969_v17 = vadd.f32 %v968_v14, %v967_v13 }
  0xe7   :  { %v1003_v19 = vpop.f32.mrf.mxu1  ;;  %v400_v22 = vadd.f32 %v969_v17, %v932_v18 }
  0xe8   :  { %v1004_v48 = vadd.f32 %v1003_v19, %v1002_v15 }
  0xea   :  { %v470_v26 = vadd.f32 %v1004_v48, %v400_v22 }
 0x104   :  { %v1037_v16 = vpop.f32.mrf.mxu0 }
 0x106   :  { %v1038_v20 = vpop.f32.mrf.mxu0 }
 0x107   :  { %v1072_v21 = vpop.f32.mrf.mxu1  ;;  %v1039_v24 = vadd.f32 %v1038_v20, %v1037_v16 }
 0x109   :  { %v1073_v25 = vpop.f32.mrf.mxu1  ;;  %v540_v29 = vadd.f32 %v1039_v24, %v470_v26 }
 0x10a   :  { %v1074_v30 = vadd.f32 %v1073_v25, %v1072_v21 }
 0x10c   :  { %v610_v33 = vadd.f32 %v1074_v30, %v540_v29 }
 0x127   :  { %v1107_v23 = vpop.f32.mrf.mxu0 }
 0x129   :  { %v1108_v27 = vpop.f32.mrf.mxu0 }
 0x12a   :  { %v1142_v28 = vpop.f32.mrf.mxu1  ;;  %v1109_v31 = vadd.f32 %v1108_v27, %v1107_v23 }
 0x12c   :  { %v1143_v32 = vpop.f32.mrf.mxu1  ;;  %v680_v34 = vadd.f32 %v1109_v31, %v610_v33 }
 0x12d   :  { %v1144_v35 = vadd.f32 %v1143_v32, %v1142_v28 }
 0x12f   :  { %v750_v38 = vadd.f32 %v1144_v35, %v680_v34 }
 0x148   :  { %v1177_v36 = vpop.f32.mrf.mxu0 }
 0x14a   :  { %v1178_v37 = vpop.f32.mrf.mxu0 }
 0x14b   :  { %v1179_v39 = vadd.f32 %v1178_v37, %v1177_v36 }
 0x14d   :  { %v820_v40 = vadd.f32 %v1179_v39, %v750_v38 }
 0x14f   :  { %v823_v41 = vmax.f32 %v820_v40, 0.0 }
 0x151   :  { %1230 = vmatmul.mubr.f32.vlgmr.msra.gmra.mxu1 %v823_v41 }
 0x211   :  { %v913_v43 = vpop.f32.mrf.mxu1 }
 0x212   :  { %v914_v44 = vadd.f32 %v934_v42, %v913_v43 }
 0x213   :  { %v1231_v45 = vpop.f32.mrf.mxu1 }
 0x214   :  { %917 = vst [vmem:[#allocation2] sm:$0x3] %v914_v44 }
 0x215   :  { %1250 = shalt.err (!%p1247_p4)
}
 0x216   :  { %927 = dma.vmem_to_hbm [thread:$0]  %s925_s28, 32, %s2054_s5, [#allocation3]  }
 0x217   :  { %1259 = dma.done.wait [#allocation3], 32  }
 0x218   :  { %1260 = vsyncadd [#allocation3], 4294967264 }
 0x219   :  { %931 = vsyncpa [#allocation3], 1 }

// kernel: cnn_forward.4
= control target key start
LH: loop header
LB: loop body
LE: loop exit
PB: predicated region body
PF: predicated region fallthrough
CT: control target
= control target key end

     0   :  { %9 = vsyncpa [#allocation3], 0  ;;  %s1884_s15 = smov [#allocation2]   ;;  %s3615_s0 = inlined_call_operand.vmem [shape: f32[4,14,256], index: 0, kind: input, shape index: {}]   ;;  %s3616_s1 = inlined_call_operand.vmem [shape: f32[3,256,256], index: 1, kind: input, shape index: {}]   ;;  %s3617_s2 = inlined_call_operand.hbm [shape: f32[3,256,256], index: 2, kind: input, shape index: {}]   ;;  %s3618_s3 = inlined_call_operand.vmem [shape: f32[1,256], index: 3, kind: input, shape index: {}]   ;;  %s3619_s4 = inlined_call_operand.vmem [shape: f32[14,256], index: 4, kind: output, shape index: {}]  }
   0x1   :  { %s19_s16 = sshll.u32 %s1884_s15, 4  ;;  %s20_s16 = int_to_ptr.vmem [resolvable:$true] %s19_s16 }
   0x2   :  { %s1870_s17 = scalar_lea.vmem %s20_s16, 24576  ;;  %p1875_p1 = scmp.lt.s32.totalorder %s20_s16, %s20_s16 }
   0x3   :  { %p1871_p0 = scmp.ne.s32.totalorder %s20_s16, %s1870_s17  ;;  %p1876_p2 = scmp.lt.s32.totalorder %s1870_s17, %s1870_s17 }
   0x5   :  { %p1877_p3 = por %p1876_p2, %p1875_p1 }
   0x7   :  { %p1878_p4 = pnand %p1877_p3, %p1871_p0 }
   0x9   :  { %1881 = shalt.err (!%p1878_p4)
}
   0xa   :  { %s1885_s18 = smov 256   ;;  %s1886_s19 = smov 16  }
   0xb   :  { %25 = dma.hbm_to_vmem [thread:$0]  %s3617_s2, 24576, %s20_s16, [#allocation3], %s1885_s18, %s1885_s18, %s1886_s19  }
   0xc   :  { %1882 = dma.done.wait [#allocation3], 24576  }
   0xd   :  { %1883 = vsyncadd [#allocation3], 4294942720  ;;  %v1462_v0 = vld [vmem:[%s3616_s1 + $0x2f8] sm:$0xff]  ;;  %v1461_v2 = vld [vmem:[%s3616_s1 + $0x2f0] sm:$0xff] }
   0xe   :  { %v81_v1 = vld [vmem:[%s3616_s1 + $0xf8] sm:$0xff]  ;;  %179 = vmatprep.subr.mxu0 %v1462_v0  ;;  %v80_v3 = vld [vmem:[%s3616_s1 + $0xf0] sm:$0xff]  ;;  %v1460_v4 = vld [vmem:[%s3616_s1 + $0x2e8] sm:$0xff] }
   0xf   :  { %256 = vmatprep.subr.mxu1 %v81_v1  ;;  %v79_v5 = vld [vmem:[%s3616_s1 + $0xe8] sm:$0xff]  ;;  %180 = vmatpush1.msra.mxu0 %v1461_v2  ;;  %v1459_v6 = vld [vmem:[%s3616_s1 + $0x2e0] sm:$0xff]  ;;  %v1458_v8 = vld [vmem:[%s3616_s1 + $0x2d8] sm:$0xff] }
  0x10   :  { %257 = vmatpush1.msra.mxu1 %v80_v3  ;;  %v78_v7 = vld [vmem:[%s3616_s1 + $0xe0] sm:$0xff]  ;;  %181 = vmatprep.subr.mxu0 %v1460_v4  ;;  %v77_v9 = vld [vmem:[%s3616_s1 + $0xd8] sm:$0xff]  ;;  %v1457_v10 = vld [vmem:[%s3616_s1 + $0x2d0] sm:$0xff] }
  0x11   :  { %258 = vmatprep.subr.mxu1 %v79_v5  ;;  %v76_v11 = vld [vmem:[%s3616_s1 + $0xd0] sm:$0xff]  ;;  %182 = vmatpush1.msra.mxu0 %v1459_v6  ;;  %v1456_v12 = vld [vmem:[%s3616_s1 + $0x2c8] sm:$0xff]  ;;  %v1455_v14 = vld [vmem:[%s3616_s1 + $0x2c0] sm:$0xff] }
  0x12   :  { %259 = vmatpush1.msra.mxu1 %v78_v7  ;;  %v75_v13 = vld [vmem:[%s3616_s1 + $0xc8] sm:$0xff]  ;;  %183 = vmatprep.subr.mxu0 %v1458_v8  ;;  %v74_v15 = vld [vmem:[%s3616_s1 + $0xc0] sm:$0xff]  ;;  %v1454_v16 = vld [vmem:[%s3616_s1 + $0x2b8] sm:$0xff] }
  0x13   :  { %260 = vmatprep.subr.mxu1 %v77_v9  ;;  %184 = vmatpush1.msra.mxu0 %v1457_v10  ;;  %v73_v17 = vld [vmem:[%s3616_s1 + $0xb8] sm:$0xff]  ;;  %v1453_v18 = vld [vmem:[%s3616_s1 + $0x2b0] sm:$0xff]  ;;  %v1452_v20 = vld [vmem:[%s3616_s1 + $0x2a8] sm:$0xff] }
  0x14   :  { %261 = vmatpush1.msra.mxu1 %v76_v11  ;;  %185 = vmatprep.subr.mxu0 %v1456_v12  ;;  %v72_v19 = vld [vmem:[%s3616_s1 + $0xb0] sm:$0xff]  ;;  %v71_v21 = vld [vmem:[%s3616_s1 + $0xa8] sm:$0xff]  ;;  %v1451_v22 = vld [vmem:[%s3616_s1 + $0x2a0] sm:$0xff] }
  0x15   :  { %262 = vmatprep.subr.mxu1 %v75_v13  ;;  %186 = vmatpush1.msra.mxu0 %v1455_v14  ;;  %v70_v23 = vld [vmem:[%s3616_s1 + $0xa0] sm:$0xff]  ;;  %v1450_v24 = vld [vmem:[%s3616_s1 + $0x298] sm:$0xff]  ;;  %v1449_v26 = vld [vmem:[%s3616_s1 + $0x290] sm:$0xff] }
  0x16   :  { %263 = vmatpush1.msra.mxu1 %v74_v15  ;;  %187 = vmatprep.subr.mxu0 %v1454_v16  ;;  %v69_v25 = vld [vmem:[%s3616_s1 + $0x98] sm:$0xff]  ;;  %v68_v27 = vld [vmem:[%s3616_s1 + $0x90] sm:$0xff]  ;;  %v1448_v28 = vld [vmem:[%s3616_s1 + $0x288] sm:$0xff] }
  0x17   :  { %264 = vmatprep.subr.mxu1 %v73_v17  ;;  %188 = vmatpush1.msra.mxu0 %v1453_v18  ;;  %v67_v29 = vld [vmem:[%s3616_s1 + $0x88] sm:$0xff]  ;;  %v1447_v30 = vld [vmem:[%s3616_s1 + $0x280] sm:$0xff]  ;;  %v1446_v32 = vld [vmem:[%s3616_s1 + $0x278] sm:$0xff] }
  0x18   :  { %265 = vmatpush1.msra.mxu1 %v72_v19  ;;  %189 = vmatprep.subr.mxu0 %v1452_v20  ;;  %v66_v31 = vld [vmem:[%s3616_s1 + $0x80] sm:$0xff]  ;;  %v65_v33 = vld [vmem:[%s3616_s1 + $0x78] sm:$0xff]  ;;  %v1445_v34 = vld [vmem:[%s3616_s1 + $0x270] sm:$0xff] }
  0x19   :  { %266 = vmatprep.subr.mxu1 %v71_v21  ;;  %190 = vmatpush1.msra.mxu0 %v1451_v22  ;;  %v64_v35 = vld [vmem:[%s3616_s1 + $0x70] sm:$0xff]  ;;  %v1444_v36 = vld [vmem:[%s3616_s1 + $0x268] sm:$0xff]  ;;  %v1443_v38 = vld [vmem:[%s3616_s1 + $0x260] sm:$0xff] }
  0x1a   :  { %267 = vmatpush1.msra.mxu1 %v70_v23  ;;  %191 = vmatprep.subr.mxu0 %v1450_v24  ;;  %v63_v37 = vld [vmem:[%s3616_s1 + $0x68] sm:$0xff]  ;;  %v62_v39 = vld [vmem:[%s3616_s1 + $0x60] sm:$0xff]  ;;  %v1442_v40 = vld [vmem:[%s3616_s1 + $0x258] sm:$0xff] }
  0x1b   :  { %268 = vmatprep.subr.mxu1 %v69_v25  ;;  %192 = vmatpush1.msra.mxu0 %v1449_v26  ;;  %v61_v41 = vld [vmem:[%s3616_s1 + $0x58] sm:$0xff]  ;;  %v1441_v42 = vld [vmem:[%s3616_s1 + $0x250] sm:$0xff]  ;;  %v1440_v44 = vld [vmem:[%s3616_s1 + $0x248] sm:$0xff] }
  0x1c   :  { %269 = vmatpush1.msra.mxu1 %v68_v27  ;;  %193 = vmatprep.subr.mxu0 %v1448_v28  ;;  %v60_v43 = vld [vmem:[%s3616_s1 + $0x50] sm:$0xff]  ;;  %v59_v45 = vld [vmem:[%s3616_s1 + $0x48] sm:$0xff]  ;;  %v1439_v46 = vld [vmem:[%s3616_s1 + $0x240] sm:$0xff] }
  0x1d   :  { %270 = vmatprep.subr.mxu1 %v67_v29  ;;  %194 = vmatpush1.msra.mxu0 %v1447_v30  ;;  %v58_v47 = vld [vmem:[%s3616_s1 + $0x40] sm:$0xff]  ;;  %v1438_v48 = vld [vmem:[%s3616_s1 + $0x238] sm:$0xff]  ;;  %v1437_v50 = vld [vmem:[%s3616_s1 + $0x230] sm:$0xff] }
  0x1e   :  { %271 = vmatpush1.msra.mxu1 %v66_v31  ;;  %195 = vmatprep.subr.mxu0 %v1446_v32  ;;  %v57_v49 = vld [vmem:[%s3616_s1 + $0x38] sm:$0xff]  ;;  %v56_v51 = vld [vmem:[%s3616_s1 + $0x30] sm:$0xff]  ;;  %v1436_v52 = vld [vmem:[%s3616_s1 + $0x228] sm:$0xff] }
  0x1f   :  { %272 = vmatprep.subr.mxu1 %v65_v33  ;;  %196 = vmatpush1.msra.mxu0 %v1445_v34  ;;  %v55_v53 = vld [vmem:[%s3616_s1 + $0x28] sm:$0xff]  ;;  %v1435_v54 = vld [vmem:[%s3616_s1 + $0x220] sm:$0xff]  ;;  %v1434_v56 = vld [vmem:[%s3616_s1 + $0x218] sm:$0xff] }
  0x20   :  { %273 = vmatpush1.msra.mxu1 %v64_v35  ;;  %197 = vmatprep.subr.mxu0 %v1444_v36  ;;  %v54_v55 = vld [vmem:[%s3616_s1 + $0x20] sm:$0xff]  ;;  %v53_v57 = vld [vmem:[%s3616_s1 + $0x18] sm:$0xff]  ;;  %v1433_v58 = vld [vmem:[%s3616_s1 + $0x210] sm:$0xff] }
  0x21   :  { %274 = vmatprep.subr.mxu1 %v63_v37  ;;  %198 = vmatpush1.msra.mxu0 %v1443_v38  ;;  %v52_v59 = vld [vmem:[%s3616_s1 + $0x10] sm:$0xff]  ;;  %v1432_v60 = vld [vmem:[%s3616_s1 + $0x208] sm:$0xff]  ;;  %v1431_v62 = vld [vmem:[%s3616_s1 + $0x200] sm:$0xff] }
  0x22   :  { %275 = vmatpush1.msra.mxu1 %v62_v39  ;;  %199 = vmatprep.subr.mxu0 %v1442_v40  ;;  %v51_v61 = vld [vmem:[%s3616_s1 + $0x8] sm:$0xff]  ;;  %v50_v63 = vld [vmem:[%s3616_s1] sm:$0xff]  ;;  %v1494_v0 = vld [vmem:[%s3616_s1 + $0x3f8] sm:$0xff] }
  0x23   :  { %276 = vmatprep.subr.mxu1 %v61_v41  ;;  %200 = vmatpush1.msra.mxu0 %v1441_v42  ;;  %v113_v1 = vld [vmem:[%s3616_s1 + $0x1f8] sm:$0xff]  ;;  %v1493_v2 = vld [vmem:[%s3616_s1 + $0x3f0] sm:$0xff]  ;;  %v1492_v4 = vld [vmem:[%s3616_s1 + $0x3e8] sm:$0xff] }
  0x24   :  { %277 = vmatpush1.msra.mxu1 %v60_v43  ;;  %201 = vmatprep.subr.mxu0 %v1440_v44  ;;  %v112_v3 = vld [vmem:[%s3616_s1 + $0x1f0] sm:$0xff]  ;;  %v111_v5 = vld [vmem:[%s3616_s1 + $0x1e8] sm:$0xff]  ;;  %v1491_v6 = vld [vmem:[%s3616_s1 + $0x3e0] sm:$0xff] }
  0x25   :  { %278 = vmatprep.subr.mxu1 %v59_v45  ;;  %202 = vmatpush1.msra.mxu0 %v1439_v46  ;;  %v110_v7 = vld [vmem:[%s3616_s1 + $0x1e0] sm:$0xff]  ;;  %v1490_v8 = vld [vmem:[%s3616_s1 + $0x3d8] sm:$0xff]  ;;  %v1489_v10 = vld [vmem:[%s3616_s1 + $0x3d0] sm:$0xff] }
  0x26   :  { %279 = vmatpush1.msra.mxu1 %v58_v47  ;;  %203 = vmatprep.subr.mxu0 %v1438_v48  ;;  %v109_v9 = vld [vmem:[%s3616_s1 + $0x1d8] sm:$0xff]  ;;  %v108_v11 = vld [vmem:[%s3616_s1 + $0x1d0] sm:$0xff]  ;;  %v1488_v12 = vld [vmem:[%s3616_s1 + $0x3c8] sm:$0xff] }
  0x27   :  { %280 = vmatprep.subr.mxu1 %v57_v49  ;;  %204 = vmatpush1.msra.mxu0 %v1437_v50  ;;  %v107_v13 = vld [vmem:[%s3616_s1 + $0x1c8] sm:$0xff]  ;;  %v1487_v14 = vld [vmem:[%s3616_s1 + $0x3c0] sm:$0xff]  ;;  %v1486_v16 = vld [vmem:[%s3616_s1 + $0x3b8] sm:$0xff] }
  0x28   :  { %281 = vmatpush1.msra.mxu1 %v56_v51  ;;  %205 = vmatprep.subr.mxu0 %v1436_v52  ;;  %v106_v15 = vld [vmem:[%s3616_s1 + $0x1c0] sm:$0xff]  ;;  %v105_v17 = vld [vmem:[%s3616_s1 + $0x1b8] sm:$0xff]  ;;  %v1485_v18 = vld [vmem:[%s3616_s1 + $0x3b0] sm:$0xff] }
  0x29   :  { %282 = vmatprep.subr.mxu1 %v55_v53  ;;  %206 = vmatpush1.msra.mxu0 %v1435_v54  ;;  %v104_v19 = vld [vmem:[%s3616_s1 + $0x1b0] sm:$0xff]  ;;  %v1484_v20 = vld [vmem:[%s3616_s1 + $0x3a8] sm:$0xff]  ;;  %v1483_v22 = vld [vmem:[%s3616_s1 + $0x3a0] sm:$0xff] }
  0x2a   :  { %283 = vmatpush1.msra.mxu1 %v54_v55  ;;  %207 = vmatprep.subr.mxu0 %v1434_v56  ;;  %v103_v21 = vld [vmem:[%s3616_s1 + $0x1a8] sm:$0xff]  ;;  %v102_v23 = vld [vmem:[%s3616_s1 + $0x1a0] sm:$0xff]  ;;  %v1482_v24 = vld [vmem:[%s3616_s1 + $0x398] sm:$0xff] }
  0x2b   :  { %284 = vmatprep.subr.mxu1 %v53_v57  ;;  %208 = vmatpush1.msra.mxu0 %v1433_v58  ;;  %v101_v25 = vld [vmem:[%s3616_s1 + $0x198] sm:$0xff]  ;;  %v1481_v26 = vld [vmem:[%s3616_s1 + $0x390] sm:$0xff]  ;;  %v1480_v28 = vld [vmem:[%s3616_s1 + $0x388] sm:$0xff] }
  0x2c   :  { %285 = vmatpush1.msra.mxu1 %v52_v59  ;;  %209 = vmatprep.subr.mxu0 %v1432_v60  ;;  %v100_v27 = vld [vmem:[%s3616_s1 + $0x190] sm:$0xff]  ;;  %v99_v29 = vld [vmem:[%s3616_s1 + $0x188] sm:$0xff]  ;;  %v1479_v30 = vld [vmem:[%s3616_s1 + $0x380] sm:$0xff] }
  0x2d   :  { %286 = vmatprep.subr.mxu1 %v51_v61  ;;  %210 = vmatpush1.msra.mxu0 %v1431_v62  ;;  %v98_v31 = vld [vmem:[%s3616_s1 + $0x180] sm:$0xff]  ;;  %v1478_v32 = vld [vmem:[%s3616_s1 + $0x378] sm:$0xff]  ;;  %v1477_v34 = vld [vmem:[%s3616_s1 + $0x370] sm:$0xff] }
  0x2e   :  { %287 = vmatpush1.msra.mxu1 %v50_v63  ;;  %211 = vmatprep.subr.mxu0 %v1494_v0  ;;  %v97_v33 = vld [vmem:[%s3616_s1 + $0x178] sm:$0xff]  ;;  %v96_v35 = vld [vmem:[%s3616_s1 + $0x170] sm:$0xff]  ;;  %v1476_v36 = vld [vmem:[%s3616_s1 + $0x368] sm:$0xff] }
  0x2f   :  { %288 = vmatprep.subr.mxu1 %v113_v1  ;;  %212 = vmatpush2.msra.mxu0 %v1493_v2  ;;  %v95_v37 = vld [vmem:[%s3616_s1 + $0x168] sm:$0xff]  ;;  %v1475_v38 = vld [vmem:[%s3616_s1 + $0x360] sm:$0xff]  ;;  %v1474_v40 = vld [vmem:[%s3616_s1 + $0x358] sm:$0xff] }
  0x30   :  { %289 = vmatpush2.msra.mxu1 %v112_v3  ;;  %213 = vmatprep.subr.mxu0 %v1492_v4  ;;  %v94_v39 = vld [vmem:[%s3616_s1 + $0x160] sm:$0xff]  ;;  %v93_v41 = vld [vmem:[%s3616_s1 + $0x158] sm:$0xff]  ;;  %v1473_v42 = vld [vmem:[%s3616_s1 + $0x350] sm:$0xff] }
  0x31   :  { %290 = vmatprep.subr.mxu1 %v111_v5  ;;  %214 = vmatpush2.msra.mxu0 %v1491_v6  ;;  %v92_v43 = vld [vmem:[%s3616_s1 + $0x150] sm:$0xff]  ;;  %v1472_v44 = vld [vmem:[%s3616_s1 + $0x348] sm:$0xff]  ;;  %v1471_v46 = vld [vmem:[%s3616_s1 + $0x340] sm:$0xff] }
  0x32   :  { %291 = vmatpush2.msra.mxu1 %v110_v7  ;;  %215 = vmatprep.subr.mxu0 %v1490_v8  ;;  %v91_v45 = vld [vmem:[%s3616_s1 + $0x148] sm:$0xff]  ;;  %v90_v47 = vld [vmem:[%s3616_s1 + $0x140] sm:$0xff]  ;;  %v1470_v48 = vld [vmem:[%s3616_s1 + $0x338] sm:$0xff] }
  0x33   :  { %292 = vmatprep.subr.mxu1 %v109_v9  ;;  %216 = vmatpush2.msra.mxu0 %v1489_v10  ;;  %v89_v49 = vld [vmem:[%s3616_s1 + $0x138] sm:$0xff]  ;;  %v1469_v50 = vld [vmem:[%s3616_s1 + $0x330] sm:$0xff]  ;;  %v1468_v52 = vld [vmem:[%s3616_s1 + $0x328] sm:$0xff] }
  0x34   :  { %293 = vmatpush2.msra.mxu1 %v108_v11  ;;  %217 = vmatprep.subr.mxu0 %v1488_v12  ;;  %v88_v51 = vld [vmem:[%s3616_s1 + $0x130] sm:$0xff]  ;;  %v87_v53 = vld [vmem:[%s3616_s1 + $0x128] sm:$0xff]  ;;  %v1467_v54 = vld [vmem:[%s3616_s1 + $0x320] sm:$0xff] }
  0x35   :  { %294 = vmatprep.subr.mxu1 %v107_v13  ;;  %218 = vmatpush2.msra.mxu0 %v1487_v14  ;;  %v86_v55 = vld [vmem:[%s3616_s1 + $0x120] sm:$0xff]  ;;  %v1466_v56 = vld [vmem:[%s3616_s1 + $0x318] sm:$0xff]  ;;  %v1465_v58 = vld [vmem:[%s3616_s1 + $0x310] sm:$0xff] }
  0x36   :  { %295 = vmatpush2.msra.mxu1 %v106_v15  ;;  %219 = vmatprep.subr.mxu0 %v1486_v16  ;;  %v85_v57 = vld [vmem:[%s3616_s1 + $0x118] sm:$0xff]  ;;  %v84_v59 = vld [vmem:[%s3616_s1 + $0x110] sm:$0xff]  ;;  %v1464_v60 = vld [vmem:[%s3616_s1 + $0x308] sm:$0xff] }
  0x37   :  { %296 = vmatprep.subr.mxu1 %v105_v17  ;;  %220 = vmatpush2.msra.mxu0 %v1485_v18  ;;  %v83_v61 = vld [vmem:[%s3616_s1 + $0x108] sm:$0xff]  ;;  %v1463_v62 = vld [vmem:[%s3616_s1 + $0x300] sm:$0xff]  ;;  %v1526_v4 = vld [vmem:[%s3616_s1 + $0x4f8] sm:$0xff] }
  0x38   :  { %297 = vmatpush2.msra.mxu1 %v104_v19  ;;  %221 = vmatprep.subr.mxu0 %v1484_v20  ;;  %v2299_v63 = vld [vmem:[%s3615_s0 + $0x28] sm:$0xff]  ;;  %v82_v0 = vld [vmem:[%s3616_s1 + $0x100] sm:$0xff]  ;;  %v575_v5 = vld [vmem:[#allocation2 + $0x2f8] sm:$0xff] }
  0x39   :  { %298 = vmatprep.subr.mxu1 %v103_v21  ;;  %222 = vmatpush2.msra.mxu0 %v1483_v22  ;;  %v32_v1 = vld [vmem:[%s3615_s0 + $0x8] sm:$0xff]  ;;  %v2310_v2 = vld [vmem:[%s3615_s0 + $0x20] sm:$0xff]  ;;  %v1525_v6 = vld [vmem:[%s3616_s1 + $0x4f0] sm:$0xff] }
  0x3a   :  { %299 = vmatpush2.msra.mxu1 %v102_v23  ;;  %223 = vmatprep.subr.mxu0 %v1482_v24  ;;  %v31_v3 = vld [vmem:[%s3615_s0] sm:$0xff]  ;;  %v574_v7 = vld [vmem:[#allocation2 + $0x2f0] sm:$0xff]  ;;  %v1524_v8 = vld [vmem:[%s3616_s1 + $0x4e8] sm:$0xff] }
  0x3b   :  { %300 = vmatprep.subr.mxu1 %v101_v25  ;;  %224 = vmatpush2.msra.mxu0 %v1481_v26  ;;  %v573_v9 = vld [vmem:[#allocation2 + $0x2e8] sm:$0xff]  ;;  %v1523_v10 = vld [vmem:[%s3616_s1 + $0x4e0] sm:$0xff]  ;;  %v1522_v12 = vld [vmem:[%s3616_s1 + $0x4d8] sm:$0xff] }
  0x3c   :  { %301 = vmatpush2.msra.mxu1 %v100_v27  ;;  %225 = vmatprep.subr.mxu0 %v1480_v28  ;;  %v572_v11 = vld [vmem:[#allocation2 + $0x2e0] sm:$0xff]  ;;  %v571_v13 = vld [vmem:[#allocation2 + $0x2d8] sm:$0xff]  ;;  %v1521_v14 = vld [vmem:[%s3616_s1 + $0x4d0] sm:$0xff] }
  0x3d   :  { %302 = vmatprep.subr.mxu1 %v99_v29  ;;  %226 = vmatpush2.msra.mxu0 %v1479_v30  ;;  %v570_v15 = vld [vmem:[#allocation2 + $0x2d0] sm:$0xff]  ;;  %v1520_v16 = vld [vmem:[%s3616_s1 + $0x4c8] sm:$0xff]  ;;  %v1519_v18 = vld [vmem:[%s3616_s1 + $0x4c0] sm:$0xff] }
  0x3e   :  { %303 = vmatpush2.msra.mxu1 %v98_v31  ;;  %227 = vmatprep.subr.mxu0 %v1478_v32  ;;  %v569_v17 = vld [vmem:[#allocation2 + $0x2c8] sm:$0xff]  ;;  %v568_v19 = vld [vmem:[#allocation2 + $0x2c0] sm:$0xff]  ;;  %v1518_v20 = vld [vmem:[%s3616_s1 + $0x4b8] sm:$0xff] }
  0x3f   :  { %304 = vmatprep.subr.mxu1 %v97_v33  ;;  %228 = vmatpush2.msra.mxu0 %v1477_v34  ;;  %v567_v21 = vld [vmem:[#allocation2 + $0x2b8] sm:$0xff]  ;;  %v1517_v22 = vld [vmem:[%s3616_s1 + $0x4b0] sm:$0xff]  ;;  %v1516_v24 = vld [vmem:[%s3616_s1 + $0x4a8] sm:$0xff] }
  0x40   :  { %305 = vmatpush2.msra.mxu1 %v96_v35  ;;  %229 = vmatprep.subr.mxu0 %v1476_v36  ;;  %v566_v23 = vld [vmem:[#allocation2 + $0x2b0] sm:$0xff]  ;;  %v565_v25 = vld [vmem:[#allocation2 + $0x2a8] sm:$0xff]  ;;  %v1515_v26 = vld [vmem:[%s3616_s1 + $0x4a0] sm:$0xff] }
  0x41   :  { %306 = vmatprep.subr.mxu1 %v95_v37  ;;  %230 = vmatpush2.msra.mxu0 %v1475_v38  ;;  %v564_v27 = vld [vmem:[#allocation2 + $0x2a0] sm:$0xff]  ;;  %v1514_v28 = vld [vmem:[%s3616_s1 + $0x498] sm:$0xff]  ;;  %v1513_v30 = vld [vmem:[%s3616_s1 + $0x490] sm:$0xff] }
  0x42   :  { %307 = vmatpush2.msra.mxu1 %v94_v39  ;;  %231 = vmatprep.subr.mxu0 %v1474_v40  ;;  %v563_v29 = vld [vmem:[#allocation2 + $0x298] sm:$0xff]  ;;  %v562_v31 = vld [vmem:[#allocation2 + $0x290] sm:$0xff]  ;;  %v1512_v32 = vld [vmem:[%s3616_s1 + $0x488] sm:$0xff] }
  0x43   :  { %308 = vmatprep.subr.mxu1 %v93_v41  ;;  %232 = vmatpush2.msra.mxu0 %v1473_v42  ;;  %v561_v33 = vld [vmem:[#allocation2 + $0x288] sm:$0xff]  ;;  %v1511_v34 = vld [vmem:[%s3616_s1 + $0x480] sm:$0xff]  ;;  %v1510_v36 = vld [vmem:[%s3616_s1 + $0x478] sm:$0xff] }
  0x44   :  { %309 = vmatpush2.msra.mxu1 %v92_v43  ;;  %233 = vmatprep.subr.mxu0 %v1472_v44  ;;  %v560_v35 = vld [vmem:[#allocation2 + $0x280] sm:$0xff]  ;;  %v559_v37 = vld [vmem:[#allocation2 + $0x278] sm:$0xff]  ;;  %v1509_v38 = vld [vmem:[%s3616_s1 + $0x470] sm:$0xff] }
  0x45   :  { %310 = vmatprep.subr.mxu1 %v91_v45  ;;  %234 = vmatpush2.msra.mxu0 %v1471_v46  ;;  %v558_v39 = vld [vmem:[#allocation2 + $0x270] sm:$0xff]  ;;  %v1508_v40 = vld [vmem:[%s3616_s1 + $0x468] sm:$0xff]  ;;  %v1507_v42 = vld [vmem:[%s3616_s1 + $0x460] sm:$0xff] }
  0x46   :  { %311 = vmatpush2.msra.mxu1 %v90_v47  ;;  %235 = vmatprep.subr.mxu0 %v1470_v48  ;;  %v557_v41 = vld [vmem:[#allocation2 + $0x268] sm:$0xff]  ;;  %v556_v43 = vld [vmem:[#allocation2 + $0x260] sm:$0xff]  ;;  %v1506_v44 = vld [vmem:[%s3616_s1 + $0x458] sm:$0xff] }
  0x47   :  { %312 = vmatprep.subr.mxu1 %v89_v49  ;;  %236 = vmatpush2.msra.mxu0 %v1469_v50  ;;  %v555_v45 = vld [vmem:[#allocation2 + $0x258] sm:$0xff]  ;;  %v1505_v46 = vld [vmem:[%s3616_s1 + $0x450] sm:$0xff]  ;;  %v1504_v48 = vld [vmem:[%s3616_s1 + $0x448] sm:$0xff] }
  0x48   :  { %313 = vmatpush2.msra.mxu1 %v88_v51  ;;  %237 = vmatprep.subr.mxu0 %v1468_v52  ;;  %v554_v47 = vld [vmem:[#allocation2 + $0x250] sm:$0xff]  ;;  %v553_v49 = vld [vmem:[#allocation2 + $0x248] sm:$0xff]  ;;  %v1503_v50 = vld [vmem:[%s3616_s1 + $0x440] sm:$0xff] }
  0x49   :  { %314 = vmatprep.subr.mxu1 %v87_v53  ;;  %238 = vmatpush2.msra.mxu0 %v1467_v54  ;;  %v552_v51 = vld [vmem:[#allocation2 + $0x240] sm:$0xff]  ;;  %v1502_v52 = vld [vmem:[%s3616_s1 + $0x438] sm:$0xff]  ;;  %v1501_v54 = vld [vmem:[%s3616_s1 + $0x430] sm:$0xff] }
  0x4a   :  { %315 = vmatpush2.msra.mxu1 %v86_v55  ;;  %239 = vmatprep.subr.mxu0 %v1466_v56  ;;  %v551_v53 = vld [vmem:[#allocation2 + $0x238] sm:$0xff]  ;;  %v550_v55 = vld [vmem:[#allocation2 + $0x230] sm:$0xff]  ;;  %v1500_v56 = vld [vmem:[%s3616_s1 + $0x428] sm:$0xff] }
  0x4b   :  { %316 = vmatprep.subr.mxu1 %v85_v57  ;;  %240 = vmatpush2.msra.mxu0 %v1465_v58  ;;  %v549_v57 = vld [vmem:[#allocation2 + $0x228] sm:$0xff]  ;;  %v1499_v58 = vld [vmem:[%s3616_s1 + $0x420] sm:$0xff] }
  0x4c   :  { %317 = vmatpush2.msra.mxu1 %v84_v59  ;;  %241 = vmatprep.subr.mxu0 %v1464_v60  ;;  %v548_v59 = vld [vmem:[#allocation2 + $0x220] sm:$0xff]  ;;  %v1498_v60 = vld [vmem:[%s3616_s1 + $0x418] sm:$0xff] }
  0x4d   :  { %318 = vmatprep.subr.mxu1 %v83_v61  ;;  %242 = vmatpush2.msra.mxu0 %v1463_v62  ;;  %v547_v61 = vld [vmem:[#allocation2 + $0x218] sm:$0xff]  ;;  %v1497_v62 = vld [vmem:[%s3616_s1 + $0x410] sm:$0xff] }
  0x4e   :  { %243 = vmatprep.mubr.f32.mxu0 %v2299_v63  ;;  %319 = vmatpush2.msra.mxu1 %v82_v0  ;;  %v546_v0 = vld [vmem:[#allocation2 + $0x210] sm:$0xff] }
  0x4f   :  { %320 = vmatprep.mubr.f32.mxu1 %v32_v1  ;;  %244 = vmatmul.mubr.f32.vlgmr.msra.gmra.mxu0 %v2310_v2  ;;  %v1496_v1 = vld [vmem:[%s3616_s1 + $0x408] sm:$0xff] }
  0x50   :  { %321 = vmatmul.mubr.f32.vlgmr.msra.gmra.mxu1 %v31_v3  ;;  %398 = vmatprep.subr.mxu0 %v1526_v4  ;;  %v545_v3 = vld [vmem:[#allocation2 + $0x208] sm:$0xff]  ;;  %v1495_v4 = vld [vmem:[%s3616_s1 + $0x400] sm:$0xff] }
  0x51   :  { %608 = vmatprep.subr.mxu1 %v575_v5  ;;  %399 = vmatpush1.msra.mxu0 %v1525_v6  ;;  %v544_v5 = vld [vmem:[#allocation2 + $0x200] sm:$0xff]  ;;  %v1558_v6 = vld [vmem:[%s3616_s1 + $0x5f8] sm:$0xff] }
  0x52   :  { %609 = vmatpush1.msra.mxu1 %v574_v7  ;;  %400 = vmatprep.subr.mxu0 %v1524_v8  ;;  %v607_v7 = vld [vmem:[#allocation2 + $0x3f8] sm:$0xff]  ;;  %v1557_v8 = vld [vmem:[%s3616_s1 + $0x5f0] sm:$0xff] }
  0x53   :  { %610 = vmatprep.subr.mxu1 %v573_v9  ;;  %401 = vmatpush1.msra.mxu0 %v1523_v10  ;;  %v606_v9 = vld [vmem:[#allocation2 + $0x3f0] sm:$0xff]  ;;  %v1556_v10 = vld [vmem:[%s3616_s1 + $0x5e8] sm:$0xff] }
  0x54   :  { %611 = vmatpush1.msra.mxu1 %v572_v11  ;;  %402 = vmatprep.subr.mxu0 %v1522_v12  ;;  %v605_v11 = vld [vmem:[#allocation2 + $0x3e8] sm:$0xff]  ;;  %v1555_v12 = vld [vmem:[%s3616_s1 + $0x5e0] sm:$0xff] }
  0x55   :  { %612 = vmatprep.subr.mxu1 %v571_v13  ;;  %403 = vmatpush1.msra.mxu0 %v1521_v14  ;;  %v604_v13 = vld [vmem:[#allocation2 + $0x3e0] sm:$0xff]  ;;  %v1554_v14 = vld [vmem:[%s3616_s1 + $0x5d8] sm:$0xff] }
  0x56   :  { %613 = vmatpush1.msra.mxu1 %v570_v15  ;;  %404 = vmatprep.subr.mxu0 %v1520_v16  ;;  %v603_v15 = vld [vmem:[#allocation2 + $0x3d8] sm:$0xff]  ;;  %v1553_v16 = vld [vmem:[%s3616_s1 + $0x5d0] sm:$0xff] }
  0x57   :  { %614 = vmatprep.subr.mxu1 %v569_v17  ;;  %405 = vmatpush1.msra.mxu0 %v1519_v18  ;;  %v602_v17 = vld [vmem:[#allocation2 + $0x3d0] sm:$0xff]  ;;  %v1552_v18 = vld [vmem:[%s3616_s1 + $0x5c8] sm:$0xff] }
  0x58   :  { %615 = vmatpush1.msra.mxu1 %v568_v19  ;;  %406 = vmatprep.subr.mxu0 %v1518_v20  ;;  %v601_v19 = vld [vmem:[#allocation2 + $0x3c8] sm:$0xff]  ;;  %v1551_v20 = vld [vmem:[%s3616_s1 + $0x5c0] sm:$0xff] }
  0x59   :  { %616 = vmatprep.subr.mxu1 %v567_v21  ;;  %407 = vmatpush1.msra.mxu0 %v1517_v22  ;;  %v600_v21 = vld [vmem:[#allocation2 + $0x3c0] sm:$0xff]  ;;  %v1550_v22 = vld [vmem:[%s3616_s1 + $0x5b8] sm:$0xff] }
  0x5a   :  { %617 = vmatpush1.msra.mxu1 %v566_v23  ;;  %408 = vmatprep.subr.mxu0 %v1516_v24  ;;  %v599_v23 = vld [vmem:[#allocation2 + $0x3b8] sm:$0xff]  ;;  %v1549_v24 = vld [vmem:[%s3616_s1 + $0x5b0] sm:$0xff] }
  0x5b   :  { %618 = vmatprep.subr.mxu1 %v565_v25  ;;  %409 = vmatpush1.msra.mxu0 %v1515_v26  ;;  %v598_v25 = vld [vmem:[#allocation2 + $0x3b0] sm:$0xff]  ;;  %v1548_v26 = vld [vmem:[%s3616_s1 + $0x5a8] sm:$0xff] }
  0x5c   :  { %619 = vmatpush1.msra.mxu1 %v564_v27  ;;  %410 = vmatprep.subr.mxu0 %v1514_v28  ;;  %v597_v27 = vld [vmem:[#allocation2 + $0x3a8] sm:$0xff]  ;;  %v1547_v28 = vld [vmem:[%s3616_s1 + $0x5a0] sm:$0xff] }
  0x5d   :  { %620 = vmatprep.subr.mxu1 %v563_v29  ;;  %411 = vmatpush1.msra.mxu0 %v1513_v30  ;;  %v596_v29 = vld [vmem:[#allocation2 + $0x3a0] sm:$0xff]  ;;  %v1546_v30 = vld [vmem:[%s3616_s1 + $0x598] sm:$0xff] }
  0x5e   :  { %621 = vmatpush1.msra.mxu1 %v562_v31  ;;  %412 = vmatprep.subr.mxu0 %v1512_v32  ;;  %v595_v31 = vld [vmem:[#allocation2 + $0x398] sm:$0xff]  ;;  %v1545_v32 = vld [vmem:[%s3616_s1 + $0x590] sm:$0xff] }
  0x5f   :  { %622 = vmatprep.subr.mxu1 %v561_v33  ;;  %413 = vmatpush1.msra.mxu0 %v1511_v34  ;;  %v594_v33 = vld [vmem:[#allocation2 + $0x390] sm:$0xff]  ;;  %v1544_v34 = vld [vmem:[%s3616_s1 + $0x588] sm:$0xff] }
  0x60   :  { %623 = vmatpush1.msra.mxu1 %v560_v35  ;;  %414 = vmatprep.subr.mxu0 %v1510_v36  ;;  %v593_v35 = vld [vmem:[#allocation2 + $0x388] sm:$0xff]  ;;  %v1543_v36 = vld [vmem:[%s3616_s1 + $0x580] sm:$0xff] }
  0x61   :  { %624 = vmatprep.subr.mxu1 %v559_v37  ;;  %415 = vmatpush1.msra.mxu0 %v1509_v38  ;;  %v592_v37 = vld [vmem:[#allocation2 + $0x380] sm:$0xff]  ;;  %v1542_v38 = vld [vmem:[%s3616_s1 + $0x578] sm:$0xff] }
  0x62   :  { %625 = vmatpush1.msra.mxu1 %v558_v39  ;;  %416 = vmatprep.subr.mxu0 %v1508_v40  ;;  %v591_v39 = vld [vmem:[#allocation2 + $0x378] sm:$0xff]  ;;  %v1541_v40 = vld [vmem:[%s3616_s1 + $0x570] sm:$0xff] }
  0x63   :  { %626 = vmatprep.subr.mxu1 %v557_v41  ;;  %417 = vmatpush1.msra.mxu0 %v1507_v42  ;;  %v590_v41 = vld [vmem:[#allocation2 + $0x370] sm:$0xff]  ;;  %v1540_v42 = vld [vmem:[%s3616_s1 + $0x568] sm:$0xff] }
  0x64   :  { %627 = vmatpush1.msra.mxu1 %v556_v43  ;;  %418 = vmatprep.subr.mxu0 %v1506_v44  ;;  %v589_v43 = vld [vmem:[#allocation2 + $0x368] sm:$0xff]  ;;  %v1539_v44 = vld [vmem:[%s3616_s1 + $0x560] sm:$0xff] }
  0x65   :  { %628 = vmatprep.subr.mxu1 %v555_v45  ;;  %419 = vmatpush1.msra.mxu0 %v1505_v46  ;;  %v588_v45 = vld [vmem:[#allocation2 + $0x360] sm:$0xff]  ;;  %v1538_v46 = vld [vmem:[%s3616_s1 + $0x558] sm:$0xff] }
  0x66   :  { %629 = vmatpush1.msra.mxu1 %v554_v47  ;;  %420 = vmatprep.subr.mxu0 %v1504_v48  ;;  %v587_v47 = vld [vmem:[#allocation2 + $0x358] sm:$0xff]  ;;  %v1537_v48 = vld [vmem:[%s3616_s1 + $0x550] sm:$0xff] }
  0x67   :  { %630 = vmatprep.subr.mxu1 %v553_v49  ;;  %421 = vmatpush1.msra.mxu0 %v1503_v50  ;;  %v586_v49 = vld [vmem:[#allocation2 + $0x350] sm:$0xff]  ;;  %v1536_v50 = vld [vmem:[%s3616_s1 + $0x548] sm:$0xff] }
  0x68   :  { %631 = vmatpush1.msra.mxu1 %v552_v51  ;;  %422 = vmatprep.subr.mxu0 %v1502_v52  ;;  %v585_v51 = vld [vmem:[#allocation2 + $0x348] sm:$0xff]  ;;  %v1535_v52 = vld [vmem:[%s3616_s1 + $0x540] sm:$0xff] }
  0x69   :  { %632 = vmatprep.subr.mxu1 %v551_v53  ;;  %423 = vmatpush1.msra.mxu0 %v1501_v54  ;;  %v584_v53 = vld [vmem:[#allocation2 + $0x340] sm:$0xff]  ;;  %v1534_v54 = vld [vmem:[%s3616_s1 + $0x538] sm:$0xff] }
  0x6a   :  { %633 = vmatpush1.msra.mxu1 %v550_v55  ;;  %424 = vmatprep.subr.mxu0 %v1500_v56  ;;  %v583_v55 = vld [vmem:[#allocation2 + $0x338] sm:$0xff]  ;;  %v1533_v56 = vld [vmem:[%s3616_s1 + $0x530] sm:$0xff] }
  0x6b   :  { %634 = vmatprep.subr.mxu1 %v549_v57  ;;  %425 = vmatpush1.msra.mxu0 %v1499_v58  ;;  %v582_v57 = vld [vmem:[#allocation2 + $0x330] sm:$0xff]  ;;  %v2494_v58 = vld [vmem:[%s3615_s0 + $0x38] sm:$0x3f] }
  0x6c   :  { %635 = vmatpush1.msra.mxu1 %v548_v59  ;;  %426 = vmatprep.subr.mxu0 %v1498_v60  ;;  %v2499_v59 = vld [vmem:[%s3615_s0 + $0x18] sm:$0x3f]  ;;  %v1532_v60 = vld [vmem:[%s3616_s1 + $0x528] sm:$0xff] }
  0x6d   :  { %636 = vmatprep.subr.mxu1 %v547_v61  ;;  %427 = vmatpush1.msra.mxu0 %v1497_v62  ;;  %v581_v61 = vld [vmem:[#allocation2 + $0x328] sm:$0xff]  ;;  %v2507_v62 = vld [vmem:[%s3615_s0 + $0x30] sm:$0x3f] }
  0x6e   :  { %637 = vmatpush1.msra.mxu1 %v546_v0  ;;  %428 = vmatprep.subr.mxu0 %v1496_v1  ;;  %v2512_v0 = vld [vmem:[%s3615_s0 + $0x10] sm:$0x3f]  ;;  %v1531_v1 = vld [vmem:[%s3616_s1 + $0x520] sm:$0xff] }
  0x6f   :  { %638 = vmatprep.subr.mxu1 %v545_v3  ;;  %429 = vmatpush1.msra.mxu0 %v1495_v4  ;;  %v580_v3 = vld [vmem:[#allocation2 + $0x320] sm:$0xff]  ;;  %v1530_v4 = vld [vmem:[%s3616_s1 + $0x518] sm:$0xff] }
  0x70   :  { %639 = vmatpush1.msra.mxu1 %v544_v5  ;;  %430 = vmatprep.subr.mxu0 %v1558_v6  ;;  %v579_v5 = vld [vmem:[#allocation2 + $0x318] sm:$0xff]  ;;  %v1529_v6 = vld [vmem:[%s3616_s1 + $0x510] sm:$0xff] }
  0x71   :  { %640 = vmatprep.subr.mxu1 %v607_v7  ;;  %431 = vmatpush2.msra.mxu0 %v1557_v8  ;;  %v578_v7 = vld [vmem:[#allocation2 + $0x310] sm:$0xff]  ;;  %v1528_v8 = vld [vmem:[%s3616_s1 + $0x508] sm:$0xff] }
  0x72   :  { %641 = vmatpush2.msra.mxu1 %v606_v9  ;;  %432 = vmatprep.subr.mxu0 %v1556_v10  ;;  %v577_v9 = vld [vmem:[#allocation2 + $0x308] sm:$0xff]  ;;  %v1527_v10 = vld [vmem:[%s3616_s1 + $0x500] sm:$0xff] }
  0x73   :  { %642 = vmatprep.subr.mxu1 %v605_v11  ;;  %433 = vmatpush2.msra.mxu0 %v1555_v12  ;;  %v2536_v11 = vld [vmem:[%s3615_s0 + $0x48] sm:$0xff]  ;;  %v576_v12 = vld [vmem:[#allocation2 + $0x300] sm:$0xff] }
  0x74   :  { %643 = vmatpush2.msra.mxu1 %v604_v13  ;;  %434 = vmatprep.subr.mxu0 %v1554_v14  ;;  %v2541_v13 = vld [vmem:[%s3615_s0 + $0x40] sm:$0xff]  ;;  %v510_v14 = vld [vmem:[#allocation2 + $0xf8] sm:$0xff] }
  0x75   :  { %644 = vmatprep.subr.mxu1 %v603_v15  ;;  %435 = vmatpush2.msra.mxu0 %v1553_v16  ;;  %v794_v15 = vld [vmem:[#allocation2 + $0x4f8] sm:$0xff]  ;;  %v509_v16 = vld [vmem:[#allocation2 + $0xf0] sm:$0xff] }
  0x76   :  { %645 = vmatpush2.msra.mxu1 %v602_v17  ;;  %436 = vmatprep.subr.mxu0 %v1552_v18  ;;  %v793_v17 = vld [vmem:[#allocation2 + $0x4f0] sm:$0xff]  ;;  %v508_v18 = vld [vmem:[#allocation2 + $0xe8] sm:$0xff] }
  0x77   :  { %646 = vmatprep.subr.mxu1 %v601_v19  ;;  %437 = vmatpush2.msra.mxu0 %v1551_v20  ;;  %v792_v19 = vld [vmem:[#allocation2 + $0x4e8] sm:$0xff]  ;;  %v2550_v20 = vld [vmem:[%s3615_s0 + $0x58] sm:$0x3f] }
  0x78   :  { %647 = vmatpush2.msra.mxu1 %v600_v21  ;;  %438 = vmatprep.subr.mxu0 %v1550_v22  ;;  %v507_v21 = vld [vmem:[#allocation2 + $0xe0] sm:$0xff] }
  0x79   :  { %648 = vmatprep.subr.mxu1 %v599_v23  ;;  %439 = vmatpush2.msra.mxu0 %v1549_v24  ;;  %v791_v22 = vld [vmem:[#allocation2 + $0x4e0] sm:$0xff]  ;;  %v2555_v23 = vld [vmem:[%s3615_s0 + $0x50] sm:$0x3f]  ;;  %v790_v24 = vld [vmem:[#allocation2 + $0x4d8] sm:$0xff] }
  0x7a   :  { %649 = vmatpush2.msra.mxu1 %v598_v25  ;;  %440 = vmatprep.subr.mxu0 %v1548_v26  ;;  %v789_v25 = vld [vmem:[#allocation2 + $0x4d0] sm:$0xff]  ;;  %v504_v26 = vld [vmem:[#allocation2 + $0xc8] sm:$0xff] }
  0x7b   :  { %650 = vmatprep.subr.mxu1 %v597_v27  ;;  %441 = vmatpush2.msra.mxu0 %v1547_v28  ;;  %v788_v27 = vld [vmem:[#allocation2 + $0x4c8] sm:$0xff]  ;;  %v503_v28 = vld [vmem:[#allocation2 + $0xc0] sm:$0xff] }
  0x7c   :  { %651 = vmatpush2.msra.mxu1 %v596_v29  ;;  %442 = vmatprep.subr.mxu0 %v1546_v30  ;;  %v787_v29 = vld [vmem:[#allocation2 + $0x4c0] sm:$0xff]  ;;  %v502_v30 = vld [vmem:[#allocation2 + $0xb8] sm:$0xff] }
  0x7d   :  { %652 = vmatprep.subr.mxu1 %v595_v31  ;;  %443 = vmatpush2.msra.mxu0 %v1545_v32  ;;  %v786_v31 = vld [vmem:[#allocation2 + $0x4b8] sm:$0xff]  ;;  %v501_v32 = vld [vmem:[#allocation2 + $0xb0] sm:$0xff] }
  0x7e   :  { %653 = vmatpush2.msra.mxu1 %v594_v33  ;;  %444 = vmatprep.subr.mxu0 %v1544_v34  ;;  %v785_v33 = vld [vmem:[#allocation2 + $0x4b0] sm:$0xff]  ;;  %v500_v34 = vld [vmem:[#allocation2 + $0xa8] sm:$0xff] }
  0x7f   :  { %654 = vmatprep.subr.mxu1 %v593_v35  ;;  %445 = vmatpush2.msra.mxu0 %v1543_v36  ;;  %v784_v35 = vld [vmem:[#allocation2 + $0x4a8] sm:$0xff]  ;;  %v499_v36 = vld [vmem:[#allocation2 + $0xa0] sm:$0xff] }
  0x80   :  { %655 = vmatpush2.msra.mxu1 %v592_v37  ;;  %446 = vmatprep.subr.mxu0 %v1542_v38  ;;  %v783_v37 = vld [vmem:[#allocation2 + $0x4a0] sm:$0xff]  ;;  %v498_v38 = vld [vmem:[#allocation2 + $0x98] sm:$0xff] }
  0x81   :  { %656 = vmatprep.subr.mxu1 %v591_v39  ;;  %447 = vmatpush2.msra.mxu0 %v1541_v40  ;;  %v782_v39 = vld [vmem:[#allocation2 + $0x498] sm:$0xff]  ;;  %v497_v40 = vld [vmem:[#allocation2 + $0x90] sm:$0xff] }
  0x82   :  { %657 = vmatpush2.msra.mxu1 %v590_v41  ;;  %448 = vmatprep.subr.mxu0 %v1540_v42  ;;  %v781_v41 = vld [vmem:[#allocation2 + $0x490] sm:$0xff]  ;;  %v496_v42 = vld [vmem:[#allocation2 + $0x88] sm:$0xff] }
  0x83   :  { %658 = vmatprep.subr.mxu1 %v589_v43  ;;  %449 = vmatpush2.msra.mxu0 %v1539_v44  ;;  %v780_v43 = vld [vmem:[#allocation2 + $0x488] sm:$0xff]  ;;  %v495_v44 = vld [vmem:[#allocation2 + $0x80] sm:$0xff] }
  0x84   :  { %659 = vmatpush2.msra.mxu1 %v588_v45  ;;  %450 = vmatprep.subr.mxu0 %v1538_v46  ;;  %v779_v45 = vld [vmem:[#allocation2 + $0x480] sm:$0xff]  ;;  %v494_v46 = vld [vmem:[#allocation2 + $0x78] sm:$0xff] }
  0x85   :  { %660 = vmatprep.subr.mxu1 %v587_v47  ;;  %451 = vmatpush2.msra.mxu0 %v1537_v48  ;;  %v778_v47 = vld [vmem:[#allocation2 + $0x478] sm:$0xff]  ;;  %v2559_v48 = vld [vmem:[#allocation2 + $0x70] sm:$0xff] }
  0x86   :  { %661 = vmatpush2.msra.mxu1 %v586_v49  ;;  %452 = vmatprep.subr.mxu0 %v1536_v50  ;;  %v2561_v49 = vld [vmem:[#allocation2 + $0x470] sm:$0xff]  ;;  %v2563_v50 = vld [vmem:[#allocation2 + $0x68] sm:$0xff] }
  0x87   :  { %662 = vmatprep.subr.mxu1 %v585_v51  ;;  %453 = vmatpush2.msra.mxu0 %v1535_v52  ;;  %v2565_v51 = vld [vmem:[#allocation2 + $0x468] sm:$0xff]  ;;  %v2567_v52 = vld [vmem:[#allocation2 + $0x60] sm:$0xff] }
  0x88   :  { %663 = vmatpush2.msra.mxu1 %v584_v53  ;;  %454 = vmatprep.subr.mxu0 %v1534_v54  ;;  %v2569_v53 = vld [vmem:[#allocation2 + $0x460] sm:$0xff]  ;;  %v2573_v54 = vld [vmem:[#allocation2 + $0x58] sm:$0xff] }
  0x89   :  { %664 = vmatprep.subr.mxu1 %v583_v55  ;;  %455 = vmatpush2.msra.mxu0 %v1533_v56  ;;  %v2575_v55 = vld [vmem:[#allocation2 + $0x458] sm:$0xff]  ;;  %v2579_v56 = vld [vmem:[#allocation2 + $0x50] sm:$0xff] }
  0x8a   :  { %665 = vmatpush2.msra.mxu1 %v582_v57  ;;  %249 = vmatprep.mubr.f32.mxu0 %v2494_v58  ;;  %v2581_v57 = vld [vmem:[#allocation2 + $0x450] sm:$0xff] }
  0x8b   :  { %326 = vmatprep.mubr.f32.mxu1 %v2499_v59  ;;  %456 = vmatprep.subr.mxu0 %v1532_v60  ;;  %v2585_v60 = vld [vmem:[#allocation2 + $0x48] sm:$0xff] }
  0x8c   :  { %666 = vmatprep.subr.mxu1 %v581_v61  ;;  %250 = vmatmul.mubr.f32.gmra.mxu0 %v2507_v62  ;;  %v2587_v61 = vld [vmem:[#allocation2 + $0x448] sm:$0xff] }
  0x8d   :  { %327 = vmatmul.mubr.f32.gmra.mxu1 %v2512_v0  ;;  %457 = vmatpush2.msra.mxu0 %v1531_v1  ;;  %v2591_v1 = vld [vmem:[#allocation2 + $0x40] sm:$0xff] }
  0x8e   :  { %667 = vmatpush2.msra.mxu1 %v580_v3  ;;  %458 = vmatprep.subr.mxu0 %v1530_v4  ;;  %v2593_v3 = vld [vmem:[#allocation2 + $0x440] sm:$0xff]  ;;  %v2597_v4 = vld [vmem:[#allocation2 + $0x38] sm:$0xff] }
  0x8f   :  { %668 = vmatprep.subr.mxu1 %v579_v5  ;;  %459 = vmatpush2.msra.mxu0 %v1529_v6  ;;  %v2599_v5 = vld [vmem:[#allocation2 + $0x438] sm:$0xff]  ;;  %v2603_v6 = vld [vmem:[#allocation2 + $0x30] sm:$0xff] }
  0x90   :  { %669 = vmatpush2.msra.mxu1 %v578_v7  ;;  %460 = vmatprep.subr.mxu0 %v1528_v8  ;;  %v2605_v7 = vld [vmem:[#allocation2 + $0x430] sm:$0xff]  ;;  %v2609_v8 = vld [vmem:[#allocation2 + $0x28] sm:$0xff] }
  0x91   :  { %670 = vmatprep.subr.mxu1 %v577_v9  ;;  %461 = vmatpush2.msra.mxu0 %v1527_v10  ;;  %v2611_v9 = vld [vmem:[#allocation2 + $0x428] sm:$0xff]  ;;  %v2615_v10 = vld [vmem:[#allocation2 + $0x20] sm:$0xff] }
  0x92   :  { %462 = vmatprep.mubr.f32.mxu0 %v2536_v11  ;;  %671 = vmatpush2.msra.mxu1 %v576_v12  ;;  %v2617_v12 = vld [vmem:[#allocation2 + $0x420] sm:$0xff] }
  0x93   :  { %463 = vmatmul.mubr.f32.vlgmr.msra.gmra.mxu0 %v2541_v13  ;;  %672 = vmatprep.mubr.f32.mxu1 %v2299_v63  ;;  %v506_v63 = vld [vmem:[#allocation2 + $0xd8] sm:$0xff] }
  0x94   :  { %685 = vmatprep.subr.mxu0 %v510_v14  ;;  %827 = vmatprep.subr.mxu1 %v794_v15  ;;  %v2621_v14 = vld [vmem:[#allocation2 + $0x18] sm:$0xff] }
  0x95   :  { %673 = vmatmul.mubr.f32.vlgmr.msra.gmra.mxu1 %v2310_v2  ;;  %686 = vmatpush1.msra.mxu0 %v509_v16  ;;  %v505_v2 = vld [vmem:[#allocation2 + $0xd0] sm:$0xff]  ;;  %v2623_v15 = vld [vmem:[#allocation2 + $0x418] sm:$0xff] }
  0x96   :  { %828 = vmatpush1.msra.mxu1 %v793_v17  ;;  %687 = vmatprep.subr.mxu0 %v508_v18  ;;  %v2627_v16 = vld [vmem:[#allocation2 + $0x10] sm:$0xff]  ;;  %v2633_v18 = vld [vmem:[#allocation2 + $0x8] sm:$0xff] }
  0x97   :  { %829 = vmatprep.subr.mxu1 %v792_v19  ;;  %468 = vmatprep.mubr.f32.mxu0 %v2550_v20  ;;  %v2629_v17 = vld [vmem:[#allocation2 + $0x410] sm:$0xff]  ;;  %v2635_v19 = vld [vmem:[#allocation2 + $0x408] sm:$0xff] }
  0x98   :  { %688 = vmatpush1.msra.mxu0 %v507_v21  ;;  %830 = vmatpush1.msra.mxu1 %v791_v22  ;;  %v2639_v21 = vld [vmem:[#allocation2] sm:$0xff] }
  0x99   :  { %469 = vmatmul.mubr.f32.gmra.mxu0 %v2555_v23  ;;  %689 = vmatprep.subr.mxu0 %v506_v63  ;;  %v2641_v22 = vld [vmem:[#allocation2 + $0x400] sm:$0xff]  ;;  %v2645_v63 = vld [vmem:[#allocation2 + $0x1f8] sm:$0xff] }
  0x9a   :  { %831 = vmatprep.subr.mxu1 %v790_v24  ;;  %690 = vmatpush1.msra.mxu0 %v505_v2  ;;  %v2647_v24 = vld [vmem:[#allocation2 + $0x5f8] sm:$0xff]  ;;  %v2651_v2 = vld [vmem:[#allocation2 + $0x1f0] sm:$0xff] }
  0x9b   :  { %832 = vmatpush1.msra.mxu1 %v789_v25  ;;  %691 = vmatprep.subr.mxu0 %v504_v26  ;;  %v2653_v25 = vld [vmem:[#allocation2 + $0x5f0] sm:$0xff]  ;;  %v2657_v26 = vld [vmem:[#allocation2 + $0x1e8] sm:$0xff] }
  0x9c   :  { %833 = vmatprep.subr.mxu1 %v788_v27  ;;  %692 = vmatpush1.msra.mxu0 %v503_v28  ;;  %v2659_v27 = vld [vmem:[#allocation2 + $0x5e8] sm:$0xff]  ;;  %v2663_v28 = vld [vmem:[#allocation2 + $0x1e0] sm:$0xff] }
  0x9d   :  { %834 = vmatpush1.msra.mxu1 %v787_v29  ;;  %693 = vmatprep.subr.mxu0 %v502_v30  ;;  %v2665_v29 = vld [vmem:[#allocation2 + $0x5e0] sm:$0xff]  ;;  %v2669_v30 = vld [vmem:[#allocation2 + $0x1d8] sm:$0xff] }
  0x9e   :  { %835 = vmatprep.subr.mxu1 %v786_v31  ;;  %694 = vmatpush1.msra.mxu0 %v501_v32  ;;  %v2671_v31 = vld [vmem:[#allocation2 + $0x5d8] sm:$0xff]  ;;  %v2675_v32 = vld [vmem:[#allocation2 + $0x1d0] sm:$0xff] }
  0x9f   :  { %836 = vmatpush1.msra.mxu1 %v785_v33  ;;  %695 = vmatprep.subr.mxu0 %v500_v34  ;;  %v2677_v33 = vld [vmem:[#allocation2 + $0x5d0] sm:$0xff]  ;;  %v2681_v34 = vld [vmem:[#allocation2 + $0x1c8] sm:$0xff] }
  0xa0   :  { %837 = vmatprep.subr.mxu1 %v784_v35  ;;  %696 = vmatpush1.msra.mxu0 %v499_v36  ;;  %v2683_v35 = vld [vmem:[#allocation2 + $0x5c8] sm:$0xff]  ;;  %v2687_v36 = vld [vmem:[#allocation2 + $0x1c0] sm:$0xff] }
  0xa1   :  { %838 = vmatpush1.msra.mxu1 %v783_v37  ;;  %697 = vmatprep.subr.mxu0 %v498_v38  ;;  %v2689_v37 = vld [vmem:[#allocation2 + $0x5c0] sm:$0xff]  ;;  %v2693_v38 = vld [vmem:[#allocation2 + $0x1b8] sm:$0xff] }
  0xa2   :  { %839 = vmatprep.subr.mxu1 %v782_v39  ;;  %698 = vmatpush1.msra.mxu0 %v497_v40  ;;  %3669 = vst [vmem:[#allocation5_spill] sm:$0xff] %v2689_v37  ;;  %3670 = vst [vmem:[#allocation6_spill] sm:$0xff] %v2693_v38  ;;  %v2695_v39 = vld [vmem:[#allocation2 + $0x5b8] sm:$0xff]  ;;  %v2699_v40 = vld [vmem:[#allocation2 + $0x1b0] sm:$0xff] }
  0xa3   :  { %840 = vmatpush1.msra.mxu1 %v781_v41  ;;  %699 = vmatprep.subr.mxu0 %v496_v42  ;;  %3671 = vst [vmem:[#allocation7_spill] sm:$0xff] %v2695_v39  ;;  %3672 = vst [vmem:[#allocation8_spill] sm:$0xff] %v2699_v40  ;;  %v2701_v41 = vld [vmem:[#allocation2 + $0x5b0] sm:$0xff]  ;;  %v2705_v42 = vld [vmem:[#allocation2 + $0x1a8] sm:$0xff] }
  0xa4   :  { %841 = vmatprep.subr.mxu1 %v780_v43  ;;  %700 = vmatpush1.msra.mxu0 %v495_v44  ;;  %3673 = vst [vmem:[#allocation9_spill] sm:$0xff] %v2701_v41  ;;  %3674 = vst [vmem:[#allocation10_spill] sm:$0xff] %v2705_v42  ;;  %v2707_v43 = vld [vmem:[#allocation2 + $0x5a8] sm:$0xff]  ;;  %v2711_v44 = vld [vmem:[#allocation2 + $0x1a0] sm:$0xff] }
  0xa5   :  { %842 = vmatpush1.msra.mxu1 %v779_v45  ;;  %701 = vmatprep.subr.mxu0 %v494_v46  ;;  %3675 = vst [vmem:[#allocation11_spill] sm:$0xff] %v2707_v43  ;;  %3676 = vst [vmem:[#allocation12_spill] sm:$0xff] %v2711_v44  ;;  %v2713_v45 = vld [vmem:[#allocation2 + $0x5a0] sm:$0xff]  ;;  %v2717_v46 = vld [vmem:[#allocation2 + $0x198] sm:$0xff] }
  0xa6   :  { %843 = vmatprep.subr.mxu1 %v778_v47  ;;  %702 = vmatpush1.msra.mxu0 %v2559_v48  ;;  %3677 = vst [vmem:[#allocation13_spill] sm:$0xff] %v2713_v45  ;;  %3678 = vst [vmem:[#allocation14_spill] sm:$0xff] %v2717_v46  ;;  %v2719_v47 = vld [vmem:[#allocation2 + $0x598] sm:$0xff] }
  0xa7   :  { %844 = vmatpush1.msra.mxu1 %v2561_v49  ;;  %703 = vmatprep.subr.mxu0 %v2563_v50  ;;  %3679 = vst [vmem:[#allocation15_spill] sm:$0xff] %v2719_v47 }
  0xa8   :  { %845 = vmatprep.subr.mxu1 %v2565_v51  ;;  %704 = vmatpush1.msra.mxu0 %v2567_v52 }
  0xa9   :  { %846 = vmatpush1.msra.mxu1 %v2569_v53  ;;  %705 = vmatprep.subr.mxu0 %v2573_v54 }
  0xaa   :  { %847 = vmatprep.subr.mxu1 %v2575_v55  ;;  %706 = vmatpush1.msra.mxu0 %v2579_v56 }
  0xab   :  { %848 = vmatpush1.msra.mxu1 %v2581_v57  ;;  %707 = vmatprep.subr.mxu0 %v2585_v60 }
  0xac   :  { %849 = vmatprep.subr.mxu1 %v2587_v61  ;;  %708 = vmatpush1.msra.mxu0 %v2591_v1 }
  0xad   :  { %850 = vmatpush1.msra.mxu1 %v2593_v3  ;;  %709 = vmatprep.subr.mxu0 %v2597_v4 }
  0xae   :  { %851 = vmatprep.subr.mxu1 %v2599_v5  ;;  %710 = vmatpush1.msra.mxu0 %v2603_v6 }
  0xaf   :  { %852 = vmatpush1.msra.mxu1 %v2605_v7  ;;  %711 = vmatprep.subr.mxu0 %v2609_v8 }
  0xb0   :  { %853 = vmatprep.subr.mxu1 %v2611_v9  ;;  %712 = vmatpush1.msra.mxu0 %v2615_v10 }
  0xb1   :  { %854 = vmatpush1.msra.mxu1 %v2617_v12  ;;  %713 = vmatprep.subr.mxu0 %v2621_v14 }
  0xb2   :  { %855 = vmatprep.subr.mxu1 %v2623_v15  ;;  %714 = vmatpush1.msra.mxu0 %v2627_v16 }
  0xb3   :  { %856 = vmatpush1.msra.mxu1 %v2629_v17  ;;  %715 = vmatprep.subr.mxu0 %v2633_v18 }
  0xb4   :  { %857 = vmatprep.subr.mxu1 %v2635_v19  ;;  %716 = vmatpush1.msra.mxu0 %v2639_v21 }
  0xb5   :  { %858 = vmatpush1.msra.mxu1 %v2641_v22  ;;  %717 = vmatprep.subr.mxu0 %v2645_v63 }
  0xb6   :  { %859 = vmatprep.subr.mxu1 %v2647_v24  ;;  %718 = vmatpush2.msra.mxu0 %v2651_v2 }
  0xb7   :  { %860 = vmatpush2.msra.mxu1 %v2653_v25  ;;  %719 = vmatprep.subr.mxu0 %v2657_v26 }
  0xb8   :  { %861 = vmatprep.subr.mxu1 %v2659_v27  ;;  %720 = vmatpush2.msra.mxu0 %v2663_v28 }
  0xb9   :  { %862 = vmatpush2.msra.mxu1 %v2665_v29  ;;  %721 = vmatprep.subr.mxu0 %v2669_v30 }
  0xba   :  { %863 = vmatprep.subr.mxu1 %v2671_v31  ;;  %722 = vmatpush2.msra.mxu0 %v2675_v32 }
  0xbb   :  { %864 = vmatpush2.msra.mxu1 %v2677_v33  ;;  %723 = vmatprep.subr.mxu0 %v2681_v34 }
  0xbc   :  { %865 = vmatprep.subr.mxu1 %v2683_v35  ;;  %724 = vmatpush2.msra.mxu0 %v2687_v36 }
  0xbd   :  { %866 = vmatpush2.msra.mxu1 %v2689_v37  ;;  %725 = vmatprep.subr.mxu0 %v2693_v38  ;;  %v2723_v37 = vld [vmem:[#allocation2 + $0x190] sm:$0xff] }
  0xbe   :  { %867 = vmatprep.subr.mxu1 %v2695_v39  ;;  %726 = vmatpush2.msra.mxu0 %v2699_v40  ;;  %3680 = vst [vmem:[#allocation16_spill] sm:$0xff] %v2723_v37  ;;  %v2725_v38 = vld [vmem:[#allocation2 + $0x590] sm:$0xff]  ;;  %v2729_v39 = vld [vmem:[#allocation2 + $0x188] sm:$0xff] }
  0xbf   :  { %868 = vmatpush2.msra.mxu1 %v2701_v41  ;;  %727 = vmatprep.subr.mxu0 %v2705_v42  ;;  %3681 = vst [vmem:[#allocation17_spill] sm:$0xff] %v2725_v38  ;;  %3682 = vst [vmem:[#allocation18_spill] sm:$0xff] %v2729_v39  ;;  %v2731_v40 = vld [vmem:[#allocation2 + $0x588] sm:$0xff]  ;;  %v2735_v41 = vld [vmem:[#allocation2 + $0x180] sm:$0xff] }
  0xc0   :  { %869 = vmatprep.subr.mxu1 %v2707_v43  ;;  %728 = vmatpush2.msra.mxu0 %v2711_v44  ;;  %3683 = vst [vmem:[#allocation19_spill] sm:$0xff] %v2731_v40  ;;  %3684 = vst [vmem:[#allocation20_spill] sm:$0xff] %v2735_v41  ;;  %v2737_v42 = vld [vmem:[#allocation2 + $0x580] sm:$0xff]  ;;  %v2741_v43 = vld [vmem:[#allocation2 + $0x178] sm:$0xff] }
  0xc1   :  { %870 = vmatpush2.msra.mxu1 %v2713_v45  ;;  %729 = vmatprep.subr.mxu0 %v2717_v46  ;;  %3685 = vst [vmem:[#allocation21_spill] sm:$0xff] %v2737_v42  ;;  %3686 = vst [vmem:[#allocation22_spill] sm:$0xff] %v2741_v43  ;;  %v2743_v44 = vld [vmem:[#allocation2 + $0x578] sm:$0xff]  ;;  %v2747_v45 = vld [vmem:[#allocation2 + $0x170] sm:$0xff] }
  0xc2   :  { %871 = vmatprep.subr.mxu1 %v2719_v47  ;;  %730 = vmatpush2.msra.mxu0 %v2723_v37  ;;  %3687 = vst [vmem:[#allocation23_spill] sm:$0xff] %v2743_v44  ;;  %3688 = vst [vmem:[#allocation24_spill] sm:$0xff] %v2747_v45  ;;  %v2749_v46 = vld [vmem:[#allocation2 + $0x570] sm:$0xff]  ;;  %v2753_v47 = vld [vmem:[#allocation2 + $0x168] sm:$0xff] }
  0xc3   :  { %872 = vmatpush2.msra.mxu1 %v2725_v38  ;;  %731 = vmatprep.subr.mxu0 %v2729_v39  ;;  %3689 = vst [vmem:[#allocation25_spill] sm:$0xff] %v2749_v46  ;;  %3690 = vst [vmem:[#allocation26_spill] sm:$0xff] %v2753_v47  ;;  %v2755_v37 = vld [vmem:[#allocation2 + $0x568] sm:$0xff]  ;;  %v2759_v38 = vld [vmem:[#allocation2 + $0x160] sm:$0xff] }
  0xc4   :  { %873 = vmatprep.subr.mxu1 %v2731_v40  ;;  %732 = vmatpush2.msra.mxu0 %v2735_v41  ;;  %3691 = vst [vmem:[#allocation27_spill] sm:$0xff] %v2755_v37  ;;  %3692 = vst [vmem:[#allocation28_spill] sm:$0xff] %v2759_v38  ;;  %v2761_v39 = vld [vmem:[#allocation2 + $0x560] sm:$0xff]  ;;  %v2765_v40 = vld [vmem:[#allocation2 + $0x158] sm:$0xff] }
  0xc5   :  { %874 = vmatpush2.msra.mxu1 %v2737_v42  ;;  %733 = vmatprep.subr.mxu0 %v2741_v43  ;;  %3693 = vst [vmem:[#allocation29_spill] sm:$0xff] %v2761_v39  ;;  %3694 = vst [vmem:[#allocation30_spill] sm:$0xff] %v2765_v40  ;;  %v2767_v41 = vld [vmem:[#allocation2 + $0x558] sm:$0xff]  ;;  %v2771_v42 = vld [vmem:[#allocation2 + $0x150] sm:$0xff] }
  0xc6   :  { %875 = vmatprep.subr.mxu1 %v2743_v44  ;;  %734 = vmatpush2.msra.mxu0 %v2747_v45  ;;  %3695 = vst [vmem:[#allocation31_spill] sm:$0xff] %v2767_v41  ;;  %3696 = vst [vmem:[#allocation32_spill] sm:$0xff] %v2771_v42  ;;  %v2773_v43 = vld [vmem:[#allocation2 + $0x550] sm:$0xff]  ;;  %v2777_v44 = vld [vmem:[#allocation2 + $0x148] sm:$0xff] }
  0xc7   :  { %876 = vmatpush2.msra.mxu1 %v2749_v46  ;;  %735 = vmatprep.subr.mxu0 %v2753_v47  ;;  %3697 = vst [vmem:[#allocation33_spill] sm:$0xff] %v2773_v43  ;;  %3698 = vst [vmem:[#allocation34_spill] sm:$0xff] %v2777_v44  ;;  %v2779_v45 = vld [vmem:[#allocation2 + $0x548] sm:$0xff]  ;;  %v2783_v46 = vld [vmem:[#allocation2 + $0x140] sm:$0xff] }
  0xc8   :  { %877 = vmatprep.subr.mxu1 %v2755_v37  ;;  %736 = vmatpush2.msra.mxu0 %v2759_v38  ;;  %3699 = vst [vmem:[#allocation35_spill] sm:$0xff] %v2779_v45  ;;  %v2785_v47 = vld [vmem:[#allocation2 + $0x540] sm:$0xff]  ;;  %v2789_v37 = vld [vmem:[#allocation2 + $0x138] sm:$0xff] }
  0xc9   :  { %878 = vmatpush2.msra.mxu1 %v2761_v39  ;;  %737 = vmatprep.subr.mxu0 %v2765_v40  ;;  %3700 = vst [vmem:[#allocation36_spill] sm:$0xff] %v2785_v47  ;;  %3701 = vst [vmem:[#allocation37_spill] sm:$0xff] %v2789_v37  ;;  %v2791_v38 = vld [vmem:[#allocation2 + $0x538] sm:$0xff]  ;;  %v2795_v39 = vld [vmem:[#allocation2 + $0x130] sm:$0xff] }
  0xca   :  { %879 = vmatprep.subr.mxu1 %v2767_v41  ;;  %738 = vmatpush2.msra.mxu0 %v2771_v42  ;;  %3702 = vst [vmem:[#allocation38_spill] sm:$0xff] %v2791_v38  ;;  %3703 = vst [vmem:[#allocation39_spill] sm:$0xff] %v2795_v39  ;;  %v2797_v40 = vld [vmem:[#allocation2 + $0x530] sm:$0xff]  ;;  %v2801_v41 = vld [vmem:[#allocation2 + $0x128] sm:$0xff] }
  0xcb   :  { %880 = vmatpush2.msra.mxu1 %v2773_v43  ;;  %739 = vmatprep.subr.mxu0 %v2777_v44  ;;  %3704 = vst [vmem:[#allocation40_spill] sm:$0xff] %v2797_v40  ;;  %v2803_v42 = vld [vmem:[#allocation2 + $0x528] sm:$0xff]  ;;  %v2807_v43 = vld [vmem:[#allocation2 + $0x120] sm:$0xff] }
  0xcc   :  { %881 = vmatprep.subr.mxu1 %v2779_v45  ;;  %740 = vmatpush2.msra.mxu0 %v2783_v46  ;;  %3705 = vst [vmem:[#allocation41_spill] sm:$0xff] %v2803_v42  ;;  %v2809_v44 = vld [vmem:[#allocation2 + $0x520] sm:$0xff]  ;;  %v2813_v45 = vld [vmem:[#allocation2 + $0x118] sm:$0xff] }
  0xcd   :  { %882 = vmatpush2.msra.mxu1 %v2785_v47  ;;  %741 = vmatprep.subr.mxu0 %v2789_v37  ;;  %3706 = vst [vmem:[#allocation42_spill] sm:$0xff] %v2809_v44  ;;  %v2817_v47 = vld [vmem:[#allocation2 + $0x518] sm:$0xff]  ;;  %v2823_v37 = vld [vmem:[#allocation2 + $0x510] sm:$0xff] }
  0xce   :  { %883 = vmatprep.subr.mxu1 %v2791_v38  ;;  %742 = vmatpush2.msra.mxu0 %v2795_v39  ;;  %v2821_v38 = vld [vmem:[#allocation2 + $0x110] sm:$0xff]  ;;  %v2829_v39 = vld [vmem:[#allocation2 + $0x508] sm:$0xff] }
  0xcf   :  { %884 = vmatpush2.msra.mxu1 %v2797_v40  ;;  %743 = vmatprep.subr.mxu0 %v2801_v41  ;;  %v2827_v40 = vld [vmem:[#allocation2 + $0x108] sm:$0xff]  ;;  %3707 = vst [vmem:[#allocation43_spill] sm:$0xff] %v2829_v39 }
  0xd0   :  { %885 = vmatprep.subr.mxu1 %v2803_v42  ;;  %744 = vmatpush2.msra.mxu0 %v2807_v43  ;;  %v2833_v42 = vld [vmem:[#allocation2 + $0x100] sm:$0xff] }
  0xd1   :  { %886 = vmatpush2.msra.mxu1 %v2809_v44  ;;  %678 = vmatprep.mubr.f32.mxu1 %v2494_v58  ;;  %3708 = vst [vmem:[#allocation44_spill] sm:$0xff] %v2833_v42  ;;  %v2837_v44 = vld [vmem:[#allocation2 + $0x500] sm:$0xff]  ;;  %v1562_v58 = vld [vmem:[%s3615_s0 + $0x8] sm:$0xff] }
  0xd2   :  { %745 = vmatprep.subr.mxu0 %v2813_v45  ;;  %887 = vmatprep.subr.mxu1 %v2817_v47  ;;  %3709 = vst [vmem:[#allocation45_spill] sm:$0xff] %v2837_v44 }
  0xd3   :  { %679 = vmatmul.mubr.f32.gmra.mxu1 %v2507_v62  ;;  %746 = vmatpush2.msra.mxu0 %v2821_v38  ;;  %v1563_v62 = vld [vmem:[%s3615_s0] sm:$0xff] }
  0xd4   :  { %888 = vmatpush2.msra.mxu1 %v2823_v37  ;;  %747 = vmatprep.subr.mxu0 %v2827_v40 }
  0xd5   :  { %889 = vmatprep.subr.mxu1 %v2829_v39  ;;  %748 = vmatpush2.msra.mxu0 %v2833_v42  ;;  %v1564_v39 = vld [vmem:[%s3616_s1 + $0x2f8] sm:$0xff] }
  0xd6   :  { %749 = vmatprep.mubr.f32.mxu0 %v1562_v58  ;;  %890 = vmatpush2.msra.mxu1 %v2837_v44  ;;  %v1565_v42 = vld [vmem:[%s3616_s1 + $0xf8] sm:$0xff]  ;;  %v1566_v58 = vld [vmem:[%s3616_s1 + $0x2f0] sm:$0xff] }
  0xd7   :  { %750 = vmatmul.mubr.f32.vlgmr.msra.gmra.mxu0 %v1563_v62  ;;  %891 = vmatprep.mubr.f32.mxu1 %v2536_v11  ;;  %v1567_v62 = vld [vmem:[%s3616_s1 + $0xf0] sm:$0xff] }
  0xd8   :  { %912 = vmatprep.subr.mxu0 %v1564_v39  ;;  %989 = vmatprep.subr.mxu1 %v1565_v42  ;;  %v1568_v39 = vld [vmem:[%s3616_s1 + $0x2e8] sm:$0xff]  ;;  %v1837_v44 = vld [vmem:[#allocation2 + $0x4d0] sm:$0xff] }
  0xd9   :  { %892 = vmatmul.mubr.f32.vlgmr.msra.gmra.mxu1 %v2541_v13  ;;  %913 = vmatpush1.msra.mxu0 %v1566_v58  ;;  %v1569_v42 = vld [vmem:[%s3616_s1 + $0xe8] sm:$0xff]  ;;  %v1570_v58 = vld [vmem:[%s3616_s1 + $0x2e0] sm:$0xff] }
  0xda   :  { %990 = vmatpush1.msra.mxu1 %v1567_v62  ;;  %914 = vmatprep.subr.mxu0 %v1568_v39  ;;  %v1571_v62 = vld [vmem:[%s3616_s1 + $0xe0] sm:$0xff]  ;;  %v1572_v39 = vld [vmem:[%s3616_s1 + $0x2d8] sm:$0xff] }
  0xdb   :  { %991 = vmatprep.subr.mxu1 %v1569_v42  ;;  %755 = vmatprep.mubr.f32.mxu0 %v2499_v59  ;;  %v1573_v59 = vld [vmem:[%s3616_s1 + $0xd8] sm:$0xff]  ;;  %v1574_v42 = vld [vmem:[%s3616_s1 + $0x2d0] sm:$0xff] }
  0xdc   :  { %915 = vmatpush1.msra.mxu0 %v1570_v58  ;;  %992 = vmatpush1.msra.mxu1 %v1571_v62  ;;  %v1576_v58 = vld [vmem:[%s3616_s1 + $0x2c8] sm:$0xff] }
  0xdd   :  { %756 = vmatmul.mubr.f32.gmra.mxu0 %v2512_v0  ;;  %916 = vmatprep.subr.mxu0 %v1572_v39  ;;  %v1575_v0 = vld [vmem:[%s3616_s1 + $0xd0] sm:$0xff]  ;;  %v1577_v62 = vld [vmem:[%s3616_s1 + $0xc8] sm:$0xff]  ;;  %v1578_v39 = vld [vmem:[%s3616_s1 + $0x2c0] sm:$0xff] }
  0xde   :  { %993 = vmatprep.subr.mxu1 %v1573_v59  ;;  %897 = vmatprep.mubr.f32.mxu1 %v2550_v20  ;;  %v1579_v59 = vld [vmem:[%s3616_s1 + $0xc0] sm:$0xff] }
  0xdf   :  { %917 = vmatpush1.msra.mxu0 %v1574_v42  ;;  %994 = vmatpush1.msra.mxu1 %v1575_v0  ;;  %v1580_v42 = vld [vmem:[%s3616_s1 + $0x2b8] sm:$0xff] }
  0xe0   :  { %918 = vmatprep.subr.mxu0 %v1576_v58  ;;  %898 = vmatmul.mubr.f32.gmra.mxu1 %v2555_v23  ;;  %v1581_v0 = vld [vmem:[%s3616_s1 + $0xb8] sm:$0xff]  ;;  %v1582_v58 = vld [vmem:[%s3616_s1 + $0x2b0] sm:$0xff] }
  0xe1   :  { %995 = vmatprep.subr.mxu1 %v1577_v62  ;;  %919 = vmatpush1.msra.mxu0 %v1578_v39  ;;  %v1583_v62 = vld [vmem:[%s3616_s1 + $0xb0] sm:$0xff]  ;;  %v1584_v39 = vld [vmem:[%s3616_s1 + $0x2a8] sm:$0xff] }
  0xe2   :  { %996 = vmatpush1.msra.mxu1 %v1579_v59  ;;  %920 = vmatprep.subr.mxu0 %v1580_v42  ;;  %v1585_v59 = vld [vmem:[%s3616_s1 + $0xa8] sm:$0xff]  ;;  %v1586_v42 = vld [vmem:[%s3616_s1 + $0x2a0] sm:$0xff] }
  0xe3   :  { %997 = vmatprep.subr.mxu1 %v1581_v0  ;;  %921 = vmatpush1.msra.mxu0 %v1582_v58  ;;  %v1587_v0 = vld [vmem:[%s3616_s1 + $0xa0] sm:$0xff]  ;;  %v1588_v58 = vld [vmem:[%s3616_s1 + $0x298] sm:$0xff] }
  0xe4   :  { %998 = vmatpush1.msra.mxu1 %v1583_v62  ;;  %922 = vmatprep.subr.mxu0 %v1584_v39  ;;  %v1589_v62 = vld [vmem:[%s3616_s1 + $0x98] sm:$0xff]  ;;  %v1590_v39 = vld [vmem:[%s3616_s1 + $0x290] sm:$0xff] }
  0xe5   :  { %999 = vmatprep.subr.mxu1 %v1585_v59  ;;  %923 = vmatpush1.msra.mxu0 %v1586_v42  ;;  %v1591_v59 = vld [vmem:[%s3616_s1 + $0x90] sm:$0xff]  ;;  %v1592_v42 = vld [vmem:[%s3616_s1 + $0x288] sm:$0xff] }
  0xe6   :  { %1000 = vmatpush1.msra.mxu1 %v1587_v0  ;;  %924 = vmatprep.subr.mxu0 %v1588_v58  ;;  %v1593_v0 = vld [vmem:[%s3616_s1 + $0x88] sm:$0xff]  ;;  %v1594_v58 = vld [vmem:[%s3616_s1 + $0x280] sm:$0xff] }
  0xe7   :  { %1001 = vmatprep.subr.mxu1 %v1589_v62  ;;  %925 = vmatpush1.msra.mxu0 %v1590_v39  ;;  %v1595_v62 = vld [vmem:[%s3616_s1 + $0x80] sm:$0xff]  ;;  %v1596_v39 = vld [vmem:[%s3616_s1 + $0x278] sm:$0xff] }
  0xe8   :  { %1002 = vmatpush1.msra.mxu1 %v1591_v59  ;;  %926 = vmatprep.subr.mxu0 %v1592_v42  ;;  %v1597_v59 = vld [vmem:[%s3616_s1 + $0x78] sm:$0xff]  ;;  %v1598_v42 = vld [vmem:[%s3616_s1 + $0x270] sm:$0xff] }
  0xe9   :  { %1003 = vmatprep.subr.mxu1 %v1593_v0  ;;  %927 = vmatpush1.msra.mxu0 %v1594_v58  ;;  %v1599_v0 = vld [vmem:[%s3616_s1 + $0x70] sm:$0xff]  ;;  %v1600_v58 = vld [vmem:[%s3616_s1 + $0x268] sm:$0xff] }
  0xea   :  { %1004 = vmatpush1.msra.mxu1 %v1595_v62  ;;  %928 = vmatprep.subr.mxu0 %v1596_v39  ;;  %v1601_v62 = vld [vmem:[%s3616_s1 + $0x68] sm:$0xff]  ;;  %v1602_v39 = vld [vmem:[%s3616_s1 + $0x260] sm:$0xff] }
  0xeb   :  { %1005 = vmatprep.subr.mxu1 %v1597_v59  ;;  %929 = vmatpush1.msra.mxu0 %v1598_v42  ;;  %v1603_v59 = vld [vmem:[%s3616_s1 + $0x60] sm:$0xff]  ;;  %v1604_v42 = vld [vmem:[%s3616_s1 + $0x258] sm:$0xff] }
  0xec   :  { %1006 = vmatpush1.msra.mxu1 %v1599_v0  ;;  %930 = vmatprep.subr.mxu0 %v1600_v58  ;;  %v1605_v0 = vld [vmem:[%s3616_s1 + $0x58] sm:$0xff]  ;;  %v1606_v58 = vld [vmem:[%s3616_s1 + $0x250] sm:$0xff] }
  0xed   :  { %1007 = vmatprep.subr.mxu1 %v1601_v62  ;;  %931 = vmatpush1.msra.mxu0 %v1602_v39  ;;  %v1607_v62 = vld [vmem:[%s3616_s1 + $0x50] sm:$0xff]  ;;  %v1608_v39 = vld [vmem:[%s3616_s1 + $0x248] sm:$0xff] }
  0xee   :  { %1008 = vmatpush1.msra.mxu1 %v1603_v59  ;;  %932 = vmatprep.subr.mxu0 %v1604_v42  ;;  %v1609_v59 = vld [vmem:[%s3616_s1 + $0x48] sm:$0xff]  ;;  %v1610_v42 = vld [vmem:[%s3616_s1 + $0x240] sm:$0xff] }
  0xef   :  { %1009 = vmatprep.subr.mxu1 %v1605_v0  ;;  %933 = vmatpush1.msra.mxu0 %v1606_v58  ;;  %v1611_v0 = vld [vmem:[%s3616_s1 + $0x40] sm:$0xff]  ;;  %v1612_v58 = vld [vmem:[%s3616_s1 + $0x238] sm:$0xff] }
  0xf0   :  { %1010 = vmatpush1.msra.mxu1 %v1607_v62  ;;  %934 = vmatprep.subr.mxu0 %v1608_v39  ;;  %v1613_v62 = vld [vmem:[%s3616_s1 + $0x38] sm:$0xff]  ;;  %v1614_v39 = vld [vmem:[%s3616_s1 + $0x230] sm:$0xff] }
  0xf1   :  { %1011 = vmatprep.subr.mxu1 %v1609_v59  ;;  %935 = vmatpush1.msra.mxu0 %v1610_v42  ;;  %v1615_v59 = vld [vmem:[%s3616_s1 + $0x30] sm:$0xff]  ;;  %v1616_v42 = vld [vmem:[%s3616_s1 + $0x228] sm:$0xff] }
  0xf2   :  { %1012 = vmatpush1.msra.mxu1 %v1611_v0  ;;  %936 = vmatprep.subr.mxu0 %v1612_v58  ;;  %v1617_v0 = vld [vmem:[%s3616_s1 + $0x28] sm:$0xff]  ;;  %v1618_v58 = vld [vmem:[%s3616_s1 + $0x220] sm:$0xff] }
  0xf3   :  { %1013 = vmatprep.subr.mxu1 %v1613_v62  ;;  %937 = vmatpush1.msra.mxu0 %v1614_v39  ;;  %v1619_v62 = vld [vmem:[%s3616_s1 + $0x20] sm:$0xff]  ;;  %v1620_v39 = vld [vmem:[%s3616_s1 + $0x218] sm:$0xff] }
  0xf4   :  { %1014 = vmatpush1.msra.mxu1 %v1615_v59  ;;  %938 = vmatprep.subr.mxu0 %v1616_v42  ;;  %v1621_v59 = vld [vmem:[%s3616_s1 + $0x18] sm:$0xff]  ;;  %v1622_v42 = vld [vmem:[%s3616_s1 + $0x210] sm:$0xff] }
  0xf5   :  { %1015 = vmatprep.subr.mxu1 %v1617_v0  ;;  %939 = vmatpush1.msra.mxu0 %v1618_v58  ;;  %v1623_v0 = vld [vmem:[%s3616_s1 + $0x10] sm:$0xff]  ;;  %v1624_v58 = vld [vmem:[%s3616_s1 + $0x208] sm:$0xff] }
  0xf6   :  { %1016 = vmatpush1.msra.mxu1 %v1619_v62  ;;  %940 = vmatprep.subr.mxu0 %v1620_v39  ;;  %v1625_v62 = vld [vmem:[%s3616_s1 + $0x8] sm:$0xff]  ;;  %v1626_v39 = vld [vmem:[%s3616_s1 + $0x200] sm:$0xff] }
  0xf7   :  { %1017 = vmatprep.subr.mxu1 %v1621_v59  ;;  %941 = vmatpush1.msra.mxu0 %v1622_v42  ;;  %v1627_v59 = vld [vmem:[%s3616_s1] sm:$0xff]  ;;  %v1628_v42 = vld [vmem:[%s3616_s1 + $0x3f8] sm:$0xff] }
  0xf8   :  { %1018 = vmatpush1.msra.mxu1 %v1623_v0  ;;  %942 = vmatprep.subr.mxu0 %v1624_v58  ;;  %v1629_v0 = vld [vmem:[%s3616_s1 + $0x1f8] sm:$0xff]  ;;  %v1630_v58 = vld [vmem:[%s3616_s1 + $0x3f0] sm:$0xff] }
  0xf9   :  { %1019 = vmatprep.subr.mxu1 %v1625_v62  ;;  %943 = vmatpush1.msra.mxu0 %v1626_v39  ;;  %v1631_v62 = vld [vmem:[%s3616_s1 + $0x1f0] sm:$0xff]  ;;  %v1632_v39 = vld [vmem:[%s3616_s1 + $0x3e8] sm:$0xff] }
  0xfa   :  { %1020 = vmatpush1.msra.mxu1 %v1627_v59  ;;  %944 = vmatprep.subr.mxu0 %v1628_v42  ;;  %v1633_v59 = vld [vmem:[%s3616_s1 + $0x1e8] sm:$0xff]  ;;  %v1634_v42 = vld [vmem:[%s3616_s1 + $0x3e0] sm:$0xff] }
  0xfb   :  { %1021 = vmatprep.subr.mxu1 %v1629_v0  ;;  %945 = vmatpush2.msra.mxu0 %v1630_v58  ;;  %v1635_v0 = vld [vmem:[%s3616_s1 + $0x1e0] sm:$0xff]  ;;  %v1636_v58 = vld [vmem:[%s3616_s1 + $0x3d8] sm:$0xff] }
  0xfc   :  { %1022 = vmatpush2.msra.mxu1 %v1631_v62  ;;  %946 = vmatprep.subr.mxu0 %v1632_v39  ;;  %v1637_v62 = vld [vmem:[%s3616_s1 + $0x1d8] sm:$0xff]  ;;  %v1638_v39 = vld [vmem:[%s3616_s1 + $0x3d0] sm:$0xff] }
  0xfd   :  { %1023 = vmatprep.subr.mxu1 %v1633_v59  ;;  %947 = vmatpush2.msra.mxu0 %v1634_v42  ;;  %v1639_v59 = vld [vmem:[%s3616_s1 + $0x1d0] sm:$0xff]  ;;  %v1640_v42 = vld [vmem:[%s3616_s1 + $0x3c8] sm:$0xff] }
  0xfe   :  { %1024 = vmatpush2.msra.mxu1 %v1635_v0  ;;  %948 = vmatprep.subr.mxu0 %v1636_v58  ;;  %v1641_v0 = vld [vmem:[%s3616_s1 + $0x1c8] sm:$0xff]  ;;  %v1642_v58 = vld [vmem:[%s3616_s1 + $0x3c0] sm:$0xff] }
  0xff   :  { %1025 = vmatprep.subr.mxu1 %v1637_v62  ;;  %949 = vmatpush2.msra.mxu0 %v1638_v39  ;;  %v1643_v62 = vld [vmem:[%s3616_s1 + $0x1c0] sm:$0xff]  ;;  %v1644_v39 = vld [vmem:[%s3616_s1 + $0x3b8] sm:$0xff] }
 0x100   :  { %1026 = vmatpush2.msra.mxu1 %v1639_v59  ;;  %950 = vmatprep.subr.mxu0 %v1640_v42  ;;  %v1645_v59 = vld [vmem:[%s3616_s1 + $0x1b8] sm:$0xff]  ;;  %v1646_v42 = vld [vmem:[%s3616_s1 + $0x3b0] sm:$0xff] }
 0x101   :  { %1027 = vmatprep.subr.mxu1 %v1641_v0  ;;  %951 = vmatpush2.msra.mxu0 %v1642_v58  ;;  %v1647_v0 = vld [vmem:[%s3616_s1 + $0x1b0] sm:$0xff]  ;;  %v1648_v58 = vld [vmem:[%s3616_s1 + $0x3a8] sm:$0xff] }
 0x102   :  { %1028 = vmatpush2.msra.mxu1 %v1643_v62  ;;  %952 = vmatprep.subr.mxu0 %v1644_v39  ;;  %v1649_v62 = vld [vmem:[%s3616_s1 + $0x1a8] sm:$0xff]  ;;  %v1650_v39 = vld [vmem:[%s3616_s1 + $0x3a0] sm:$0xff] }
 0x103   :  { %1029 = vmatprep.subr.mxu1 %v1645_v59  ;;  %953 = vmatpush2.msra.mxu0 %v1646_v42  ;;  %v1651_v59 = vld [vmem:[%s3616_s1 + $0x1a0] sm:$0xff]  ;;  %v1652_v42 = vld [vmem:[%s3616_s1 + $0x398] sm:$0xff] }
 0x104   :  { %1030 = vmatpush2.msra.mxu1 %v1647_v0  ;;  %954 = vmatprep.subr.mxu0 %v1648_v58  ;;  %v1653_v0 = vld [vmem:[%s3616_s1 + $0x198] sm:$0xff]  ;;  %v1654_v58 = vld [vmem:[%s3616_s1 + $0x390] sm:$0xff] }
 0x105   :  { %1031 = vmatprep.subr.mxu1 %v1649_v62  ;;  %955 = vmatpush2.msra.mxu0 %v1650_v39  ;;  %v1655_v62 = vld [vmem:[%s3616_s1 + $0x190] sm:$0xff]  ;;  %v1656_v39 = vld [vmem:[%s3616_s1 + $0x388] sm:$0xff] }
 0x106   :  { %1032 = vmatpush2.msra.mxu1 %v1651_v59  ;;  %956 = vmatprep.subr.mxu0 %v1652_v42  ;;  %v1657_v59 = vld [vmem:[%s3616_s1 + $0x188] sm:$0xff]  ;;  %v1658_v42 = vld [vmem:[%s3616_s1 + $0x380] sm:$0xff] }
 0x107   :  { %1033 = vmatprep.subr.mxu1 %v1653_v0  ;;  %957 = vmatpush2.msra.mxu0 %v1654_v58  ;;  %v1659_v0 = vld [vmem:[%s3616_s1 + $0x180] sm:$0xff]  ;;  %v1660_v58 = vld [vmem:[%s3616_s1 + $0x378] sm:$0xff] }
 0x108   :  { %1034 = vmatpush2.msra.mxu1 %v1655_v62  ;;  %958 = vmatprep.subr.mxu0 %v1656_v39  ;;  %v1661_v62 = vld [vmem:[%s3616_s1 + $0x178] sm:$0xff]  ;;  %v1662_v39 = vld [vmem:[%s3616_s1 + $0x370] sm:$0xff] }
 0x109   :  { %1035 = vmatprep.subr.mxu1 %v1657_v59  ;;  %959 = vmatpush2.msra.mxu0 %v1658_v42  ;;  %v1663_v59 = vld [vmem:[%s3616_s1 + $0x170] sm:$0xff]  ;;  %v1664_v42 = vld [vmem:[%s3616_s1 + $0x368] sm:$0xff] }
 0x10a   :  { %1036 = vmatpush2.msra.mxu1 %v1659_v0  ;;  %960 = vmatprep.subr.mxu0 %v1660_v58  ;;  %v1665_v0 = vld [vmem:[%s3616_s1 + $0x168] sm:$0xff]  ;;  %v1666_v58 = vld [vmem:[%s3616_s1 + $0x360] sm:$0xff] }
 0x10b   :  { %1037 = vmatprep.subr.mxu1 %v1661_v62  ;;  %961 = vmatpush2.msra.mxu0 %v1662_v39  ;;  %v1667_v62 = vld [vmem:[%s3616_s1 + $0x160] sm:$0xff]  ;;  %v1668_v39 = vld [vmem:[%s3616_s1 + $0x358] sm:$0xff] }
 0x10c   :  { %1038 = vmatpush2.msra.mxu1 %v1663_v59  ;;  %962 = vmatprep.subr.mxu0 %v1664_v42  ;;  %v1669_v59 = vld [vmem:[%s3616_s1 + $0x158] sm:$0xff]  ;;  %v1670_v42 = vld [vmem:[%s3616_s1 + $0x350] sm:$0xff] }
 0x10d   :  { %1039 = vmatprep.subr.mxu1 %v1665_v0  ;;  %963 = vmatpush2.msra.mxu0 %v1666_v58  ;;  %v1671_v0 = vld [vmem:[%s3616_s1 + $0x150] sm:$0xff]  ;;  %v1672_v58 = vld [vmem:[%s3616_s1 + $0x348] sm:$0xff] }
 0x10e   :  { %1040 = vmatpush2.msra.mxu1 %v1667_v62  ;;  %964 = vmatprep.subr.mxu0 %v1668_v39  ;;  %v1673_v62 = vld [vmem:[%s3616_s1 + $0x148] sm:$0xff]  ;;  %v1674_v39 = vld [vmem:[%s3616_s1 + $0x340] sm:$0xff] }
 0x10f   :  { %1041 = vmatprep.subr.mxu1 %v1669_v59  ;;  %965 = vmatpush2.msra.mxu0 %v1670_v42  ;;  %v1675_v59 = vld [vmem:[%s3616_s1 + $0x140] sm:$0xff]  ;;  %v1676_v42 = vld [vmem:[%s3616_s1 + $0x338] sm:$0xff] }
 0x110   :  { %1042 = vmatpush2.msra.mxu1 %v1671_v0  ;;  %966 = vmatprep.subr.mxu0 %v1672_v58  ;;  %v1677_v0 = vld [vmem:[%s3616_s1 + $0x138] sm:$0xff]  ;;  %v1678_v58 = vld [vmem:[%s3616_s1 + $0x330] sm:$0xff] }
 0x111   :  { %1043 = vmatprep.subr.mxu1 %v1673_v62  ;;  %967 = vmatpush2.msra.mxu0 %v1674_v39  ;;  %v1679_v62 = vld [vmem:[%s3616_s1 + $0x130] sm:$0xff]  ;;  %v1680_v39 = vld [vmem:[%s3616_s1 + $0x328] sm:$0xff] }
 0x112   :  { %1044 = vmatpush2.msra.mxu1 %v1675_v59  ;;  %968 = vmatprep.subr.mxu0 %v1676_v42  ;;  %v1681_v59 = vld [vmem:[%s3616_s1 + $0x128] sm:$0xff]  ;;  %v1682_v42 = vld [vmem:[%s3616_s1 + $0x320] sm:$0xff] }
 0x113   :  { %1045 = vmatprep.subr.mxu1 %v1677_v0  ;;  %969 = vmatpush2.msra.mxu0 %v1678_v58  ;;  %v1683_v0 = vld [vmem:[%s3616_s1 + $0x120] sm:$0xff]  ;;  %v1684_v58 = vld [vmem:[%s3616_s1 + $0x318] sm:$0xff] }
 0x114   :  { %1046 = vmatpush2.msra.mxu1 %v1679_v62  ;;  %970 = vmatprep.subr.mxu0 %v1680_v39  ;;  %v1685_v62 = vld [vmem:[%s3616_s1 + $0x118] sm:$0xff]  ;;  %v1686_v39 = vld [vmem:[%s3616_s1 + $0x310] sm:$0xff] }
 0x115   :  { %1047 = vmatprep.subr.mxu1 %v1681_v59  ;;  %971 = vmatpush2.msra.mxu0 %v1682_v42  ;;  %v1687_v59 = vld [vmem:[%s3616_s1 + $0x110] sm:$0xff]  ;;  %v1688_v42 = vld [vmem:[%s3616_s1 + $0x308] sm:$0xff] }
 0x116   :  { %1048 = vmatpush2.msra.mxu1 %v1683_v0  ;;  %972 = vmatprep.subr.mxu0 %v1684_v58  ;;  %v1689_v0 = vld [vmem:[%s3616_s1 + $0x108] sm:$0xff]  ;;  %v1690_v58 = vld [vmem:[%s3616_s1 + $0x300] sm:$0xff] }
 0x117   :  { %1049 = vmatprep.subr.mxu1 %v1685_v62  ;;  %973 = vmatpush2.msra.mxu0 %v1686_v39  ;;  %v1691_v62 = vld [vmem:[%s3616_s1 + $0x100] sm:$0xff]  ;;  %v3243_v39 = vld [vmem:[%s3615_s0 + $0x28] sm:$0xff] }
 0x118   :  { %1050 = vmatpush2.msra.mxu1 %v1687_v59  ;;  %974 = vmatprep.subr.mxu0 %v1688_v42  ;;  %3710 = vst [vmem:[#allocation46_spill] sm:$0xff] %v3243_v39  ;;  %v3250_v59 = vld [vmem:[%s3615_s0 + $0x20] sm:$0xff]  ;;  %v1695_v42 = vld [vmem:[#allocation2 + $0x2f8] sm:$0xff] }
 0x119   :  { %1051 = vmatprep.subr.mxu1 %v1689_v0  ;;  %975 = vmatpush2.msra.mxu0 %v1690_v58  ;;  %3711 = vst [vmem:[#allocation47_spill] sm:$0xff] %v3250_v59  ;;  %v1696_v0 = vld [vmem:[%s3616_s1 + $0x4f0] sm:$0xff]  ;;  %v1698_v58 = vld [vmem:[%s3616_s1 + $0x4e8] sm:$0xff] }
 0x11a   :  { %976 = vmatprep.mubr.f32.mxu0 %v2536_v11  ;;  %1052 = vmatpush2.msra.mxu1 %v1691_v62  ;;  %v1694_v11 = vld [vmem:[%s3616_s1 + $0x4f8] sm:$0xff]  ;;  %v1699_v62 = vld [vmem:[#allocation2 + $0x2e8] sm:$0xff] }
 0x11b   :  { %1053 = vmatprep.mubr.f32.mxu1 %v3243_v39  ;;  %977 = vmatmul.mubr.f32.vlgmr.msra.gmra.mxu0 %v2541_v13  ;;  %v1697_v13 = vld [vmem:[#allocation2 + $0x2f0] sm:$0xff]  ;;  %v1838_v39 = vld [vmem:[#allocation2 + $0xc8] sm:$0xff] }
 0x11c   :  { %1054 = vmatmul.mubr.f32.vlgmr.msra.gmra.mxu1 %v3250_v59  ;;  %1066 = vmatprep.subr.mxu0 %v1694_v11  ;;  %v1700_v11 = vld [vmem:[%s3616_s1 + $0x4e0] sm:$0xff] }
 0x11d   :  { %1151 = vmatprep.subr.mxu1 %v1695_v42  ;;  %1067 = vmatpush1.msra.mxu0 %v1696_v0  ;;  %v1701_v42 = vld [vmem:[#allocation2 + $0x2e0] sm:$0xff]  ;;  %v1702_v0 = vld [vmem:[%s3616_s1 + $0x4d8] sm:$0xff] }
 0x11e   :  { %1152 = vmatpush1.msra.mxu1 %v1697_v13  ;;  %1068 = vmatprep.subr.mxu0 %v1698_v58  ;;  %v1703_v13 = vld [vmem:[#allocation2 + $0x2d8] sm:$0xff]  ;;  %v1704_v58 = vld [vmem:[%s3616_s1 + $0x4d0] sm:$0xff]  ;;  %v1833_v59 = vld [vmem:[#allocation2 + $0x4e0] sm:$0xff] }
 0x11f   :  { %1153 = vmatprep.subr.mxu1 %v1699_v62  ;;  %1069 = vmatpush1.msra.mxu0 %v1700_v11  ;;  %v1705_v62 = vld [vmem:[#allocation2 + $0x2d0] sm:$0xff]  ;;  %v1706_v11 = vld [vmem:[%s3616_s1 + $0x4c8] sm:$0xff] }
 0x120   :  { %1154 = vmatpush1.msra.mxu1 %v1701_v42  ;;  %1070 = vmatprep.subr.mxu0 %v1702_v0  ;;  %v1707_v42 = vld [vmem:[#allocation2 + $0x2c8] sm:$0xff]  ;;  %v1708_v0 = vld [vmem:[%s3616_s1 + $0x4c0] sm:$0xff] }
 0x121   :  { %1155 = vmatprep.subr.mxu1 %v1703_v13  ;;  %1071 = vmatpush1.msra.mxu0 %v1704_v58  ;;  %v1709_v13 = vld [vmem:[#allocation2 + $0x2c0] sm:$0xff]  ;;  %v1710_v58 = vld [vmem:[%s3616_s1 + $0x4b8] sm:$0xff] }
 0x122   :  { %1156 = vmatpush1.msra.mxu1 %v1705_v62  ;;  %1072 = vmatprep.subr.mxu0 %v1706_v11  ;;  %v1711_v62 = vld [vmem:[#allocation2 + $0x2b8] sm:$0xff]  ;;  %v1712_v11 = vld [vmem:[%s3616_s1 + $0x4b0] sm:$0xff] }
 0x123   :  { %1157 = vmatprep.subr.mxu1 %v1707_v42  ;;  %1073 = vmatpush1.msra.mxu0 %v1708_v0  ;;  %v1713_v42 = vld [vmem:[#allocation2 + $0x2b0] sm:$0xff]  ;;  %v1714_v0 = vld [vmem:[%s3616_s1 + $0x4a8] sm:$0xff] }
 0x124   :  { %1158 = vmatpush1.msra.mxu1 %v1709_v13  ;;  %1074 = vmatprep.subr.mxu0 %v1710_v58  ;;  %v1715_v13 = vld [vmem:[#allocation2 + $0x2a8] sm:$0xff]  ;;  %v1716_v58 = vld [vmem:[%s3616_s1 + $0x4a0] sm:$0xff] }
 0x125   :  { %1159 = vmatprep.subr.mxu1 %v1711_v62  ;;  %1075 = vmatpush1.msra.mxu0 %v1712_v11  ;;  %v1717_v62 = vld [vmem:[#allocation2 + $0x2a0] sm:$0xff]  ;;  %v1718_v11 = vld [vmem:[%s3616_s1 + $0x498] sm:$0xff] }
 0x126   :  { %1160 = vmatpush1.msra.mxu1 %v1713_v42  ;;  %1076 = vmatprep.subr.mxu0 %v1714_v0  ;;  %v1719_v42 = vld [vmem:[#allocation2 + $0x298] sm:$0xff]  ;;  %v1720_v0 = vld [vmem:[%s3616_s1 + $0x490] sm:$0xff] }
 0x127   :  { %1161 = vmatprep.subr.mxu1 %v1715_v13  ;;  %1077 = vmatpush1.msra.mxu0 %v1716_v58  ;;  %v1721_v13 = vld [vmem:[#allocation2 + $0x290] sm:$0xff]  ;;  %v1722_v58 = vld [vmem:[%s3616_s1 + $0x488] sm:$0xff] }
 0x128   :  { %1162 = vmatpush1.msra.mxu1 %v1717_v62  ;;  %1078 = vmatprep.subr.mxu0 %v1718_v11  ;;  %v1723_v62 = vld [vmem:[#allocation2 + $0x288] sm:$0xff]  ;;  %v1724_v11 = vld [vmem:[%s3616_s1 + $0x480] sm:$0xff] }
 0x129   :  { %1163 = vmatprep.subr.mxu1 %v1719_v42  ;;  %1079 = vmatpush1.msra.mxu0 %v1720_v0  ;;  %v1725_v42 = vld [vmem:[#allocation2 + $0x280] sm:$0xff]  ;;  %v1726_v0 = vld [vmem:[%s3616_s1 + $0x478] sm:$0xff] }
 0x12a   :  { %1164 = vmatpush1.msra.mxu1 %v1721_v13  ;;  %1080 = vmatprep.subr.mxu0 %v1722_v58  ;;  %v1727_v13 = vld [vmem:[#allocation2 + $0x278] sm:$0xff]  ;;  %v1728_v58 = vld [vmem:[%s3616_s1 + $0x470] sm:$0xff] }
 0x12b   :  { %1165 = vmatprep.subr.mxu1 %v1723_v62  ;;  %1081 = vmatpush1.msra.mxu0 %v1724_v11  ;;  %v1729_v62 = vld [vmem:[#allocation2 + $0x270] sm:$0xff]  ;;  %v1730_v11 = vld [vmem:[%s3616_s1 + $0x468] sm:$0xff] }
 0x12c   :  { %1166 = vmatpush1.msra.mxu1 %v1725_v42  ;;  %1082 = vmatprep.subr.mxu0 %v1726_v0  ;;  %v1731_v42 = vld [vmem:[#allocation2 + $0x268] sm:$0xff]  ;;  %v1732_v0 = vld [vmem:[%s3616_s1 + $0x460] sm:$0xff] }
 0x12d   :  { %1167 = vmatprep.subr.mxu1 %v1727_v13  ;;  %1083 = vmatpush1.msra.mxu0 %v1728_v58  ;;  %v1733_v13 = vld [vmem:[#allocation2 + $0x260] sm:$0xff]  ;;  %v1734_v58 = vld [vmem:[%s3616_s1 + $0x458] sm:$0xff] }
 0x12e   :  { %1168 = vmatpush1.msra.mxu1 %v1729_v62  ;;  %1084 = vmatprep.subr.mxu0 %v1730_v11  ;;  %v1735_v62 = vld [vmem:[#allocation2 + $0x258] sm:$0xff]  ;;  %v1736_v11 = vld [vmem:[%s3616_s1 + $0x450] sm:$0xff] }
 0x12f   :  { %1169 = vmatprep.subr.mxu1 %v1731_v42  ;;  %1085 = vmatpush1.msra.mxu0 %v1732_v0  ;;  %v1737_v42 = vld [vmem:[#allocation2 + $0x250] sm:$0xff]  ;;  %v1738_v0 = vld [vmem:[%s3616_s1 + $0x448] sm:$0xff] }
 0x130   :  { %1170 = vmatpush1.msra.mxu1 %v1733_v13  ;;  %1086 = vmatprep.subr.mxu0 %v1734_v58  ;;  %v1739_v13 = vld [vmem:[#allocation2 + $0x248] sm:$0xff]  ;;  %v1740_v58 = vld [vmem:[%s3616_s1 + $0x440] sm:$0xff] }
 0x131   :  { %1171 = vmatprep.subr.mxu1 %v1735_v62  ;;  %1087 = vmatpush1.msra.mxu0 %v1736_v11  ;;  %v1741_v62 = vld [vmem:[#allocation2 + $0x240] sm:$0xff]  ;;  %v1742_v11 = vld [vmem:[%s3616_s1 + $0x438] sm:$0xff] }
 0x132   :  { %1172 = vmatpush1.msra.mxu1 %v1737_v42  ;;  %1088 = vmatprep.subr.mxu0 %v1738_v0  ;;  %v1743_v42 = vld [vmem:[#allocation2 + $0x238] sm:$0xff]  ;;  %v1744_v0 = vld [vmem:[%s3616_s1 + $0x430] sm:$0xff] }
 0x133   :  { %1173 = vmatprep.subr.mxu1 %v1739_v13  ;;  %1089 = vmatpush1.msra.mxu0 %v1740_v58  ;;  %v1745_v13 = vld [vmem:[#allocation2 + $0x230] sm:$0xff]  ;;  %v1746_v58 = vld [vmem:[%s3616_s1 + $0x428] sm:$0xff] }
 0x134   :  { %1174 = vmatpush1.msra.mxu1 %v1741_v62  ;;  %1090 = vmatprep.subr.mxu0 %v1742_v11  ;;  %v1747_v62 = vld [vmem:[#allocation2 + $0x228] sm:$0xff]  ;;  %v1748_v11 = vld [vmem:[%s3616_s1 + $0x420] sm:$0xff] }
 0x135   :  { %1175 = vmatprep.subr.mxu1 %v1743_v42  ;;  %1091 = vmatpush1.msra.mxu0 %v1744_v0  ;;  %v1749_v42 = vld [vmem:[#allocation2 + $0x220] sm:$0xff]  ;;  %v1750_v0 = vld [vmem:[%s3616_s1 + $0x418] sm:$0xff] }
 0x136   :  { %1176 = vmatpush1.msra.mxu1 %v1745_v13  ;;  %1092 = vmatprep.subr.mxu0 %v1746_v58  ;;  %v1751_v13 = vld [vmem:[#allocation2 + $0x218] sm:$0xff]  ;;  %v1752_v58 = vld [vmem:[%s3616_s1 + $0x410] sm:$0xff] }
 0x137   :  { %1177 = vmatprep.subr.mxu1 %v1747_v62  ;;  %1093 = vmatpush1.msra.mxu0 %v1748_v11  ;;  %v1753_v62 = vld [vmem:[#allocation2 + $0x210] sm:$0xff]  ;;  %v1754_v11 = vld [vmem:[%s3616_s1 + $0x408] sm:$0xff] }
 0x138   :  { %1178 = vmatpush1.msra.mxu1 %v1749_v42  ;;  %1094 = vmatprep.subr.mxu0 %v1750_v0  ;;  %v1755_v42 = vld [vmem:[#allocation2 + $0x208] sm:$0xff]  ;;  %v1756_v0 = vld [vmem:[%s3616_s1 + $0x400] sm:$0xff] }
 0x139   :  { %1179 = vmatprep.subr.mxu1 %v1751_v13  ;;  %1095 = vmatpush1.msra.mxu0 %v1752_v58  ;;  %v1757_v13 = vld [vmem:[#allocation2 + $0x200] sm:$0xff]  ;;  %v1758_v58 = vld [vmem:[%s3616_s1 + $0x5f8] sm:$0xff] }
 0x13a   :  { %1180 = vmatpush1.msra.mxu1 %v1753_v62  ;;  %1096 = vmatprep.subr.mxu0 %v1754_v11  ;;  %v1759_v62 = vld [vmem:[#allocation2 + $0x3f8] sm:$0xff]  ;;  %v1760_v11 = vld [vmem:[%s3616_s1 + $0x5f0] sm:$0xff] }
 0x13b   :  { %1181 = vmatprep.subr.mxu1 %v1755_v42  ;;  %1097 = vmatpush1.msra.mxu0 %v1756_v0  ;;  %v1761_v42 = vld [vmem:[#allocation2 + $0x3f0] sm:$0xff]  ;;  %v1762_v0 = vld [vmem:[%s3616_s1 + $0x5e8] sm:$0xff] }
 0x13c   :  { %1182 = vmatpush1.msra.mxu1 %v1757_v13  ;;  %1098 = vmatprep.subr.mxu0 %v1758_v58  ;;  %v1763_v13 = vld [vmem:[#allocation2 + $0x3e8] sm:$0xff]  ;;  %v1764_v58 = vld [vmem:[%s3616_s1 + $0x5e0] sm:$0xff] }
 0x13d   :  { %1183 = vmatprep.subr.mxu1 %v1759_v62  ;;  %1099 = vmatpush2.msra.mxu0 %v1760_v11  ;;  %v1765_v62 = vld [vmem:[#allocation2 + $0x3e0] sm:$0xff]  ;;  %v1766_v11 = vld [vmem:[%s3616_s1 + $0x5d8] sm:$0xff] }
 0x13e   :  { %1184 = vmatpush2.msra.mxu1 %v1761_v42  ;;  %1100 = vmatprep.subr.mxu0 %v1762_v0  ;;  %v1767_v42 = vld [vmem:[#allocation2 + $0x3d8] sm:$0xff]  ;;  %v1768_v0 = vld [vmem:[%s3616_s1 + $0x5d0] sm:$0xff] }
 0x13f   :  { %1185 = vmatprep.subr.mxu1 %v1763_v13  ;;  %1101 = vmatpush2.msra.mxu0 %v1764_v58  ;;  %v1769_v13 = vld [vmem:[#allocation2 + $0x3d0] sm:$0xff]  ;;  %v1770_v58 = vld [vmem:[%s3616_s1 + $0x5c8] sm:$0xff] }
 0x140   :  { %1186 = vmatpush2.msra.mxu1 %v1765_v62  ;;  %1102 = vmatprep.subr.mxu0 %v1766_v11  ;;  %v1771_v62 = vld [vmem:[#allocation2 + $0x3c8] sm:$0xff]  ;;  %v1772_v11 = vld [vmem:[%s3616_s1 + $0x5c0] sm:$0xff] }
 0x141   :  { %1187 = vmatprep.subr.mxu1 %v1767_v42  ;;  %1103 = vmatpush2.msra.mxu0 %v1768_v0  ;;  %v1773_v42 = vld [vmem:[#allocation2 + $0x3c0] sm:$0xff]  ;;  %v1774_v0 = vld [vmem:[%s3616_s1 + $0x5b8] sm:$0xff] }
 0x142   :  { %1188 = vmatpush2.msra.mxu1 %v1769_v13  ;;  %1104 = vmatprep.subr.mxu0 %v1770_v58  ;;  %v1775_v13 = vld [vmem:[#allocation2 + $0x3b8] sm:$0xff]  ;;  %v1776_v58 = vld [vmem:[%s3616_s1 + $0x5b0] sm:$0xff] }
 0x143   :  { %1189 = vmatprep.subr.mxu1 %v1771_v62  ;;  %1105 = vmatpush2.msra.mxu0 %v1772_v11  ;;  %v1777_v62 = vld [vmem:[#allocation2 + $0x3b0] sm:$0xff]  ;;  %v1778_v11 = vld [vmem:[%s3616_s1 + $0x5a8] sm:$0xff] }
 0x144   :  { %1190 = vmatpush2.msra.mxu1 %v1773_v42  ;;  %1106 = vmatprep.subr.mxu0 %v1774_v0  ;;  %v1779_v42 = vld [vmem:[#allocation2 + $0x3a8] sm:$0xff]  ;;  %v1780_v0 = vld [vmem:[%s3616_s1 + $0x5a0] sm:$0xff] }
 0x145   :  { %1191 = vmatprep.subr.mxu1 %v1775_v13  ;;  %1107 = vmatpush2.msra.mxu0 %v1776_v58  ;;  %v1781_v13 = vld [vmem:[#allocation2 + $0x3a0] sm:$0xff]  ;;  %v1782_v58 = vld [vmem:[%s3616_s1 + $0x598] sm:$0xff] }
 0x146   :  { %1192 = vmatpush2.msra.mxu1 %v1777_v62  ;;  %1108 = vmatprep.subr.mxu0 %v1778_v11  ;;  %v1783_v62 = vld [vmem:[#allocation2 + $0x398] sm:$0xff]  ;;  %v1784_v11 = vld [vmem:[%s3616_s1 + $0x590] sm:$0xff] }
 0x147   :  { %1193 = vmatprep.subr.mxu1 %v1779_v42  ;;  %1109 = vmatpush2.msra.mxu0 %v1780_v0  ;;  %v1785_v42 = vld [vmem:[#allocation2 + $0x390] sm:$0xff]  ;;  %v1786_v0 = vld [vmem:[%s3616_s1 + $0x588] sm:$0xff] }
 0x148   :  { %1194 = vmatpush2.msra.mxu1 %v1781_v13  ;;  %1110 = vmatprep.subr.mxu0 %v1782_v58  ;;  %v1787_v13 = vld [vmem:[#allocation2 + $0x388] sm:$0xff]  ;;  %v1788_v58 = vld [vmem:[%s3616_s1 + $0x580] sm:$0xff] }
 0x149   :  { %1195 = vmatprep.subr.mxu1 %v1783_v62  ;;  %1111 = vmatpush2.msra.mxu0 %v1784_v11  ;;  %v1789_v62 = vld [vmem:[#allocation2 + $0x380] sm:$0xff]  ;;  %v1790_v11 = vld [vmem:[%s3616_s1 + $0x578] sm:$0xff] }
 0x14a   :  { %1196 = vmatpush2.msra.mxu1 %v1785_v42  ;;  %1112 = vmatprep.subr.mxu0 %v1786_v0  ;;  %v1791_v42 = vld [vmem:[#allocation2 + $0x378] sm:$0xff]  ;;  %v1792_v0 = vld [vmem:[%s3616_s1 + $0x570] sm:$0xff] }
 0x14b   :  { %1197 = vmatprep.subr.mxu1 %v1787_v13  ;;  %1113 = vmatpush2.msra.mxu0 %v1788_v58  ;;  %v1793_v13 = vld [vmem:[#allocation2 + $0x370] sm:$0xff]  ;;  %v1794_v58 = vld [vmem:[%s3616_s1 + $0x568] sm:$0xff] }
 0x14c   :  { %1198 = vmatpush2.msra.mxu1 %v1789_v62  ;;  %1114 = vmatprep.subr.mxu0 %v1790_v11  ;;  %v1795_v62 = vld [vmem:[#allocation2 + $0x368] sm:$0xff]  ;;  %v1796_v11 = vld [vmem:[%s3616_s1 + $0x560] sm:$0xff] }
 0x14d   :  { %1199 = vmatprep.subr.mxu1 %v1791_v42  ;;  %1115 = vmatpush2.msra.mxu0 %v1792_v0  ;;  %v1797_v42 = vld [vmem:[#allocation2 + $0x360] sm:$0xff]  ;;  %v1798_v0 = vld [vmem:[%s3616_s1 + $0x558] sm:$0xff] }
 0x14e   :  { %1200 = vmatpush2.msra.mxu1 %v1793_v13  ;;  %1116 = vmatprep.subr.mxu0 %v1794_v58  ;;  %v1799_v13 = vld [vmem:[#allocation2 + $0x358] sm:$0xff]  ;;  %v1800_v58 = vld [vmem:[%s3616_s1 + $0x550] sm:$0xff] }
 0x14f   :  { %1201 = vmatprep.subr.mxu1 %v1795_v62  ;;  %1117 = vmatpush2.msra.mxu0 %v1796_v11  ;;  %v1801_v62 = vld [vmem:[#allocation2 + $0x350] sm:$0xff]  ;;  %v1802_v11 = vld [vmem:[%s3616_s1 + $0x548] sm:$0xff] }
 0x150   :  { %1202 = vmatpush2.msra.mxu1 %v1797_v42  ;;  %1118 = vmatprep.subr.mxu0 %v1798_v0  ;;  %v1803_v42 = vld [vmem:[#allocation2 + $0x348] sm:$0xff]  ;;  %v1804_v0 = vld [vmem:[%s3616_s1 + $0x540] sm:$0xff] }
 0x151   :  { %1203 = vmatprep.subr.mxu1 %v1799_v13  ;;  %1119 = vmatpush2.msra.mxu0 %v1800_v58  ;;  %v1805_v13 = vld [vmem:[#allocation2 + $0x340] sm:$0xff]  ;;  %v1806_v58 = vld [vmem:[%s3616_s1 + $0x538] sm:$0xff] }
 0x152   :  { %1204 = vmatpush2.msra.mxu1 %v1801_v62  ;;  %1120 = vmatprep.subr.mxu0 %v1802_v11  ;;  %v1807_v62 = vld [vmem:[#allocation2 + $0x338] sm:$0xff]  ;;  %v1808_v11 = vld [vmem:[%s3616_s1 + $0x530] sm:$0xff] }
 0x153   :  { %1205 = vmatprep.subr.mxu1 %v1803_v42  ;;  %1121 = vmatpush2.msra.mxu0 %v1804_v0  ;;  %v1809_v42 = vld [vmem:[#allocation2 + $0x330] sm:$0xff]  ;;  %v3431_v0 = vld [vmem:[%s3615_s0 + $0x38] sm:$0x3f] }
 0x154   :  { %1206 = vmatpush2.msra.mxu1 %v1805_v13  ;;  %1122 = vmatprep.subr.mxu0 %v1806_v58  ;;  %3712 = vst [vmem:[#allocation48_spill] sm:$0xff] %v3431_v0  ;;  %v1811_v13 = vld [vmem:[%s3616_s1 + $0x528] sm:$0xff] }
 0x155   :  { %1207 = vmatprep.subr.mxu1 %v1807_v62  ;;  %1123 = vmatpush2.msra.mxu0 %v1808_v11  ;;  %v1812_v58 = vld [vmem:[#allocation2 + $0x328] sm:$0xff]  ;;  %v1814_v62 = vld [vmem:[%s3616_s1 + $0x520] sm:$0xff] }
 0x156   :  { %1208 = vmatpush2.msra.mxu1 %v1809_v42  ;;  %982 = vmatprep.mubr.f32.mxu0 %v2550_v20  ;;  %v3441_v20 = vld [vmem:[%s3615_s0 + $0x30] sm:$0x3f]  ;;  %v1815_v11 = vld [vmem:[#allocation2 + $0x320] sm:$0xff]  ;;  %v1816_v42 = vld [vmem:[%s3616_s1 + $0x518] sm:$0xff] }
 0x157   :  { %1059 = vmatprep.mubr.f32.mxu1 %v3431_v0  ;;  %1124 = vmatprep.subr.mxu0 %v1811_v13  ;;  %3713 = vst [vmem:[#allocation49_spill] sm:$0xff] %v3441_v20  ;;  %v3453_v13 = vld [vmem:[%s3615_s0 + $0x68] sm:$0xff]  ;;  %v1825_v0 = vld [vmem:[#allocation2 + $0xf8] sm:$0xff] }
 0x158   :  { %1209 = vmatprep.subr.mxu1 %v1812_v58  ;;  %983 = vmatmul.mubr.f32.gmra.mxu0 %v2555_v23  ;;  %v1817_v23 = vld [vmem:[#allocation2 + $0x318] sm:$0xff]  ;;  %3714 = vst [vmem:[#allocation50_spill] sm:$0xff] %v3453_v13  ;;  %v1818_v58 = vld [vmem:[%s3616_s1 + $0x510] sm:$0xff] }
 0x159   :  { %1060 = vmatmul.mubr.f32.gmra.mxu1 %v3441_v20  ;;  %1125 = vmatpush2.msra.mxu0 %v1814_v62  ;;  %v1819_v62 = vld [vmem:[#allocation2 + $0x310] sm:$0xff]  ;;  %v1822_v20 = vld [vmem:[%s3616_s1 + $0x500] sm:$0xff] }
 0x15a   :  { %1210 = vmatpush2.msra.mxu1 %v1815_v11  ;;  %1126 = vmatprep.subr.mxu0 %v1816_v42  ;;  %v3461_v11 = vld [vmem:[%s3615_s0 + $0x60] sm:$0xff]  ;;  %v1820_v42 = vld [vmem:[%s3616_s1 + $0x508] sm:$0xff] }
 0x15b   :  { %1211 = vmatprep.subr.mxu1 %v1817_v23  ;;  %1127 = vmatpush2.msra.mxu0 %v1818_v58  ;;  %3715 = vst [vmem:[#allocation51_spill] sm:$0xff] %v3461_v11  ;;  %v1821_v23 = vld [vmem:[#allocation2 + $0x308] sm:$0xff]  ;;  %v1823_v58 = vld [vmem:[#allocation2 + $0x300] sm:$0xff] }
 0x15c   :  { %1212 = vmatpush2.msra.mxu1 %v1819_v62  ;;  %1128 = vmatprep.subr.mxu0 %v1820_v42  ;;  %v1824_v62 = vld [vmem:[%s3615_s0 + $0x48] sm:$0xff]  ;;  %v1826_v42 = vld [vmem:[#allocation2 + $0x4f8] sm:$0xff] }
 0x15d   :  { %1213 = vmatprep.subr.mxu1 %v1821_v23  ;;  %1129 = vmatpush2.msra.mxu0 %v1822_v20  ;;  %v1827_v23 = vld [vmem:[%s3615_s0 + $0x40] sm:$0xff]  ;;  %v3480_v20 = vld [vmem:[%s3615_s0 + $0x78] sm:$0x3f] }
 0x15e   :  { %1130 = vmatprep.mubr.f32.mxu0 %v3453_v13  ;;  %1214 = vmatpush2.msra.mxu1 %v1823_v58  ;;  %3716 = vst [vmem:[#allocation52_spill] sm:$0xff] %v3480_v20  ;;  %v1828_v58 = vld [vmem:[#allocation2 + $0xf0] sm:$0xff] }
 0x15f   :  { %1131 = vmatmul.mubr.f32.vlgmr.msra.gmra.mxu0 %v3461_v11  ;;  %1215 = vmatprep.mubr.f32.mxu1 %v1824_v62  ;;  %v1829_v11 = vld [vmem:[#allocation2 + $0x4f0] sm:$0xff]  ;;  %v1830_v62 = vld [vmem:[#allocation2 + $0xe8] sm:$0xff] }
 0x160   :  { %1228 = vmatprep.subr.mxu0 %v1825_v0  ;;  %1305 = vmatprep.subr.mxu1 %v1826_v42  ;;  %v3485_v0 = vld [vmem:[%s3615_s0 + $0x70] sm:$0x3f]  ;;  %v1831_v42 = vld [vmem:[#allocation2 + $0x4e8] sm:$0xff] }
 0x161   :  { %1216 = vmatmul.mubr.f32.vlgmr.msra.gmra.mxu1 %v1827_v23  ;;  %1229 = vmatpush1.msra.mxu0 %v1828_v58  ;;  %3717 = vst [vmem:[#allocation53_spill] sm:$0xff] %v3485_v0  ;;  %v1832_v23 = vld [vmem:[#allocation2 + $0xe0] sm:$0xff]  ;;  %v1834_v58 = vld [vmem:[#allocation2 + $0xd8] sm:$0xff]  ;;  %v1836_v13 = vld [vmem:[#allocation2 + $0xd0] sm:$0xff] }
 0x162   :  { %1306 = vmatpush1.msra.mxu1 %v1829_v11  ;;  %1230 = vmatprep.subr.mxu0 %v1830_v62  ;;  %v1835_v11 = vld [vmem:[#allocation2 + $0x4d8] sm:$0xff]  ;;  %v1839_v62 = vld [vmem:[#allocation2 + $0x4c8] sm:$0xff] }
 0x163   :  { %1307 = vmatprep.subr.mxu1 %v1831_v42  ;;  %1136 = vmatprep.mubr.f32.mxu0 %v3480_v20  ;;  %v1840_v42 = vld [vmem:[#allocation2 + $0xc0] sm:$0xff] }
 0x164   :  { %1231 = vmatpush1.msra.mxu0 %v1832_v23  ;;  %1308 = vmatpush1.msra.mxu1 %v1833_v59  ;;  %v1841_v20 = vld [vmem:[#allocation2 + $0x4c0] sm:$0xff]  ;;  %v1842_v23 = vld [vmem:[#allocation2 + $0xb8] sm:$0xff] }
 0x165   :  { %1137 = vmatmul.mubr.f32.gmra.mxu0 %v3485_v0  ;;  %1232 = vmatprep.subr.mxu0 %v1834_v58  ;;  %v1843_v59 = vld [vmem:[#allocation2 + $0x4b8] sm:$0xff]  ;;  %v1844_v0 = vld [vmem:[#allocation2 + $0xb0] sm:$0xff] }
 0x166   :  { %1309 = vmatprep.subr.mxu1 %v1835_v11  ;;  %1233 = vmatpush1.msra.mxu0 %v1836_v13  ;;  %v1845_v58 = vld [vmem:[#allocation2 + $0x4b0] sm:$0xff]  ;;  %v1846_v11 = vld [vmem:[#allocation2 + $0xa8] sm:$0xff] }
 0x167   :  { %1310 = vmatpush1.msra.mxu1 %v1837_v44  ;;  %1234 = vmatprep.subr.mxu0 %v1838_v39  ;;  %v1847_v13 = vld [vmem:[#allocation2 + $0x4a8] sm:$0xff]  ;;  %v1848_v44 = vld [vmem:[#allocation2 + $0xa0] sm:$0xff] }
 0x168   :  { %1311 = vmatprep.subr.mxu1 %v1839_v62  ;;  %1235 = vmatpush1.msra.mxu0 %v1840_v42  ;;  %v1849_v39 = vld [vmem:[#allocation2 + $0x4a0] sm:$0xff]  ;;  %v1850_v62 = vld [vmem:[#allocation2 + $0x98] sm:$0xff] }
 0x169   :  { %1312 = vmatpush1.msra.mxu1 %v1841_v20  ;;  %1236 = vmatprep.subr.mxu0 %v1842_v23  ;;  %v1851_v42 = vld [vmem:[#allocation2 + $0x498] sm:$0xff]  ;;  %v1852_v20 = vld [vmem:[#allocation2 + $0x90] sm:$0xff] }
 0x16a   :  { %1313 = vmatprep.subr.mxu1 %v1843_v59  ;;  %1237 = vmatpush1.msra.mxu0 %v1844_v0  ;;  %v1853_v23 = vld [vmem:[#allocation2 + $0x490] sm:$0xff]  ;;  %v1854_v59 = vld [vmem:[#allocation2 + $0x88] sm:$0xff] }
 0x16b   :  { %1314 = vmatpush1.msra.mxu1 %v1845_v58  ;;  %1238 = vmatprep.subr.mxu0 %v1846_v11  ;;  %v1855_v0 = vld [vmem:[#allocation2 + $0x488] sm:$0xff]  ;;  %v1856_v58 = vld [vmem:[#allocation2 + $0x80] sm:$0xff] }
 0x16c   :  { %1315 = vmatprep.subr.mxu1 %v1847_v13  ;;  %1239 = vmatpush1.msra.mxu0 %v1848_v44  ;;  %v1857_v11 = vld [vmem:[#allocation2 + $0x480] sm:$0xff]  ;;  %v1858_v13 = vld [vmem:[#allocation2 + $0x78] sm:$0xff] }
 0x16d   :  { %1316 = vmatpush1.msra.mxu1 %v1849_v39  ;;  %1240 = vmatprep.subr.mxu0 %v1850_v62  ;;  %v1859_v44 = vld [vmem:[#allocation2 + $0x478] sm:$0xff]  ;;  %v322_v62 = vpop.f32.mrf.mxu1 }
 0x16e   :  { %1317 = vmatprep.subr.mxu1 %v1851_v42  ;;  %1241 = vmatpush1.msra.mxu0 %v1852_v20 }
 0x16f   :  { %1318 = vmatpush1.msra.mxu1 %v1853_v23  ;;  %1242 = vmatprep.subr.mxu0 %v1854_v59  ;;  %v324_v20 = vpop.f32.mrf.mxu1 }
 0x170   :  { %1319 = vmatprep.subr.mxu1 %v1855_v0  ;;  %1243 = vmatpush1.msra.mxu0 %v1856_v58 }
 0x171   :  { %1320 = vmatpush1.msra.mxu1 %v1857_v11  ;;  %1244 = vmatprep.subr.mxu0 %v1858_v13  ;;  %v328_v23 = vpop.f32.mrf.mxu1 }
 0x172   :  { %1321 = vmatprep.subr.mxu1 %v1859_v44  ;;  %1245 = vmatpush1.msra.mxu0 %v2559_v48  ;;  %v3718_v48 = vld [vmem:[#allocation5_spill] sm:$0xff] }
 0x173   :  { %1322 = vmatpush1.msra.mxu1 %v2561_v49  ;;  %1246 = vmatprep.subr.mxu0 %v2563_v50  ;;  %v3719_v49 = vld [vmem:[#allocation6_spill] sm:$0xff]  ;;  %v3720_v50 = vld [vmem:[#allocation7_spill] sm:$0xff]  ;;  %v330_v0 = vpop.f32.mrf.mxu1 }
 0x174   :  { %1323 = vmatprep.subr.mxu1 %v2565_v51  ;;  %1247 = vmatpush1.msra.mxu0 %v2567_v52  ;;  %v3721_v51 = vld [vmem:[#allocation8_spill] sm:$0xff]  ;;  %v3722_v52 = vld [vmem:[#allocation9_spill] sm:$0xff] }
 0x175   :  { %1324 = vmatpush1.msra.mxu1 %v2569_v53  ;;  %1248 = vmatprep.subr.mxu0 %v2573_v54  ;;  %v3723_v53 = vld [vmem:[#allocation10_spill] sm:$0xff]  ;;  %v3724_v54 = vld [vmem:[#allocation11_spill] sm:$0xff]  ;;  %v674_v11 = vpop.f32.mrf.mxu1 }
 0x176   :  { %1325 = vmatprep.subr.mxu1 %v2575_v55  ;;  %1249 = vmatpush1.msra.mxu0 %v2579_v56  ;;  %v3725_v55 = vld [vmem:[#allocation12_spill] sm:$0xff]  ;;  %v3726_v56 = vld [vmem:[#allocation13_spill] sm:$0xff] }
 0x177   :  { %1326 = vmatpush1.msra.mxu1 %v2581_v57  ;;  %1250 = vmatprep.subr.mxu0 %v2585_v60  ;;  %v3727_v57 = vld [vmem:[#allocation14_spill] sm:$0xff]  ;;  %v3728_v60 = vld [vmem:[#allocation15_spill] sm:$0xff]  ;;  %v676_v44 = vpop.f32.mrf.mxu1 }
 0x178   :  { %1327 = vmatprep.subr.mxu1 %v2587_v61  ;;  %1251 = vmatpush1.msra.mxu0 %v2591_v1  ;;  %v3729_v61 = vld [vmem:[#allocation16_spill] sm:$0xff]  ;;  %v3730_v1 = vld [vmem:[#allocation17_spill] sm:$0xff] }
 0x179   :  { %1328 = vmatpush1.msra.mxu1 %v2593_v3  ;;  %1252 = vmatprep.subr.mxu0 %v2597_v4  ;;  %v3731_v3 = vld [vmem:[#allocation18_spill] sm:$0xff]  ;;  %v3732_v4 = vld [vmem:[#allocation19_spill] sm:$0xff] }
 0x17a   :  { %1329 = vmatprep.subr.mxu1 %v2599_v5  ;;  %1253 = vmatpush1.msra.mxu0 %v2603_v6  ;;  %v3733_v5 = vld [vmem:[#allocation20_spill] sm:$0xff]  ;;  %v3734_v6 = vld [vmem:[#allocation21_spill] sm:$0xff] }
 0x17b   :  { %1330 = vmatpush1.msra.mxu1 %v2605_v7  ;;  %1254 = vmatprep.subr.mxu0 %v2609_v8  ;;  %v3735_v7 = vld [vmem:[#allocation22_spill] sm:$0xff]  ;;  %v3736_v8 = vld [vmem:[#allocation23_spill] sm:$0xff] }
 0x17c   :  { %1331 = vmatprep.subr.mxu1 %v2611_v9  ;;  %1255 = vmatpush1.msra.mxu0 %v2615_v10  ;;  %v3737_v9 = vld [vmem:[#allocation24_spill] sm:$0xff]  ;;  %v3738_v10 = vld [vmem:[#allocation25_spill] sm:$0xff] }
 0x17d   :  { %1332 = vmatpush1.msra.mxu1 %v2617_v12  ;;  %1256 = vmatprep.subr.mxu0 %v2621_v14  ;;  %v3739_v12 = vld [vmem:[#allocation26_spill] sm:$0xff]  ;;  %v3740_v14 = vld [vmem:[#allocation27_spill] sm:$0xff] }
 0x17e   :  { %1333 = vmatprep.subr.mxu1 %v2623_v15  ;;  %1257 = vmatpush1.msra.mxu0 %v2627_v16  ;;  %v3741_v15 = vld [vmem:[#allocation28_spill] sm:$0xff]  ;;  %v3742_v16 = vld [vmem:[#allocation29_spill] sm:$0xff] }
 0x17f   :  { %1334 = vmatpush1.msra.mxu1 %v2629_v17  ;;  %1258 = vmatprep.subr.mxu0 %v2633_v18  ;;  %v3743_v17 = vld [vmem:[#allocation30_spill] sm:$0xff]  ;;  %v3744_v18 = vld [vmem:[#allocation31_spill] sm:$0xff] }
 0x180   :  { %1335 = vmatprep.subr.mxu1 %v2635_v19  ;;  %1259 = vmatpush1.msra.mxu0 %v2639_v21  ;;  %v3745_v19 = vld [vmem:[#allocation32_spill] sm:$0xff]  ;;  %v3746_v21 = vld [vmem:[#allocation33_spill] sm:$0xff] }
 0x181   :  { %1336 = vmatpush1.msra.mxu1 %v2641_v22  ;;  %1260 = vmatprep.subr.mxu0 %v2645_v63  ;;  %v3747_v22 = vld [vmem:[#allocation34_spill] sm:$0xff]  ;;  %v3748_v63 = vld [vmem:[#allocation35_spill] sm:$0xff] }
 0x182   :  { %1337 = vmatprep.subr.mxu1 %v2647_v24  ;;  %1261 = vmatpush2.msra.mxu0 %v2651_v2  ;;  %v3749_v24 = vld [vmem:[#allocation36_spill] sm:$0xff]  ;;  %v3750_v2 = vld [vmem:[#allocation37_spill] sm:$0xff] }
 0x183   :  { %1338 = vmatpush2.msra.mxu1 %v2653_v25  ;;  %1262 = vmatprep.subr.mxu0 %v2657_v26  ;;  %v3751_v25 = vld [vmem:[#allocation38_spill] sm:$0xff]  ;;  %v3752_v26 = vld [vmem:[#allocation39_spill] sm:$0xff] }
 0x184   :  { %1339 = vmatprep.subr.mxu1 %v2659_v27  ;;  %1263 = vmatpush2.msra.mxu0 %v2663_v28  ;;  %v3753_v27 = vld [vmem:[#allocation40_spill] sm:$0xff]  ;;  %v3754_v28 = vld [vmem:[#allocation41_spill] sm:$0xff] }
 0x185   :  { %1340 = vmatpush2.msra.mxu1 %v2665_v29  ;;  %1264 = vmatprep.subr.mxu0 %v2669_v30  ;;  %v1860_v29 = vld [vmem:[%s3615_s0 + $0x58] sm:$0x3f]  ;;  %v3755_v30 = vld [vmem:[#allocation42_spill] sm:$0xff] }
 0x186   :  { %1341 = vmatprep.subr.mxu1 %v2671_v31  ;;  %1265 = vmatpush2.msra.mxu0 %v2675_v32  ;;  %v1861_v31 = vld [vmem:[%s3615_s0 + $0x50] sm:$0x3f] }
 0x187   :  { %1342 = vmatpush2.msra.mxu1 %v2677_v33  ;;  %1266 = vmatprep.subr.mxu0 %v2681_v34  ;;  %v3756_v32 = vld [vmem:[#allocation43_spill] sm:$0xff]  ;;  %v3757_v33 = vld [vmem:[#allocation44_spill] sm:$0xff]  ;;  %v3758_v34 = vld [vmem:[#allocation46_spill] sm:$0xff] }
 0x188   :  { %1343 = vmatprep.subr.mxu1 %v2683_v35  ;;  %1267 = vmatpush2.msra.mxu0 %v2687_v36  ;;  %v3759_v35 = vld [vmem:[#allocation45_spill] sm:$0xff]  ;;  %v3760_v36 = vld [vmem:[#allocation50_spill] sm:$0xff] }
 0x189   :  { %1344 = vmatpush2.msra.mxu1 %v3718_v48  ;;  %1268 = vmatprep.subr.mxu0 %v3719_v49 }
 0x18a   :  { %1345 = vmatprep.subr.mxu1 %v3720_v50  ;;  %1269 = vmatpush2.msra.mxu0 %v3721_v51 }
 0x18b   :  { %1346 = vmatpush2.msra.mxu1 %v3722_v52  ;;  %1270 = vmatprep.subr.mxu0 %v3723_v53 }
 0x18c   :  { %1347 = vmatprep.subr.mxu1 %v3724_v54  ;;  %1271 = vmatpush2.msra.mxu0 %v3725_v55 }
 0x18d   :  { %1348 = vmatpush2.msra.mxu1 %v3726_v56  ;;  %1272 = vmatprep.subr.mxu0 %v3727_v57 }
 0x18e   :  { %1349 = vmatprep.subr.mxu1 %v3728_v60  ;;  %1273 = vmatpush2.msra.mxu0 %v3729_v61 }
 0x18f   :  { %1350 = vmatpush2.msra.mxu1 %v3730_v1  ;;  %1274 = vmatprep.subr.mxu0 %v3731_v3 }
 0x190   :  { %1351 = vmatprep.subr.mxu1 %v3732_v4  ;;  %1275 = vmatpush2.msra.mxu0 %v3733_v5 }
 0x191   :  { %1352 = vmatpush2.msra.mxu1 %v3734_v6  ;;  %1276 = vmatprep.subr.mxu0 %v3735_v7 }
 0x192   :  { %1353 = vmatprep.subr.mxu1 %v3736_v8  ;;  %1277 = vmatpush2.msra.mxu0 %v3737_v9 }
 0x193   :  { %1354 = vmatpush2.msra.mxu1 %v3738_v10  ;;  %1278 = vmatprep.subr.mxu0 %v3739_v12  ;;  %v680_v48 = vpop.f32.mrf.mxu1 }
 0x194   :  { %1355 = vmatprep.subr.mxu1 %v3740_v14  ;;  %1279 = vmatpush2.msra.mxu0 %v3741_v15  ;;  %v1392_v14 = vlaneseq }
 0x195   :  { %1356 = vmatpush2.msra.mxu1 %v3742_v16  ;;  %1280 = vmatprep.subr.mxu0 %v3743_v17  ;;  %v682_v51 = vpop.f32.mrf.mxu1 }
 0x196   :  { %1357 = vmatprep.subr.mxu1 %v3744_v18  ;;  %1281 = vmatpush2.msra.mxu0 %v3745_v19 }
 0x197   :  { %1358 = vmatpush2.msra.mxu1 %v3746_v21  ;;  %1282 = vmatprep.subr.mxu0 %v3747_v22  ;;  %v1393_v21 = vshrl.u32 %v1392_v14, 7 }
 0x198   :  { %1359 = vmatprep.subr.mxu1 %v3748_v63  ;;  %1283 = vmatpush2.msra.mxu0 %v2783_v46  ;;  %v245_v46 = vpop.f32.mrf.mxu0 }
 0x199   :  { %1360 = vmatpush2.msra.mxu1 %v3749_v24  ;;  %1284 = vmatprep.subr.mxu0 %v3750_v2  ;;  %v893_v53 = vpop.f32.mrf.mxu1  ;;  %v323_v63 = vadd.f32 %v322_v62, %v245_v46 }
 0x19a   :  { %1361 = vmatprep.subr.mxu1 %v3751_v25  ;;  %1285 = vmatpush2.msra.mxu0 %v3752_v26 }
 0x19b   :  { %1362 = vmatpush2.msra.mxu1 %v3753_v27  ;;  %1286 = vmatprep.subr.mxu0 %v2801_v41  ;;  %v3761_v41 = vld [vmem:[#allocation47_spill] sm:$0xff]  ;;  %v895_v55 = vpop.f32.mrf.mxu1 }
 0x19c   :  { %1363 = vmatprep.subr.mxu1 %v3754_v28  ;;  %1221 = vmatprep.mubr.f32.mxu1 %v1860_v29 }
 0x19d   :  { %1287 = vmatpush2.msra.mxu0 %v2807_v43  ;;  %1364 = vmatpush2.msra.mxu1 %v3755_v30  ;;  %v3762_v43 = vld [vmem:[#allocation51_spill] sm:$0xff] }
 0x19e   :  { %1288 = vmatprep.subr.mxu0 %v2813_v45  ;;  %1222 = vmatmul.mubr.f32.gmra.mxu1 %v1861_v31  ;;  %v3763_v45 = vld [vmem:[#allocation48_spill] sm:$0xff] }
 0x19f   :  { %1365 = vmatprep.subr.mxu1 %v2817_v47  ;;  %1289 = vmatpush2.msra.mxu0 %v2821_v38  ;;  %v3764_v38 = vld [vmem:[#allocation52_spill] sm:$0xff]  ;;  %v247_v47 = vpop.f32.mrf.mxu0 }
 0x1a0   :  { %1366 = vmatpush2.msra.mxu1 %v2823_v37  ;;  %1290 = vmatprep.subr.mxu0 %v2827_v40  ;;  %v3765_v37 = vld [vmem:[#allocation49_spill] sm:$0xff]  ;;  %v899_v57 = vpop.f32.mrf.mxu1  ;;  %v325_v24 = vadd.f32 %v324_v20, %v247_v47 }
 0x1a1   :  { %1367 = vmatprep.subr.mxu1 %v3756_v32  ;;  %1291 = vmatpush2.msra.mxu0 %v3757_v33  ;;  %v3766_v40 = vld [vmem:[#allocation53_spill] sm:$0xff]  ;;  %v251_v39 = vpop.f32.mrf.mxu0 }
 0x1a2   :  { %1292 = vmatprep.mubr.f32.mxu0 %v3758_v34  ;;  %1368 = vmatpush2.msra.mxu1 %v3759_v35  ;;  %v901_v61 = vpop.f32.mrf.mxu1  ;;  %v329_v27 = vadd.f32 %v328_v23, %v251_v39  ;;  %v1394_v35 = vsub.s32 0, %v1393_v21 }
 0x1a3   :  { %1369 = vmatprep.mubr.f32.mxu1 %v3760_v36  ;;  %1293 = vmatmul.mubr.f32.vlgmr.msra.gmra.mxu0 %v3761_v41  ;;  %v253_v42 = vpop.f32.mrf.mxu0 }
 0x1a4   :  { %1370 = vmatmul.mubr.f32.vlgmr.msra.gmra.mxu1 %v3762_v43  ;;  %1298 = vmatprep.mubr.f32.mxu0 %v3763_v45  ;;  %v331_v28 = vadd.f32 %v330_v0, %v253_v42 }
 0x1a5   :  { %1375 = vmatprep.mubr.f32.mxu1 %v3764_v38  ;;  %v464_v59 = vpop.f32.mrf.mxu0 }
 0x1a6   :  { %v475_v32 = vadd.f32 %v464_v59, %v323_v63 }
 0x1a7   :  { %1299 = vmatmul.mubr.f32.gmra.mxu0 %v3765_v37  ;;  %v466_v58 = vpop.f32.mrf.mxu0  ;;  %v1390_v37 = vld [vmem:[%s3618_s3] sm:$0x3] }
 0x1a8   :  { %1376 = vmatmul.mubr.f32.gmra.mxu1 %v3766_v40  ;;  %v476_v36 = vadd.f32 %v466_v58, %v325_v24  ;;  %v1398_v40 = vsub.s32 1, %v1393_v21 }
 0x1a9   :  { %v470_v13 = vpop.f32.mrf.mxu0 }
 0x1aa   :  { %v477_v46 = vadd.f32 %v470_v13, %v329_v27 }
 0x1ab   :  { %v3597_v49 = vpop.f32.mrf.mxu0 }
 0x1ad   :  { %v751_v50 = vpop.f32.mrf.mxu0 }
 0x1ae   :  { %v752_v15 = vadd.f32 %v751_v50, %v674_v11 }
 0x1af   :  { %v753_v52 = vpop.f32.mrf.mxu0 }
 0x1b0   :  { %v754_v17 = vadd.f32 %v753_v52, %v676_v44  ;;  %v904_v2 = vadd.f32 %v893_v53, %v752_v15 }
 0x1b1   :  { %v757_v54 = vpop.f32.mrf.mxu0 }
 0x1b2   :  { %v758_v22 = vadd.f32 %v757_v54, %v680_v48  ;;  %v905_v29 = vadd.f32 %v895_v55, %v754_v17  ;;  %v908_v47 = vmax.f32 %v475_v32, %v904_v2  ;;  %v1395_v48 = vrot.slane %v1390_v37, %v1394_v35 }
 0x1b3   :  { %v759_v56 = vpop.f32.mrf.mxu0  ;;  %v1399_v54 = vrot.slane %v1390_v37, %v1398_v40 }
 0x1b4   :  { %v760_v30 = vadd.f32 %v759_v56, %v682_v51  ;;  %v906_v41 = vadd.f32 %v899_v57, %v758_v22  ;;  %v909_v42 = vmax.f32 %v476_v36, %v905_v29  ;;  %v478_v51 = vadd.f32 %v3597_v49, %v331_v28 }
 0x1b6   :  { %v907_v20 = vadd.f32 %v901_v61, %v760_v30  ;;  %v910_v52 = vmax.f32 %v477_v46, %v906_v41 }
 0x1b8   :  { %v911_v61 = vmax.f32 %v478_v51, %v907_v20 }
 0x1db   :  { %v978_v60 = vpop.f32.mrf.mxu0 }
 0x1dc   :  { %v1055_v3 = vpop.f32.mrf.mxu1 }
 0x1dd   :  { %v980_v1 = vpop.f32.mrf.mxu0  ;;  %v1056_v25 = vadd.f32 %v1055_v3, %v978_v60 }
 0x1de   :  { %v1057_v5 = vpop.f32.mrf.mxu1 }
 0x1df   :  { %v1058_v33 = vadd.f32 %v1057_v5, %v980_v1 }
 0x218   :  { %v984_v4 = vpop.f32.mrf.mxu0 }
 0x219   :  { %v1061_v7 = vpop.f32.mrf.mxu1 }
 0x21a   :  { %v986_v6 = vpop.f32.mrf.mxu0  ;;  %v1062_v43 = vadd.f32 %v1061_v7, %v984_v4 }
 0x21b   :  { %v1063_v9 = vpop.f32.mrf.mxu1 }
 0x21c   :  { %v1064_v23 = vadd.f32 %v1063_v9, %v986_v6 }
 0x21f   :  { %v1132_v8 = vpop.f32.mrf.mxu0 }
 0x220   :  { %v1143_v34 = vadd.f32 %v1132_v8, %v1056_v25 }
 0x221   :  { %v1217_v10 = vpop.f32.mrf.mxu1  ;;  %v1134_v12 = vpop.f32.mrf.mxu0 }
 0x222   :  { %v1144_v39 = vadd.f32 %v1134_v12, %v1058_v33  ;;  %v1147_v58 = vmax.f32 %v908_v47, %v1143_v34 }
 0x223   :  { %v1219_v16 = vpop.f32.mrf.mxu1 }
 0x224   :  { %v1148_v56 = vmax.f32 %v909_v42, %v1144_v39 }
 0x225   :  { %v1138_v18 = vpop.f32.mrf.mxu0 }
 0x226   :  { %v1145_v59 = vadd.f32 %v1138_v18, %v1062_v43 }
 0x227   :  { %v1140_v31 = vpop.f32.mrf.mxu0 }
 0x228   :  { %v1146_v53 = vadd.f32 %v1140_v31, %v1064_v23  ;;  %v1149_v3 = vmax.f32 %v910_v52, %v1145_v59 }
 0x22a   :  { %v1150_v9 = vmax.f32 %v911_v61, %v1146_v53 }
 0x25e   :  { %v1223_v19 = vpop.f32.mrf.mxu1 }
 0x260   :  { %v1225_v26 = vpop.f32.mrf.mxu1 }
 0x263   :  { %v1294_v45 = vpop.f32.mrf.mxu0 }
 0x264   :  { %v1371_v38 = vpop.f32.mrf.mxu1  ;;  %v1295_v62 = vadd.f32 %v1294_v45, %v1217_v10 }
 0x265   :  { %v1296_v0 = vpop.f32.mrf.mxu0 }
 0x266   :  { %v1373_v11 = vpop.f32.mrf.mxu1  ;;  %v1382_v44 = vadd.f32 %v1371_v38, %v1295_v62  ;;  %v1297_v50 = vadd.f32 %v1296_v0, %v1219_v16 }
 0x267   :  { %v1300_v55 = vpop.f32.mrf.mxu0 }
 0x268   :  { %v1377_v13 = vpop.f32.mrf.mxu1  ;;  %v1386_v57 = vmax.f32 %v1147_v58, %v1382_v44  ;;  %v1383_v60 = vadd.f32 %v1373_v11, %v1297_v50  ;;  %v1301_v1 = vadd.f32 %v1300_v55, %v1223_v19 }
 0x269   :  { %v1302_v4 = vpop.f32.mrf.mxu0 }
 0x26a   :  { %v1402_v5 = vadd.f32 %v1395_v48, %v1386_v57  ;;  %v1387_v6 = vmax.f32 %v1148_v56, %v1383_v60  ;;  %v1384_v7 = vadd.f32 %v1377_v13, %v1301_v1  ;;  %v1303_v8 = vadd.f32 %v1302_v4, %v1225_v26  ;;  %v1379_v10 = vpop.f32.mrf.mxu1 }
 0x26c   :  { %v1406_v12 = vmax.f32 %v1402_v5, 0.0  ;;  %v1403_v49 = vadd.f32 %v1399_v54, %v1387_v6  ;;  %v1388_v14 = vmax.f32 %v1149_v3, %v1384_v7  ;;  %v1385_v15 = vadd.f32 %v1379_v10, %v1303_v8 }
 0x26e   :  { %1410 = vst [vmem:[%s3619_s4] sm:$0xff] %v1406_v12  ;;  %v1407_v16 = vmax.f32 %v1403_v49, 0.0  ;;  %v1404_v17 = vadd.f32 %v1395_v48, %v1388_v14  ;;  %v1389_v18 = vmax.f32 %v1150_v9, %v1385_v15 }
 0x270   :  { %1411 = vst [vmem:[%s3619_s4 + $0x8] sm:$0xff] %v1407_v16  ;;  %v1408_v19 = vmax.f32 %v1404_v17, 0.0  ;;  %v1405_v21 = vadd.f32 %v1399_v54, %v1389_v18 }
 0x272   :  { %1412 = vst [vmem:[%s3619_s4 + $0x10] sm:$0x3f] %v1408_v19  ;;  %v1409_v22 = vmax.f32 %v1405_v21, 0.0 }
 0x274   :  { %1413 = vst [vmem:[%s3619_s4 + $0x18] sm:$0x3f] %v1409_v22 }
 0x275   :  { %1418 = vsyncpa [#allocation3], 1 }

</bundles_post_ra>
